<compile_context>
chip_gen: v6e
topology: v6e:2x2x1
jax: 0.10.0
libtpu: 0.0.40
codegen_flags: <defaults>
</compile_context>

<pallas_src>
import functools

import jax
import jax.numpy as jnp
from jax import lax
from jax.experimental import pallas as pl
from jax.experimental.pallas import tpu as pltpu

_VMEM_LIMIT = 48 * 1024 * 1024      # safe on v7x (64 MiB/TC) and generous on v5e/v6e
_LANE_TILE_TARGET = 4096            # lane tile for the (B, C, S) point-wise kernels
_CMUL_TM_TARGET = 512               # lane tile for the spectral mode-mixing kernel
_EPS = 1e-5


def _cparams():
    return pltpu.CompilerParams(
        dimension_semantics=("parallel", "parallel"),
        vmem_limit_bytes=_VMEM_LIMIT,
    )


def _pick_tile(s, target=_LANE_TILE_TARGET):
    """Largest lane tile <= target that is a multiple of 128 and divides S."""
    if s % 128 != 0:
        return s  # fall back to full extent only when S is not 128-divisible
    t = min(target, s)
    t -= t % 128
    while s % t != 0:
        t -= 128
    return t


def _cmul_dims(m):
    """(tile, padded M) for the spectral mixing kernel."""
    tm = min(_CMUL_TM_TARGET, pl.cdiv(m, 128) * 128)
    mp = pl.cdiv(m, tm) * tm
    return tm, mp


# ----------------------------------------------------------------------------
# Channel-major linear (fc0): out[b] = W @ x[b] + bias, lanes = spatial
# ----------------------------------------------------------------------------
def _cm_linear_kernel(x_ref, w_ref, b_ref, o_ref):
    y = jnp.dot(w_ref[...], x_ref[0], preferred_element_type=jnp.float32)
    o_ref[0] = y + b_ref[...]


def cm_linear(x, w, b, *, ts):
    B, cin, S = x.shape
    cout = w.shape[0]
    ns = S // ts
    return pl.pallas_call(
        _cm_linear_kernel,
        out_shape=jax.ShapeDtypeStruct((B, cout, S), jnp.float32),
        grid_spec=pltpu.PrefetchScalarGridSpec(
            num_scalar_prefetch=0,
            grid=(B, ns),
            in_specs=[
                pl.BlockSpec((1, cin, ts), lambda bi, si: (bi, 0, si)),
                pl.BlockSpec((cout, cin), lambda bi, si: (0, 0)),
                pl.BlockSpec((cout, 1), lambda bi, si: (0, 0)),
            ],
            out_specs=pl.BlockSpec((1, cout, ts), lambda bi, si: (bi, 0, si)),
        ),
        compiler_params=_cparams(),
    )(x, w, b)


# ----------------------------------------------------------------------------
# Fused: previous-block BN affine (+ReLU) applied on the fly to the pre-BN input,
# then 1x1-conv + bias + spectral-branch add + BN partial statistics (single store).
# ----------------------------------------------------------------------------
def _conv_affine_add_stats_kernel(t_ref, x1_ref, w_ref, b_ref, sc_ref, sh_ref,
                                  o_ref, part_ref, *, relu):
    v = t_ref[0] * sc_ref[...] + sh_ref[...]
    if relu:
        v = jnp.maximum(v, 0.0)
    t = jnp.dot(w_ref[...], v, preferred_element_type=jnp.float32)
    t = t + b_ref[...] + x1_ref[0]
    o_ref[0] = t
    part_ref[0, 0] = jnp.concatenate(
        [jnp.sum(t, axis=1, keepdims=True), jnp.sum(t * t, axis=1, keepdims=True)],
        axis=1,
    )


def conv_affine_add_stats(t_in, x1, w, b, scale, shift, *, relu, ts):
    B, cin, S = t_in.shape
    cout = w.shape[0]
    ns = S // ts
    return pl.pallas_call(
        functools.partial(_conv_affine_add_stats_kernel, relu=relu),
        out_shape=(
            jax.ShapeDtypeStruct((B, cout, S), jnp.float32),
            jax.ShapeDtypeStruct((B, ns, cout, 2), jnp.float32),
        ),
        grid_spec=pltpu.PrefetchScalarGridSpec(
            num_scalar_prefetch=0,
            grid=(B, ns),
            in_specs=[
                pl.BlockSpec((1, cin, ts), lambda bi, si: (bi, 0, si)),
                pl.BlockSpec((1, cout, ts), lambda bi, si: (bi, 0, si)),
                pl.BlockSpec((cout, cin), lambda bi, si: (0, 0)),
                pl.BlockSpec((cout, 1), lambda bi, si: (0, 0)),
                pl.BlockSpec((cin, 1), lambda bi, si: (0, 0)),
                pl.BlockSpec((cin, 1), lambda bi, si: (0, 0)),
            ],
            out_specs=(
                pl.BlockSpec((1, cout, ts), lambda bi, si: (bi, 0, si)),
                pl.BlockSpec((1, 1, cout, 2), lambda bi, si: (bi, si, 0, 0)),
            ),
        ),
        compiler_params=_cparams(),
    )(t_in, x1, w, b, scale, shift)


def _bn_scale_shift(part, gamma, beta, n_total, eps=_EPS):
    # Training-mode (biased) batch statistics, matching torch BatchNorm3d.forward().
    sums = jnp.sum(part[..., 0], axis=(0, 1))
    sumsq = jnp.sum(part[..., 1], axis=(0, 1))
    mean = sums / n_total
    var = jnp.maximum(sumsq / n_total - mean * mean, 0.0)
    inv = lax.rsqrt(var + eps)
    scale = gamma.reshape(-1) * inv
    shift = beta.reshape(-1) - mean * scale
    return (scale.reshape(-1, 1).astype(jnp.float32),
            shift.reshape(-1, 1).astype(jnp.float32))


# ----------------------------------------------------------------------------
# Fused fc1 (W->128, ReLU) + fc2 (128->1); fc1 activation stays a pure value
# ----------------------------------------------------------------------------
def _fc12_kernel(v_ref, w1_ref, b1_ref, w2_ref, b2_ref, o_ref):
    h = jnp.dot(w1_ref[...], v_ref[0], preferred_element_type=jnp.float32) + b1_ref[...]
    h = jnp.maximum(h, 0.0)
    o_ref[0] = jnp.dot(w2_ref[...], h, preferred_element_type=jnp.float32) + b2_ref[...]


def fc12(v, w1, b1, w2, b2, *, ts):
    B, cin, S = v.shape
    H = w1.shape[0]
    ns = S // ts
    return pl.pallas_call(
        _fc12_kernel,
        out_shape=jax.ShapeDtypeStruct((B, 1, S), jnp.float32),
        grid_spec=pltpu.PrefetchScalarGridSpec(
            num_scalar_prefetch=0,
            grid=(B, ns),
            in_specs=[
                pl.BlockSpec((1, cin, ts), lambda bi, si: (bi, 0, si)),
                pl.BlockSpec((H, cin), lambda bi, si: (0, 0)),
                pl.BlockSpec((H, 1), lambda bi, si: (0, 0)),
                pl.BlockSpec((1, H), lambda bi, si: (0, 0)),
                pl.BlockSpec((1, 1), lambda bi, si: (0, 0)),
            ],
            out_specs=pl.BlockSpec((1, 1, ts), lambda bi, si: (bi, 0, si)),
        ),
        compiler_params=_cparams(),
    )(v, w1, b1, w2, b2)


# ----------------------------------------------------------------------------
# Spectral complex channel mixing: out[b,o,m] = sum_i a[b,i,m] * w[i,o,m]  (complex)
# Grid = (mode-tiles, B): mode axis outermost -> weight tile reused across batch.
# Standard 4-mul/2-add complex product; fori_loop over Cin for large widths.
# ----------------------------------------------------------------------------
def _cmul_kernel(ar_ref, ai_ref, wr_ref, wi_ref, or_ref, oi_ref, *, cin):
    cout, tm = or_ref.shape[1], or_ref.shape[2]

    def step(i, acc):
        acc_re, acc_im = acc
        ar = ar_ref[0, pl.ds(i, 1), :]      # (1, TM), broadcast over Cout
        ai = ai_ref[0, pl.ds(i, 1), :]
        wr = wr_ref[i]                      # (Cout, TM)
        wi = wi_ref[i]
        acc_re = acc_re + (ar * wr - ai * wi)
        acc_im = acc_im + (ar * wi + ai * wr)
        return acc_re, acc_im

    init = (jnp.zeros((cout, tm), jnp.float32), jnp.zeros((cout, tm), jnp.float32))
    if cin >= 32:
        acc_re, acc_im = lax.fori_loop(0, cin, step, init, unroll=8)
    else:
        acc_re, acc_im = init
        for i in range(cin):
            acc_re, acc_im = step(i, (acc_re, acc_im))
    or_ref[0] = acc_re
    oi_ref[0] = acc_im


def compl_mul(a_re, a_im, w_re, w_im, m_valid):
    """a: (B, Cin, M) real/imag; w: (Cin, Cout, Mp) pre-padded real/imag planes."""
    B, cin, _ = a_re.shape
    cout = w_re.shape[1]
    mp = w_re.shape[2]
    tm, mp_expected = _cmul_dims(m_valid)
    assert mp == mp_expected
    if mp != m_valid:
        padm = ((0, 0), (0, 0), (0, mp - m_valid))
        a_re = jnp.pad(a_re, padm)
        a_im = jnp.pad(a_im, padm)

    a_spec = pl.BlockSpec((1, cin, tm), lambda mi, bi: (bi, 0, mi))
    w_spec = pl.BlockSpec((cin, cout, tm), lambda mi, bi: (0, 0, mi))
    o_spec = pl.BlockSpec((1, cout, tm), lambda mi, bi: (bi, 0, mi))
    o_sds = jax.ShapeDtypeStruct((B, cout, mp), jnp.float32)
    o_re, o_im = pl.pallas_call(
        functools.partial(_cmul_kernel, cin=cin),
        out_shape=(o_sds, o_sds),
        grid_spec=pltpu.PrefetchScalarGridSpec(
            num_scalar_prefetch=0,
            grid=(mp // tm, B),
            in_specs=[a_spec, a_spec, w_spec, w_spec],
            out_specs=(o_spec, o_spec),
        ),
        compiler_params=_cparams(),
    )(a_re, a_im, w_re, w_im)
    return o_re[:, :, :m_valid], o_im[:, :, :m_valid]


# ----------------------------------------------------------------------------
# SpectralConv3d_fast (FFTs in XLA glue, mode mixing in Pallas)
# ----------------------------------------------------------------------------
def spectral_conv3d(v5, spec_w, m1, m2, m3):
    # v5: (B, C, SX, SY, SZ) float32
    # TODO(synk): 3-D rFFT/irFFT has no Pallas equivalent; uses jnp.fft (XLA FFT).
    w_re, w_im = spec_w                          # each (Cin, Cout, Mp), pre-padded
    B, C, SX, SY, SZ = v5.shape
    ZF = SZ // 2 + 1
    x_ft = jnp.fft.rfftn(v5, axes=(2, 3, 4), norm="ortho")  # torch.rfft(normalized=True)

    corners = jnp.stack(
        [
            x_ft[:, :, :m1, :m2, :m3],
            x_ft[:, :, SX - m1:, :m2, :m3],
            x_ft[:, :, :m1, SY - m2:, :m3],
            x_ft[:, :, SX - m1:, SY - m2:, :m3],
        ],
        axis=2,
    )                                            # (B, C, 4, m1, m2, m3) complex
    M = 4 * m1 * m2 * m3
    a = corners.reshape(B, C, M)

    o_re, o_im = compl_mul(
        jnp.real(a).astype(jnp.float32), jnp.imag(a).astype(jnp.float32),
        w_re, w_im, M)
    o = (o_re + 1j * o_im).astype(jnp.complex64).reshape(B, C, 4, m1, m2, m3)

    out_ft = jnp.zeros((B, C, SX, SY, ZF), jnp.complex64)
    out_ft = out_ft.at[:, :, :m1, :m2, :m3].set(o[:, :, 0])
    out_ft = out_ft.at[:, :, SX - m1:, :m2, :m3].set(o[:, :, 1])
    out_ft = out_ft.at[:, :, :m1, SY - m2:, :m3].set(o[:, :, 2])
    out_ft = out_ft.at[:, :, SX - m1:, SY - m2:, :m3].set(o[:, :, 3])

    return jnp.fft.irfftn(out_ft, s=(SX, SY, SZ), axes=(2, 3, 4), norm="ortho")


# ----------------------------------------------------------------------------
# Net2d forward (SimpleBlock2d + squeeze)
# ----------------------------------------------------------------------------
def net2d_forward(x, params, *, width, modes):
    m1, m2, m3 = modes
    B, SX, SY, SZ, C0 = x.shape
    S = SX * SY * SZ
    W = width
    ts = _pick_tile(S)
    n_total = B * S

    # fc0 in the fixed (B, C, S) layout (one cheap 4-channel transpose).
    x_cm = jnp.transpose(x.reshape(B, S, C0), (0, 2, 1))             # (B, 4, S)
    t = cm_linear(x_cm, params["fc0_w"], params["fc0_b"], ts=ts)     # (B, W, S)

    # `t` always holds the PRE-BN activation of the previous stage; `scale/shift`
    # hold the affine that maps it to the post-BN (and, for blocks 0-2, pre-ReLU) value.
    scale = jnp.ones((W, 1), jnp.float32)
    shift = jnp.zeros((W, 1), jnp.float32)

    for i in range(4):
        if i == 0:
            v_fft = t
        else:
            # Previous block's BN affine + ReLU, fused by XLA into the FFT prologue.
            v_fft = jnp.maximum(t * scale.reshape(1, W, 1) + shift.reshape(1, W, 1), 0.0)
        x1 = spectral_conv3d(
            v_fft.reshape(B, W, SX, SY, SZ), params["spec"][i], m1, m2, m3
        ).reshape(B, W, S)
        wc_w, wc_b = params["w_conv"][i]
        # Fused: apply previous BN affine(+ReLU) on the fly, 1x1 conv + bias + add(x1),
        # and emit per-tile BN statistics for THIS block.
        t, part = conv_affine_add_stats(t, x1, wc_w, wc_b, scale, shift,
                                        relu=(i > 0), ts=ts)
        gamma, beta = params["bn"][i]
        scale, shift = _bn_scale_shift(part, gamma, beta, n_total)

    # Fold the final (relu-free) BN into fc1: fc1(BN3(t)) = (w1*scale) @ t + (b1 + w1@shift).
    w1_eff = params["fc1_w"] * scale.reshape(1, W)
    b1_eff = params["fc1_b"] + params["fc1_w"] @ shift
    out = fc12(t, w1_eff, b1_eff, params["fc2_w"], params["fc2_b"], ts=ts)  # (B, 1, S)
    return out.reshape(B, SX, SY, SZ)                                       # .squeeze()


# ----------------------------------------------------------------------------
# Deterministic parameter init (shapes per the PyTorch module, (Cout, Cin) layout).
# Spectral weights are pre-transposed to (Cin, Cout, M) and pre-padded once here.
# ----------------------------------------------------------------------------
def init_params(key, width, m1, m2, m3):
    keys = iter(jax.random.split(key, 64))

    def uniform(shape, lo, hi):
        return jax.random.uniform(next(keys), shape, jnp.float32, lo, hi)

    M = 4 * m1 * m2 * m3
    _, mp = _cmul_dims(M)

    p = {}
    p["fc0_w"] = uniform((width, 4), -0.5, 0.5)        # nn.Linear(4, W) weight (W, 4)
    p["fc0_b"] = uniform((width, 1), -0.5, 0.5)

    wscale = 1.0 / (width * width)
    spec = []
    for _ in range(4):  # conv0..conv3
        wr, wi = [], []
        for _ in range(4):  # weights1..weights4 (four frequency corners)
            w = uniform((width, width, m1, m2, m3, 2), 0.0, wscale)
            wr.append(w[..., 0])
            wi.append(w[..., 1])
        wr = jnp.stack(wr, axis=2).reshape(width, width, M)    # (Cin, Cout, M)
        wi = jnp.stack(wi, axis=2).reshape(width, width, M)
        if mp != M:
            wr = jnp.pad(wr, ((0, 0), (0, 0), (0, mp - M)))
            wi = jnp.pad(wi, ((0, 0), (0, 0), (0, mp - M)))
        spec.append((wr, wi))
    p["spec"] = spec

    p["w_conv"] = [
        (uniform((width, width), -0.35, 0.35), uniform((width, 1), -0.35, 0.35))
        for _ in range(4)
    ]
    p["bn"] = [
        (jnp.ones((width,), jnp.float32), jnp.zeros((width,), jnp.float32))
        for _ in range(4)
    ]
    p["fc1_w"] = uniform((128, width), -0.35, 0.35)    # nn.Linear(W, 128) weight
    p["fc1_b"] = uniform((128, 1), -0.35, 0.35)
    p["fc2_w"] = uniform((1, 128), -0.09, 0.09)        # nn.Linear(128, 1) weight
    p["fc2_b"] = uniform((1, 1), -0.09, 0.09)
    return p


if __name__ == "__main__":
    # Small shapes: Net2d(modes=3, width=8); modes3 is hard-coded to 6 in the module,
    # so SZ must satisfy SZ//2 + 1 >= 6.
    B, SX, SY, SZ = 2, 8, 8, 16
    modes, width, modes3 = 3, 8, 6

    key = jax.random.PRNGKey(0)
    kx, kp = jax.random.split(key)
    x = jax.random.normal(kx, (B, SX, SY, SZ, 4), jnp.float32)
    params = init_params(kp, width, modes, modes, modes3)

    fwd = jax.jit(
        functools.partial(net2d_forward, width=width, modes=(modes, modes, modes3))
    )
    out = fwd(x, params)
    jax.block_until_ready(out)
    assert out.shape == (B, SX, SY, SZ), out.shape
    assert jnp.all(jnp.isfinite(out))
    print("KERNEL_OK")
</pallas_src>

<mosaic_0001>
module attributes {stable_mosaic.version = 11 : i64} {
  func.func @_cm_linear_kernel(%arg0: i32, %arg1: i32, %arg2: memref<1x4x1024xf32, #tpu.memory_space<vmem>>, %arg3: memref<8x4xf32, #tpu.memory_space<vmem>>, %arg4: memref<8x1xf32, #tpu.memory_space<vmem>>, %arg5: memref<1x8x1024xf32, #tpu.memory_space<vmem>>) attributes {dimension_semantics = [#tpu.dimension_semantics<parallel>, #tpu.dimension_semantics<parallel>], iteration_bounds = array<i64: 2, 1>, scalar_prefetch = 0 : i64, scratch_operands = 0 : i64, tpu.core_type = #tpu.core_type<tc>, window_params = [{transform_indices = @transform_0, window_bounds = array<i64: 1, 4, 1024>}, {pipeline_mode = #tpu.pipeline_mode<synchronous>, transform_indices = @transform_1, window_bounds = array<i64: 8, 4>}, {pipeline_mode = #tpu.pipeline_mode<synchronous>, transform_indices = @transform_2, window_bounds = array<i64: 8, 1>}, {transform_indices = @transform_3, window_bounds = array<i64: 1, 8, 1024>}]} {
    %c0 = arith.constant 0 : index
    %c0_0 = arith.constant 0 : index
    %0 = vector.load %arg3[%c0, %c0_0] : memref<8x4xf32, #tpu.memory_space<vmem>>, vector<8x4xf32>
    %c0_1 = arith.constant 0 : index
    %c0_2 = arith.constant 0 : index
    %c0_3 = arith.constant 0 : index
    %1 = vector.load %arg2[%c0_1, %c0_2, %c0_3] : memref<1x4x1024xf32, #tpu.memory_space<vmem>>, vector<1x4x1024xf32>
    %2 = vector.shape_cast %1 : vector<1x4x1024xf32> to vector<4x1024xf32>
    %cst = arith.constant dense<0.000000e+00> : vector<8x1024xf32>
    %3 = tpu.matmul %0, %2, %cst {dimension_numbers = #tpu.dot_dimension_numbers<[1], [0], [0], [1], [0, 0, 1, 1], [], []>} : vector<8x4xf32>, vector<4x1024xf32>, vector<8x1024xf32> -> vector<8x1024xf32>
    %c0_4 = arith.constant 0 : index
    %c0_5 = arith.constant 0 : index
    %4 = vector.load %arg4[%c0_4, %c0_5] : memref<8x1xf32, #tpu.memory_space<vmem>>, vector<8x1xf32>
    %5 = vector.broadcast %4 : vector<8x1xf32> to vector<8x1024xf32>
    %6 = arith.addf %3, %5 : vector<8x1024xf32>
    %c0_6 = arith.constant 0 : index
    %c0_7 = arith.constant 0 : index
    %c0_8 = arith.constant 0 : index
    %7 = vector.load %arg5[%c0_6, %c0_7, %c0_8] : memref<1x8x1024xf32, #tpu.memory_space<vmem>>, vector<1x8x1024xf32>
    %8 = vector.shape_cast %7 : vector<1x8x1024xf32> to vector<8x1024xf32>
    %9 = vector.shape_cast %6 : vector<8x1024xf32> to vector<1x8x1024xf32>
    tpu.vector_store %arg5[%c0_6, %c0_7, %c0_8], %9 {strides = array<i32>} : memref<1x8x1024xf32, #tpu.memory_space<vmem>>, vector<1x8x1024xf32>,
    return
  }
  func.func @transform_0(%arg0: i32, %arg1: i32) -> (i32, i32, i32) {
    %c0_i32 = arith.constant 0 : i32
    %c0_i32_0 = arith.constant 0 : i32
    return %arg0, %c0_i32, %arg1 : i32, i32, i32
  }
  func.func @transform_1(%arg0: i32, %arg1: i32) -> (i32, i32) {
    %c0_i32 = arith.constant 0 : i32
    %c0_i32_0 = arith.constant 0 : i32
    %c0_i32_1 = arith.constant 0 : i32
    return %c0_i32, %c0_i32_0 : i32, i32
  }
  func.func @transform_2(%arg0: i32, %arg1: i32) -> (i32, i32) {
    %c0_i32 = arith.constant 0 : i32
    %c0_i32_0 = arith.constant 0 : i32
    %c0_i32_1 = arith.constant 0 : i32
    return %c0_i32, %c0_i32_0 : i32, i32
  }
  func.func @transform_3(%arg0: i32, %arg1: i32) -> (i32, i32, i32) {
    %c0_i32 = arith.constant 0 : i32
    %c0_i32_0 = arith.constant 0 : i32
    return %arg0, %c0_i32, %arg1 : i32, i32, i32
  }
}

module attributes {stable_mosaic.version = 11 : i64} {
  func.func @_cmul_kernel(%arg0: i32, %arg1: i32, %arg2: memref<1x8x256xf32, #tpu.memory_space<vmem>>, %arg3: memref<1x8x256xf32, #tpu.memory_space<vmem>>, %arg4: memref<8x8x256xf32, #tpu.memory_space<vmem>>, %arg5: memref<8x8x256xf32, #tpu.memory_space<vmem>>, %arg6: memref<1x8x256xf32, #tpu.memory_space<vmem>>, %arg7: memref<1x8x256xf32, #tpu.memory_space<vmem>>) attributes {dimension_semantics = [#tpu.dimension_semantics<parallel>, #tpu.dimension_semantics<parallel>], iteration_bounds = array<i64: 1, 2>, scalar_prefetch = 0 : i64, scratch_operands = 0 : i64, tpu.core_type = #tpu.core_type<tc>, window_params = [{transform_indices = @transform_0, window_bounds = array<i64: 1, 8, 256>}, {transform_indices = @transform_1, window_bounds = array<i64: 1, 8, 256>}, {transform_indices = @transform_2, window_bounds = array<i64: 8, 8, 256>}, {transform_indices = @transform_3, window_bounds = array<i64: 8, 8, 256>}, {transform_indices = @transform_4, window_bounds = array<i64: 1, 8, 256>}, {transform_indices = @transform_5, window_bounds = array<i64: 1, 8, 256>}]} {
    %cst = arith.constant 0.000000e+00 : f32
    %0 = vector.broadcast %cst : f32 to vector<8x256xf32>
    %cst_0 = arith.constant 0.000000e+00 : f32
    %1 = vector.broadcast %cst_0 : f32 to vector<8x256xf32>
    %c0 = arith.constant 0 : index
    %c0_1 = arith.constant 0 : index
    %c0_2 = arith.constant 0 : index
    %2 = vector.load %arg2[%c0, %c0_1, %c0_2] : memref<1x8x256xf32, #tpu.memory_space<vmem>>, vector<1x1x256xf32>
    %3 = vector.shape_cast %2 : vector<1x1x256xf32> to vector<1x256xf32>
    %c0_3 = arith.constant 0 : index
    %c0_4 = arith.constant 0 : index
    %c0_5 = arith.constant 0 : index
    %4 = vector.load %arg3[%c0_3, %c0_4, %c0_5] : memref<1x8x256xf32, #tpu.memory_space<vmem>>, vector<1x1x256xf32>
    %5 = vector.shape_cast %4 : vector<1x1x256xf32> to vector<1x256xf32>
    %c0_6 = arith.constant 0 : index
    %c0_7 = arith.constant 0 : index
    %c0_8 = arith.constant 0 : index
    %6 = vector.load %arg4[%c0_6, %c0_7, %c0_8] : memref<8x8x256xf32, #tpu.memory_space<vmem>>, vector<1x8x256xf32>
    %7 = vector.shape_cast %6 : vector<1x8x256xf32> to vector<8x256xf32>
    %c0_9 = arith.constant 0 : index
    %c0_10 = arith.constant 0 : index
    %c0_11 = arith.constant 0 : index
    %8 = vector.load %arg5[%c0_9, %c0_10, %c0_11] : memref<8x8x256xf32, #tpu.memory_space<vmem>>, vector<1x8x256xf32>
    %9 = vector.shape_cast %8 : vector<1x8x256xf32> to vector<8x256xf32>
    %10 = vector.broadcast %3 : vector<1x256xf32> to vector<8x256xf32>
    %11 = arith.mulf %10, %7 : vector<8x256xf32>
    %12 = vector.broadcast %5 : vector<1x256xf32> to vector<8x256xf32>
    %13 = arith.mulf %12, %9 : vector<8x256xf32>
    %14 = arith.subf %11, %13 : vector<8x256xf32>
    %15 = arith.addf %0, %14 : vector<8x256xf32>
    %16 = vector.broadcast %3 : vector<1x256xf32> to vector<8x256xf32>
    %17 = arith.mulf %16, %9 : vector<8x256xf32>
    %18 = vector.broadcast %5 : vector<1x256xf32> to vector<8x256xf32>
    %19 = arith.mulf %18, %7 : vector<8x256xf32>
    %20 = arith.addf %17, %19 : vector<8x256xf32>
    %21 = arith.addf %1, %20 : vector<8x256xf32>
    %c0_12 = arith.constant 0 : index
    %c1 = arith.constant 1 : index
    %c0_13 = arith.constant 0 : index
    %22 = vector.load %arg2[%c0_12, %c1, %c0_13] : memref<1x8x256xf32, #tpu.memory_space<vmem>>, vector<1x1x256xf32>
    %23 = vector.shape_cast %22 : vector<1x1x256xf32> to vector<1x256xf32>
    %c0_14 = arith.constant 0 : index
    %c1_15 = arith.constant 1 : index
    %c0_16 = arith.constant 0 : index
    %24 = vector.load %arg3[%c0_14, %c1_15, %c0_16] : memref<1x8x256xf32, #tpu.memory_space<vmem>>, vector<1x1x256xf32>
    %25 = vector.shape_cast %24 : vector<1x1x256xf32> to vector<1x256xf32>
    %c1_17 = arith.constant 1 : index
    %c0_18 = arith.constant 0 : index
    %c0_19 = arith.constant 0 : index
    %26 = vector.load %arg4[%c1_17, %c0_18, %c0_19] : memref<8x8x256xf32, #tpu.memory_space<vmem>>, vector<1x8x256xf32>
    %27 = vector.shape_cast %26 : vector<1x8x256xf32> to vector<8x256xf32>
    %c1_20 = arith.constant 1 : index
    %c0_21 = arith.constant 0 : index
    %c0_22 = arith.constant 0 : index
    %28 = vector.load %arg5[%c1_20, %c0_21, %c0_22] : memref<8x8x256xf32, #tpu.memory_space<vmem>>, vector<1x8x256xf32>
    %29 = vector.shape_cast %28 : vector<1x8x256xf32> to vector<8x256xf32>
    %30 = vector.broadcast %23 : vector<1x256xf32> to vector<8x256xf32>
    %31 = arith.mulf %30, %27 : vector<8x256xf32>
    %32 = vector.broadcast %25 : vector<1x256xf32> to vector<8x256xf32>
    %33 = arith.mulf %32, %29 : vector<8x256xf32>
    %34 = arith.subf %31, %33 : vector<8x256xf32>
    %35 = arith.addf %15, %34 : vector<8x256xf32>
    %36 = vector.broadcast %23 : vector<1x256xf32> to vector<8x256xf32>
    %37 = arith.mulf %36, %29 : vector<8x256xf32>
    %38 = vector.broadcast %25 : vector<1x256xf32> to vector<8x256xf32>
    %39 = arith.mulf %38, %27 : vector<8x256xf32>
    %40 = arith.addf %37, %39 : vector<8x256xf32>
    %41 = arith.addf %21, %40 : vector<8x256xf32>
    %c0_23 = arith.constant 0 : index
    %c2 = arith.constant 2 : index
    %c0_24 = arith.constant 0 : index
    %42 = vector.load %arg2[%c0_23, %c2, %c0_24] : memref<1x8x256xf32, #tpu.memory_space<vmem>>, vector<1x1x256xf32>
    %43 = vector.shape_cast %42 : vector<1x1x256xf32> to vector<1x256xf32>
    %c0_25 = arith.constant 0 : index
    %c2_26 = arith.constant 2 : index
    %c0_27 = arith.constant 0 : index
    %44 = vector.load %arg3[%c0_25, %c2_26, %c0_27] : memref<1x8x256xf32, #tpu.memory_space<vmem>>, vector<1x1x256xf32>
    %45 = vector.shape_cast %44 : vector<1x1x256xf32> to vector<1x256xf32>
    %c2_28 = arith.constant 2 : index
    %c0_29 = arith.constant 0 : index
    %c0_30 = arith.constant 0 : index
    %46 = vector.load %arg4[%c2_28, %c0_29, %c0_30] : memref<8x8x256xf32, #tpu.memory_space<vmem>>, vector<1x8x256xf32>
    %47 = vector.shape_cast %46 : vector<1x8x256xf32> to vector<8x256xf32>
    %c2_31 = arith.constant 2 : index
    %c0_32 = arith.constant 0 : index
    %c0_33 = arith.constant 0 : index
    %48 = vector.load %arg5[%c2_31, %c0_32, %c0_33] : memref<8x8x256xf32, #tpu.memory_space<vmem>>, vector<1x8x256xf32>
    %49 = vector.shape_cast %48 : vector<1x8x256xf32> to vector<8x256xf32>
    %50 = vector.broadcast %43 : vector<1x256xf32> to vector<8x256xf32>
    %51 = arith.mulf %50, %47 : vector<8x256xf32>
    %52 = vector.broadcast %45 : vector<1x256xf32> to vector<8x256xf32>
    %53 = arith.mulf %52, %49 : vector<8x256xf32>
    %54 = arith.subf %51, %53 : vector<8x256xf32>
    %55 = arith.addf %35, %54 : vector<8x256xf32>
    %56 = vector.broadcast %43 : vector<1x256xf32> to vector<8x256xf32>
    %57 = arith.mulf %56, %49 : vector<8x256xf32>
    %58 = vector.broadcast %45 : vector<1x256xf32> to vector<8x256xf32>
    %59 = arith.mulf %58, %47 : vector<8x256xf32>
    %60 = arith.addf %57, %59 : vector<8x256xf32>
    %61 = arith.addf %41, %60 : vector<8x256xf32>
    %c0_34 = arith.constant 0 : index
    %c3 = arith.constant 3 : index
    %c0_35 = arith.constant 0 : index
    %62 = vector.load %arg2[%c0_34, %c3, %c0_35] : memref<1x8x256xf32, #tpu.memory_space<vmem>>, vector<1x1x256xf32>
    %63 = vector.shape_cast %62 : vector<1x1x256xf32> to vector<1x256xf32>
    %c0_36 = arith.constant 0 : index
    %c3_37 = arith.constant 3 : index
    %c0_38 = arith.constant 0 : index
    %64 = vector.load %arg3[%c0_36, %c3_37, %c0_38] : memref<1x8x256xf32, #tpu.memory_space<vmem>>, vector<1x1x256xf32>
    %65 = vector.shape_cast %64 : vector<1x1x256xf32> to vector<1x256xf32>
    %c3_39 = arith.constant 3 : index
    %c0_40 = arith.constant 0 : index
    %c0_41 = arith.constant 0 : index
    %66 = vector.load %arg4[%c3_39, %c0_40, %c0_41] : memref<8x8x256xf32, #tpu.memory_space<vmem>>, vector<1x8x256xf32>
    %67 = vector.shape_cast %66 : vector<1x8x256xf32> to vector<8x256xf32>
    %c3_42 = arith.constant 3 : index
    %c0_43 = arith.constant 0 : index
    %c0_44 = arith.constant 0 : index
    %68 = vector.load %arg5[%c3_42, %c0_43, %c0_44] : memref<8x8x256xf32, #tpu.memory_space<vmem>>, vector<1x8x256xf32>
    %69 = vector.shape_cast %68 : vector<1x8x256xf32> to vector<8x256xf32>
    %70 = vector.broadcast %63 : vector<1x256xf32> to vector<8x256xf32>
    %71 = arith.mulf %70, %67 : vector<8x256xf32>
    %72 = vector.broadcast %65 : vector<1x256xf32> to vector<8x256xf32>
    %73 = arith.mulf %72, %69 : vector<8x256xf32>
    %74 = arith.subf %71, %73 : vector<8x256xf32>
    %75 = arith.addf %55, %74 : vector<8x256xf32>
    %76 = vector.broadcast %63 : vector<1x256xf32> to vector<8x256xf32>
    %77 = arith.mulf %76, %69 : vector<8x256xf32>
    %78 = vector.broadcast %65 : vector<1x256xf32> to vector<8x256xf32>
    %79 = arith.mulf %78, %67 : vector<8x256xf32>
    %80 = arith.addf %77, %79 : vector<8x256xf32>
    %81 = arith.addf %61, %80 : vector<8x256xf32>
    %c0_45 = arith.constant 0 : index
    %c4 = arith.constant 4 : index
    %c0_46 = arith.constant 0 : index
    %82 = vector.load %arg2[%c0_45, %c4, %c0_46] : memref<1x8x256xf32, #tpu.memory_space<vmem>>, vector<1x1x256xf32>
    %83 = vector.shape_cast %82 : vector<1x1x256xf32> to vector<1x256xf32>
    %c0_47 = arith.constant 0 : index
    %c4_48 = arith.constant 4 : index
    %c0_49 = arith.constant 0 : index
    %84 = vector.load %arg3[%c0_47, %c4_48, %c0_49] : memref<1x8x256xf32, #tpu.memory_space<vmem>>, vector<1x1x256xf32>
    %85 = vector.shape_cast %84 : vector<1x1x256xf32> to vector<1x256xf32>
    %c4_50 = arith.constant 4 : index
    %c0_51 = arith.constant 0 : index
    %c0_52 = arith.constant 0 : index
    %86 = vector.load %arg4[%c4_50, %c0_51, %c0_52] : memref<8x8x256xf32, #tpu.memory_space<vmem>>, vector<1x8x256xf32>
    %87 = vector.shape_cast %86 : vector<1x8x256xf32> to vector<8x256xf32>
    %c4_53 = arith.constant 4 : index
    %c0_54 = arith.constant 0 : index
    %c0_55 = arith.constant 0 : index
    %88 = vector.load %arg5[%c4_53, %c0_54, %c0_55] : memref<8x8x256xf32, #tpu.memory_space<vmem>>, vector<1x8x256xf32>
    %89 = vector.shape_cast %88 : vector<1x8x256xf32> to vector<8x256xf32>
    %90 = vector.broadcast %83 : vector<1x256xf32> to vector<8x256xf32>
    %91 = arith.mulf %90, %87 : vector<8x256xf32>
    %92 = vector.broadcast %85 : vector<1x256xf32> to vector<8x256xf32>
    %93 = arith.mulf %92, %89 : vector<8x256xf32>
    %94 = arith.subf %91, %93 : vector<8x256xf32>
    %95 = arith.addf %75, %94 : vector<8x256xf32>
    %96 = vector.broadcast %83 : vector<1x256xf32> to vector<8x256xf32>
    %97 = arith.mulf %96, %89 : vector<8x256xf32>
    %98 = vector.broadcast %85 : vector<1x256xf32> to vector<8x256xf32>
    %99 = arith.mulf %98, %87 : vector<8x256xf32>
    %100 = arith.addf %97, %99 : vector<8x256xf32>
    %101 = arith.addf %81, %100 : vector<8x256xf32>
    %c0_56 = arith.constant 0 : index
    %c5 = arith.constant 5 : index
    %c0_57 = arith.constant 0 : index
    %102 = vector.load %arg2[%c0_56, %c5, %c0_57] : memref<1x8x256xf32, #tpu.memory_space<vmem>>, vector<1x1x256xf32>
    %103 = vector.shape_cast %102 : vector<1x1x256xf32> to vector<1x256xf32>
    %c0_58 = arith.constant 0 : index
    %c5_59 = arith.constant 5 : index
    %c0_60 = arith.constant 0 : index
    %104 = vector.load %arg3[%c0_58, %c5_59, %c0_60] : memref<1x8x256xf32, #tpu.memory_space<vmem>>, vector<1x1x256xf32>
    %105 = vector.shape_cast %104 : vector<1x1x256xf32> to vector<1x256xf32>
    %c5_61 = arith.constant 5 : index
    %c0_62 = arith.constant 0 : index
    %c0_63 = arith.constant 0 : index
    %106 = vector.load %arg4[%c5_61, %c0_62, %c0_63] : memref<8x8x256xf32, #tpu.memory_space<vmem>>, vector<1x8x256xf32>
    %107 = vector.shape_cast %106 : vector<1x8x256xf32> to vector<8x256xf32>
    %c5_64 = arith.constant 5 : index
    %c0_65 = arith.constant 0 : index
    %c0_66 = arith.constant 0 : index
    %108 = vector.load %arg5[%c5_64, %c0_65, %c0_66] : memref<8x8x256xf32, #tpu.memory_space<vmem>>, vector<1x8x256xf32>
    %109 = vector.shape_cast %108 : vector<1x8x256xf32> to vector<8x256xf32>
    %110 = vector.broadcast %103 : vector<1x256xf32> to vector<8x256xf32>
    %111 = arith.mulf %110, %107 : vector<8x256xf32>
    %112 = vector.broadcast %105 : vector<1x256xf32> to vector<8x256xf32>
    %113 = arith.mulf %112, %109 : vector<8x256xf32>
    %114 = arith.subf %111, %113 : vector<8x256xf32>
    %115 = arith.addf %95, %114 : vector<8x256xf32>
    %116 = vector.broadcast %103 : vector<1x256xf32> to vector<8x256xf32>
    %117 = arith.mulf %116, %109 : vector<8x256xf32>
    %118 = vector.broadcast %105 : vector<1x256xf32> to vector<8x256xf32>
    %119 = arith.mulf %118, %107 : vector<8x256xf32>
    %120 = arith.addf %117, %119 : vector<8x256xf32>
    %121 = arith.addf %101, %120 : vector<8x256xf32>
    %c0_67 = arith.constant 0 : index
    %c6 = arith.constant 6 : index
    %c0_68 = arith.constant 0 : index
    %122 = vector.load %arg2[%c0_67, %c6, %c0_68] : memref<1x8x256xf32, #tpu.memory_space<vmem>>, vector<1x1x256xf32>
    %123 = vector.shape_cast %122 : vector<1x1x256xf32> to vector<1x256xf32>
    %c0_69 = arith.constant 0 : index
    %c6_70 = arith.constant 6 : index
    %c0_71 = arith.constant 0 : index
    %124 = vector.load %arg3[%c0_69, %c6_70, %c0_71] : memref<1x8x256xf32, #tpu.memory_space<vmem>>, vector<1x1x256xf32>
    %125 = vector.shape_cast %124 : vector<1x1x256xf32> to vector<1x256xf32>
    %c6_72 = arith.constant 6 : index
    %c0_73 = arith.constant 0 : index
    %c0_74 = arith.constant 0 : index
    %126 = vector.load %arg4[%c6_72, %c0_73, %c0_74] : memref<8x8x256xf32, #tpu.memory_space<vmem>>, vector<1x8x256xf32>
    %127 = vector.shape_cast %126 : vector<1x8x256xf32> to vector<8x256xf32>
    %c6_75 = arith.constant 6 : index
    %c0_76 = arith.constant 0 : index
    %c0_77 = arith.constant 0 : index
    %128 = vector.load %arg5[%c6_75, %c0_76, %c0_77] : memref<8x8x256xf32, #tpu.memory_space<vmem>>, vector<1x8x256xf32>
    %129 = vector.shape_cast %128 : vector<1x8x256xf32> to vector<8x256xf32>
    %130 = vector.broadcast %123 : vector<1x256xf32> to vector<8x256xf32>
    %131 = arith.mulf %130, %127 : vector<8x256xf32>
    %132 = vector.broadcast %125 : vector<1x256xf32> to vector<8x256xf32>
    %133 = arith.mulf %132, %129 : vector<8x256xf32>
    %134 = arith.subf %131, %133 : vector<8x256xf32>
    %135 = arith.addf %115, %134 : vector<8x256xf32>
    %136 = vector.broadcast %123 : vector<1x256xf32> to vector<8x256xf32>
    %137 = arith.mulf %136, %129 : vector<8x256xf32>
    %138 = vector.broadcast %125 : vector<1x256xf32> to vector<8x256xf32>
    %139 = arith.mulf %138, %127 : vector<8x256xf32>
    %140 = arith.addf %137, %139 : vector<8x256xf32>
    %141 = arith.addf %121, %140 : vector<8x256xf32>
    %c0_78 = arith.constant 0 : index
    %c7 = arith.constant 7 : index
    %c0_79 = arith.constant 0 : index
    %142 = vector.load %arg2[%c0_78, %c7, %c0_79] : memref<1x8x256xf32, #tpu.memory_space<vmem>>, vector<1x1x256xf32>
    %143 = vector.shape_cast %142 : vector<1x1x256xf32> to vector<1x256xf32>
    %c0_80 = arith.constant 0 : index
    %c7_81 = arith.constant 7 : index
    %c0_82 = arith.constant 0 : index
    %144 = vector.load %arg3[%c0_80, %c7_81, %c0_82] : memref<1x8x256xf32, #tpu.memory_space<vmem>>, vector<1x1x256xf32>
    %145 = vector.shape_cast %144 : vector<1x1x256xf32> to vector<1x256xf32>
    %c7_83 = arith.constant 7 : index
    %c0_84 = arith.constant 0 : index
    %c0_85 = arith.constant 0 : index
    %146 = vector.load %arg4[%c7_83, %c0_84, %c0_85] : memref<8x8x256xf32, #tpu.memory_space<vmem>>, vector<1x8x256xf32>
    %147 = vector.shape_cast %146 : vector<1x8x256xf32> to vector<8x256xf32>
    %c7_86 = arith.constant 7 : index
    %c0_87 = arith.constant 0 : index
    %c0_88 = arith.constant 0 : index
    %148 = vector.load %arg5[%c7_86, %c0_87, %c0_88] : memref<8x8x256xf32, #tpu.memory_space<vmem>>, vector<1x8x256xf32>
    %149 = vector.shape_cast %148 : vector<1x8x256xf32> to vector<8x256xf32>
    %150 = vector.broadcast %143 : vector<1x256xf32> to vector<8x256xf32>
    %151 = arith.mulf %150, %147 : vector<8x256xf32>
    %152 = vector.broadcast %145 : vector<1x256xf32> to vector<8x256xf32>
    %153 = arith.mulf %152, %149 : vector<8x256xf32>
    %154 = arith.subf %151, %153 : vector<8x256xf32>
    %155 = arith.addf %135, %154 : vector<8x256xf32>
    %156 = vector.broadcast %143 : vector<1x256xf32> to vector<8x256xf32>
    %157 = arith.mulf %156, %149 : vector<8x256xf32>
    %158 = vector.broadcast %145 : vector<1x256xf32> to vector<8x256xf32>
    %159 = arith.mulf %158, %147 : vector<8x256xf32>
    %160 = arith.addf %157, %159 : vector<8x256xf32>
    %161 = arith.addf %141, %160 : vector<8x256xf32>
    %c0_89 = arith.constant 0 : index
    %c0_90 = arith.constant 0 : index
    %c0_91 = arith.constant 0 : index
    %162 = vector.load %arg6[%c0_89, %c0_90, %c0_91] : memref<1x8x256xf32, #tpu.memory_space<vmem>>, vector<1x8x256xf32>
    %163 = vector.shape_cast %162 : vector<1x8x256xf32> to vector<8x256xf32>
    %164 = vector.shape_cast %155 : vector<8x256xf32> to vector<1x8x256xf32>
    tpu.vector_store %arg6[%c0_89, %c0_90, %c0_91], %164 {strides = array<i32>} : memref<1x8x256xf32, #tpu.memory_space<vmem>>, vector<1x8x256xf32>,
    %c0_92 = arith.constant 0 : index
    %c0_93 = arith.constant 0 : index
    %c0_94 = arith.constant 0 : index
    %165 = vector.load %arg7[%c0_92, %c0_93, %c0_94] : memref<1x8x256xf32, #tpu.memory_space<vmem>>, vector<1x8x256xf32>
    %166 = vector.shape_cast %165 : vector<1x8x256xf32> to vector<8x256xf32>
    %167 = vector.shape_cast %161 : vector<8x256xf32> to vector<1x8x256xf32>
    tpu.vector_store %arg7[%c0_92, %c0_93, %c0_94], %167 {strides = array<i32>} : memref<1x8x256xf32, #tpu.memory_space<vmem>>, vector<1x8x256xf32>,
    return
  }
  func.func @transform_0(%arg0: i32, %arg1: i32) -> (i32, i32, i32) {
    %c0_i32 = arith.constant 0 : i32
    %c0_i32_0 = arith.constant 0 : i32
    return %arg1, %c0_i32, %arg0 : i32, i32, i32
  }
  func.func @transform_1(%arg0: i32, %arg1: i32) -> (i32, i32, i32) {
    %c0_i32 = arith.constant 0 : i32
    %c0_i32_0 = arith.constant 0 : i32
    return %arg1, %c0_i32, %arg0 : i32, i32, i32
  }
  func.func @transform_2(%arg0: i32, %arg1: i32) -> (i32, i32, i32) {
    %c0_i32 = arith.constant 0 : i32
    %c0_i32_0 = arith.constant 0 : i32
    %c0_i32_1 = arith.constant 0 : i32
    return %c0_i32, %c0_i32_0, %arg0 : i32, i32, i32
  }
  func.func @transform_3(%arg0: i32, %arg1: i32) -> (i32, i32, i32) {
    %c0_i32 = arith.constant 0 : i32
    %c0_i32_0 = arith.constant 0 : i32
    %c0_i32_1 = arith.constant 0 : i32
    return %c0_i32, %c0_i32_0, %arg0 : i32, i32, i32
  }
  func.func @transform_4(%arg0: i32, %arg1: i32) -> (i32, i32, i32) {
    %c0_i32 = arith.constant 0 : i32
    %c0_i32_0 = arith.constant 0 : i32
    return %arg1, %c0_i32, %arg0 : i32, i32, i32
  }
  func.func @transform_5(%arg0: i32, %arg1: i32) -> (i32, i32, i32) {
    %c0_i32 = arith.constant 0 : i32
    %c0_i32_0 = arith.constant 0 : i32
    return %arg1, %c0_i32, %arg0 : i32, i32, i32
  }
}

module attributes {stable_mosaic.version = 11 : i64} {
  func.func @_conv_affine_add_stats_kernel(%arg0: i32, %arg1: i32, %arg2: memref<1x8x1024xf32, #tpu.memory_space<vmem>>, %arg3: memref<1x8x1024xf32, #tpu.memory_space<vmem>>, %arg4: memref<8x8xf32, #tpu.memory_space<vmem>>, %arg5: memref<8x1xf32, #tpu.memory_space<vmem>>, %arg6: memref<8x1xf32, #tpu.memory_space<vmem>>, %arg7: memref<8x1xf32, #tpu.memory_space<vmem>>, %arg8: memref<1x8x1024xf32, #tpu.memory_space<vmem>>, %arg9: memref<1x1x8x2xf32, #tpu.memory_space<vmem>>) attributes {dimension_semantics = [#tpu.dimension_semantics<parallel>, #tpu.dimension_semantics<parallel>], iteration_bounds = array<i64: 2, 1>, scalar_prefetch = 0 : i64, scratch_operands = 0 : i64, tpu.core_type = #tpu.core_type<tc>, window_params = [{transform_indices = @transform_0, window_bounds = array<i64: 1, 8, 1024>}, {transform_indices = @transform_1, window_bounds = array<i64: 1, 8, 1024>}, {pipeline_mode = #tpu.pipeline_mode<synchronous>, transform_indices = @transform_2, window_bounds = array<i64: 8, 8>}, {pipeline_mode = #tpu.pipeline_mode<synchronous>, transform_indices = @transform_3, window_bounds = array<i64: 8, 1>}, {pipeline_mode = #tpu.pipeline_mode<synchronous>, transform_indices = @transform_4, window_bounds = array<i64: 8, 1>}, {pipeline_mode = #tpu.pipeline_mode<synchronous>, transform_indices = @transform_5, window_bounds = array<i64: 8, 1>}, {transform_indices = @transform_6, window_bounds = array<i64: 1, 8, 1024>}, {transform_indices = @transform_7, window_bounds = array<i64: 1, 1, 8, 2>}]} {
    %c0 = arith.constant 0 : index
    %c0_0 = arith.constant 0 : index
    %c0_1 = arith.constant 0 : index
    %0 = vector.load %arg2[%c0, %c0_0, %c0_1] : memref<1x8x1024xf32, #tpu.memory_space<vmem>>, vector<1x8x1024xf32>
    %1 = vector.shape_cast %0 : vector<1x8x1024xf32> to vector<8x1024xf32>
    %c0_2 = arith.constant 0 : index
    %c0_3 = arith.constant 0 : index
    %2 = vector.load %arg6[%c0_2, %c0_3] : memref<8x1xf32, #tpu.memory_space<vmem>>, vector<8x1xf32>
    %3 = vector.broadcast %2 : vector<8x1xf32> to vector<8x1024xf32>
    %4 = arith.mulf %1, %3 : vector<8x1024xf32>
    %c0_4 = arith.constant 0 : index
    %c0_5 = arith.constant 0 : index
    %5 = vector.load %arg7[%c0_4, %c0_5] : memref<8x1xf32, #tpu.memory_space<vmem>>, vector<8x1xf32>
    %6 = vector.broadcast %5 : vector<8x1xf32> to vector<8x1024xf32>
    %7 = arith.addf %4, %6 : vector<8x1024xf32>
    %c0_6 = arith.constant 0 : index
    %c0_7 = arith.constant 0 : index
    %8 = vector.load %arg4[%c0_6, %c0_7] : memref<8x8xf32, #tpu.memory_space<vmem>>, vector<8x8xf32>
    %cst = arith.constant dense<0.000000e+00> : vector<8x1024xf32>
    %9 = tpu.matmul %8, %7, %cst {dimension_numbers = #tpu.dot_dimension_numbers<[1], [0], [0], [1], [0, 0, 1, 1], [], []>} : vector<8x8xf32>, vector<8x1024xf32>, vector<8x1024xf32> -> vector<8x1024xf32>
    %c0_8 = arith.constant 0 : index
    %c0_9 = arith.constant 0 : index
    %10 = vector.load %arg5[%c0_8, %c0_9] : memref<8x1xf32, #tpu.memory_space<vmem>>, vector<8x1xf32>
    %11 = vector.broadcast %10 : vector<8x1xf32> to vector<8x1024xf32>
    %12 = arith.addf %9, %11 : vector<8x1024xf32>
    %c0_10 = arith.constant 0 : index
    %c0_11 = arith.constant 0 : index
    %c0_12 = arith.constant 0 : index
    %13 = vector.load %arg3[%c0_10, %c0_11, %c0_12] : memref<1x8x1024xf32, #tpu.memory_space<vmem>>, vector<1x8x1024xf32>
    %14 = vector.shape_cast %13 : vector<1x8x1024xf32> to vector<8x1024xf32>
    %15 = arith.addf %12, %14 : vector<8x1024xf32>
    %c0_13 = arith.constant 0 : index
    %c0_14 = arith.constant 0 : index
    %c0_15 = arith.constant 0 : index
    %16 = vector.load %arg8[%c0_13, %c0_14, %c0_15] : memref<1x8x1024xf32, #tpu.memory_space<vmem>>, vector<1x8x1024xf32>
    %17 = vector.shape_cast %16 : vector<1x8x1024xf32> to vector<8x1024xf32>
    %18 = vector.shape_cast %15 : vector<8x1024xf32> to vector<1x8x1024xf32>
    tpu.vector_store %arg8[%c0_13, %c0_14, %c0_15], %18 {strides = array<i32>} : memref<1x8x1024xf32, #tpu.memory_space<vmem>>, vector<1x8x1024xf32>,
    %cst_16 = arith.constant dense<0.000000e+00> : vector<8xf32>
    %19 = vector.multi_reduction <add>, %15, %cst_16 [1] : vector<8x1024xf32> to vector<8xf32>
    %20 = vector.shape_cast %19 : vector<8xf32> to vector<8x1xf32>
    %21 = arith.mulf %15, %15 : vector<8x1024xf32>
    %cst_17 = arith.constant dense<0.000000e+00> : vector<8xf32>
    %22 = vector.multi_reduction <add>, %21, %cst_17 [1] : vector<8x1024xf32> to vector<8xf32>
    %23 = vector.shape_cast %22 : vector<8xf32> to vector<8x1xf32>
    %24 = tpu.concatenate %20, %23 in 1 : vector<8x1xf32>, vector<8x1xf32> -> vector<8x2xf32>
    %c0_18 = arith.constant 0 : index
    %c0_19 = arith.constant 0 : index
    %c0_20 = arith.constant 0 : index
    %c0_21 = arith.constant 0 : index
    %25 = vector.load %arg9[%c0_18, %c0_19, %c0_20, %c0_21] : memref<1x1x8x2xf32, #tpu.memory_space<vmem>>, vector<1x1x8x2xf32>
    %26 = vector.shape_cast %25 : vector<1x1x8x2xf32> to vector<8x2xf32>
    %27 = vector.shape_cast %24 : vector<8x2xf32> to vector<1x1x8x2xf32>
    tpu.vector_store %arg9[%c0_18, %c0_19, %c0_20, %c0_21], %27 {strides = array<i32>} : memref<1x1x8x2xf32, #tpu.memory_space<vmem>>, vector<1x1x8x2xf32>,
    return
  }
  func.func @transform_0(%arg0: i32, %arg1: i32) -> (i32, i32, i32) {
    %c0_i32 = arith.constant 0 : i32
    %c0_i32_0 = arith.constant 0 : i32
    return %arg0, %c0_i32, %arg1 : i32, i32, i32
  }
  func.func @transform_1(%arg0: i32, %arg1: i32) -> (i32, i32, i32) {
    %c0_i32 = arith.constant 0 : i32
    %c0_i32_0 = arith.constant 0 : i32
    return %arg0, %c0_i32, %arg1 : i32, i32, i32
  }
  func.func @transform_2(%arg0: i32, %arg1: i32) -> (i32, i32) {
    %c0_i32 = arith.constant 0 : i32
    %c0_i32_0 = arith.constant 0 : i32
    %c0_i32_1 = arith.constant 0 : i32
    return %c0_i32, %c0_i32_0 : i32, i32
  }
  func.func @transform_3(%arg0: i32, %arg1: i32) -> (i32, i32) {
    %c0_i32 = arith.constant 0 : i32
    %c0_i32_0 = arith.constant 0 : i32
    %c0_i32_1 = arith.constant 0 : i32
    return %c0_i32, %c0_i32_0 : i32, i32
  }
  func.func @transform_4(%arg0: i32, %arg1: i32) -> (i32, i32) {
    %c0_i32 = arith.constant 0 : i32
    %c0_i32_0 = arith.constant 0 : i32
    %c0_i32_1 = arith.constant 0 : i32
    return %c0_i32, %c0_i32_0 : i32, i32
  }
  func.func @transform_5(%arg0: i32, %arg1: i32) -> (i32, i32) {
    %c0_i32 = arith.constant 0 : i32
    %c0_i32_0 = arith.constant 0 : i32
    %c0_i32_1 = arith.constant 0 : i32
    return %c0_i32, %c0_i32_0 : i32, i32
  }
  func.func @transform_6(%arg0: i32, %arg1: i32) -> (i32, i32, i32) {
    %c0_i32 = arith.constant 0 : i32
    %c0_i32_0 = arith.constant 0 : i32
    return %arg0, %c0_i32, %arg1 : i32, i32, i32
  }
  func.func @transform_7(%arg0: i32, %arg1: i32) -> (i32, i32, i32, i32) {
    %c0_i32 = arith.constant 0 : i32
    %c0_i32_0 = arith.constant 0 : i32
    %c0_i32_1 = arith.constant 0 : i32
    return %arg0, %arg1, %c0_i32, %c0_i32_0 : i32, i32, i32, i32
  }
}

module attributes {stable_mosaic.version = 11 : i64} {
  func.func @_conv_affine_add_stats_kernel(%arg0: i32, %arg1: i32, %arg2: memref<1x8x1024xf32, #tpu.memory_space<vmem>>, %arg3: memref<1x8x1024xf32, #tpu.memory_space<vmem>>, %arg4: memref<8x8xf32, #tpu.memory_space<vmem>>, %arg5: memref<8x1xf32, #tpu.memory_space<vmem>>, %arg6: memref<8x1xf32, #tpu.memory_space<vmem>>, %arg7: memref<8x1xf32, #tpu.memory_space<vmem>>, %arg8: memref<1x8x1024xf32, #tpu.memory_space<vmem>>, %arg9: memref<1x1x8x2xf32, #tpu.memory_space<vmem>>) attributes {dimension_semantics = [#tpu.dimension_semantics<parallel>, #tpu.dimension_semantics<parallel>], iteration_bounds = array<i64: 2, 1>, scalar_prefetch = 0 : i64, scratch_operands = 0 : i64, tpu.core_type = #tpu.core_type<tc>, window_params = [{transform_indices = @transform_0, window_bounds = array<i64: 1, 8, 1024>}, {transform_indices = @transform_1, window_bounds = array<i64: 1, 8, 1024>}, {pipeline_mode = #tpu.pipeline_mode<synchronous>, transform_indices = @transform_2, window_bounds = array<i64: 8, 8>}, {pipeline_mode = #tpu.pipeline_mode<synchronous>, transform_indices = @transform_3, window_bounds = array<i64: 8, 1>}, {pipeline_mode = #tpu.pipeline_mode<synchronous>, transform_indices = @transform_4, window_bounds = array<i64: 8, 1>}, {pipeline_mode = #tpu.pipeline_mode<synchronous>, transform_indices = @transform_5, window_bounds = array<i64: 8, 1>}, {transform_indices = @transform_6, window_bounds = array<i64: 1, 8, 1024>}, {transform_indices = @transform_7, window_bounds = array<i64: 1, 1, 8, 2>}]} {
    %c0 = arith.constant 0 : index
    %c0_0 = arith.constant 0 : index
    %c0_1 = arith.constant 0 : index
    %0 = vector.load %arg2[%c0, %c0_0, %c0_1] : memref<1x8x1024xf32, #tpu.memory_space<vmem>>, vector<1x8x1024xf32>
    %1 = vector.shape_cast %0 : vector<1x8x1024xf32> to vector<8x1024xf32>
    %c0_2 = arith.constant 0 : index
    %c0_3 = arith.constant 0 : index
    %2 = vector.load %arg6[%c0_2, %c0_3] : memref<8x1xf32, #tpu.memory_space<vmem>>, vector<8x1xf32>
    %3 = vector.broadcast %2 : vector<8x1xf32> to vector<8x1024xf32>
    %4 = arith.mulf %1, %3 : vector<8x1024xf32>
    %c0_4 = arith.constant 0 : index
    %c0_5 = arith.constant 0 : index
    %5 = vector.load %arg7[%c0_4, %c0_5] : memref<8x1xf32, #tpu.memory_space<vmem>>, vector<8x1xf32>
    %6 = vector.broadcast %5 : vector<8x1xf32> to vector<8x1024xf32>
    %7 = arith.addf %4, %6 : vector<8x1024xf32>
    %cst = arith.constant 0.000000e+00 : f32
    %8 = vector.broadcast %cst : f32 to vector<8x1024xf32>
    %9 = arith.maximumf %7, %8 : vector<8x1024xf32>
    %c0_6 = arith.constant 0 : index
    %c0_7 = arith.constant 0 : index
    %10 = vector.load %arg4[%c0_6, %c0_7] : memref<8x8xf32, #tpu.memory_space<vmem>>, vector<8x8xf32>
    %cst_8 = arith.constant dense<0.000000e+00> : vector<8x1024xf32>
    %11 = tpu.matmul %10, %9, %cst_8 {dimension_numbers = #tpu.dot_dimension_numbers<[1], [0], [0], [1], [0, 0, 1, 1], [], []>} : vector<8x8xf32>, vector<8x1024xf32>, vector<8x1024xf32> -> vector<8x1024xf32>
    %c0_9 = arith.constant 0 : index
    %c0_10 = arith.constant 0 : index
    %12 = vector.load %arg5[%c0_9, %c0_10] : memref<8x1xf32, #tpu.memory_space<vmem>>, vector<8x1xf32>
    %13 = vector.broadcast %12 : vector<8x1xf32> to vector<8x1024xf32>
    %14 = arith.addf %11, %13 : vector<8x1024xf32>
    %c0_11 = arith.constant 0 : index
    %c0_12 = arith.constant 0 : index
    %c0_13 = arith.constant 0 : index
    %15 = vector.load %arg3[%c0_11, %c0_12, %c0_13] : memref<1x8x1024xf32, #tpu.memory_space<vmem>>, vector<1x8x1024xf32>
    %16 = vector.shape_cast %15 : vector<1x8x1024xf32> to vector<8x1024xf32>
    %17 = arith.addf %14, %16 : vector<8x1024xf32>
    %c0_14 = arith.constant 0 : index
    %c0_15 = arith.constant 0 : index
    %c0_16 = arith.constant 0 : index
    %18 = vector.load %arg8[%c0_14, %c0_15, %c0_16] : memref<1x8x1024xf32, #tpu.memory_space<vmem>>, vector<1x8x1024xf32>
    %19 = vector.shape_cast %18 : vector<1x8x1024xf32> to vector<8x1024xf32>
    %20 = vector.shape_cast %17 : vector<8x1024xf32> to vector<1x8x1024xf32>
    tpu.vector_store %arg8[%c0_14, %c0_15, %c0_16], %20 {strides = array<i32>} : memref<1x8x1024xf32, #tpu.memory_space<vmem>>, vector<1x8x1024xf32>,
    %cst_17 = arith.constant dense<0.000000e+00> : vector<8xf32>
    %21 = vector.multi_reduction <add>, %17, %cst_17 [1] : vector<8x1024xf32> to vector<8xf32>
    %22 = vector.shape_cast %21 : vector<8xf32> to vector<8x1xf32>
    %23 = arith.mulf %17, %17 : vector<8x1024xf32>
    %cst_18 = arith.constant dense<0.000000e+00> : vector<8xf32>
    %24 = vector.multi_reduction <add>, %23, %cst_18 [1] : vector<8x1024xf32> to vector<8xf32>
    %25 = vector.shape_cast %24 : vector<8xf32> to vector<8x1xf32>
    %26 = tpu.concatenate %22, %25 in 1 : vector<8x1xf32>, vector<8x1xf32> -> vector<8x2xf32>
    %c0_19 = arith.constant 0 : index
    %c0_20 = arith.constant 0 : index
    %c0_21 = arith.constant 0 : index
    %c0_22 = arith.constant 0 : index
    %27 = vector.load %arg9[%c0_19, %c0_20, %c0_21, %c0_22] : memref<1x1x8x2xf32, #tpu.memory_space<vmem>>, vector<1x1x8x2xf32>
    %28 = vector.shape_cast %27 : vector<1x1x8x2xf32> to vector<8x2xf32>
    %29 = vector.shape_cast %26 : vector<8x2xf32> to vector<1x1x8x2xf32>
    tpu.vector_store %arg9[%c0_19, %c0_20, %c0_21, %c0_22], %29 {strides = array<i32>} : memref<1x1x8x2xf32, #tpu.memory_space<vmem>>, vector<1x1x8x2xf32>,
    return
  }
  func.func @transform_0(%arg0: i32, %arg1: i32) -> (i32, i32, i32) {
    %c0_i32 = arith.constant 0 : i32
    %c0_i32_0 = arith.constant 0 : i32
    return %arg0, %c0_i32, %arg1 : i32, i32, i32
  }
  func.func @transform_1(%arg0: i32, %arg1: i32) -> (i32, i32, i32) {
    %c0_i32 = arith.constant 0 : i32
    %c0_i32_0 = arith.constant 0 : i32
    return %arg0, %c0_i32, %arg1 : i32, i32, i32
  }
  func.func @transform_2(%arg0: i32, %arg1: i32) -> (i32, i32) {
    %c0_i32 = arith.constant 0 : i32
    %c0_i32_0 = arith.constant 0 : i32
    %c0_i32_1 = arith.constant 0 : i32
    return %c0_i32, %c0_i32_0 : i32, i32
  }
  func.func @transform_3(%arg0: i32, %arg1: i32) -> (i32, i32) {
    %c0_i32 = arith.constant 0 : i32
    %c0_i32_0 = arith.constant 0 : i32
    %c0_i32_1 = arith.constant 0 : i32
    return %c0_i32, %c0_i32_0 : i32, i32
  }
  func.func @transform_4(%arg0: i32, %arg1: i32) -> (i32, i32) {
    %c0_i32 = arith.constant 0 : i32
    %c0_i32_0 = arith.constant 0 : i32
    %c0_i32_1 = arith.constant 0 : i32
    return %c0_i32, %c0_i32_0 : i32, i32
  }
  func.func @transform_5(%arg0: i32, %arg1: i32) -> (i32, i32) {
    %c0_i32 = arith.constant 0 : i32
    %c0_i32_0 = arith.constant 0 : i32
    %c0_i32_1 = arith.constant 0 : i32
    return %c0_i32, %c0_i32_0 : i32, i32
  }
  func.func @transform_6(%arg0: i32, %arg1: i32) -> (i32, i32, i32) {
    %c0_i32 = arith.constant 0 : i32
    %c0_i32_0 = arith.constant 0 : i32
    return %arg0, %c0_i32, %arg1 : i32, i32, i32
  }
  func.func @transform_7(%arg0: i32, %arg1: i32) -> (i32, i32, i32, i32) {
    %c0_i32 = arith.constant 0 : i32
    %c0_i32_0 = arith.constant 0 : i32
    %c0_i32_1 = arith.constant 0 : i32
    return %arg0, %arg1, %c0_i32, %c0_i32_0 : i32, i32, i32, i32
  }
}

module attributes {stable_mosaic.version = 11 : i64} {
  func.func @_fc12_kernel(%arg0: i32, %arg1: i32, %arg2: memref<1x8x1024xf32, #tpu.memory_space<vmem>>, %arg3: memref<128x8xf32, #tpu.memory_space<vmem>>, %arg4: memref<128x1xf32, #tpu.memory_space<vmem>>, %arg5: memref<1x128xf32, #tpu.memory_space<vmem>>, %arg6: memref<1x1xf32, #tpu.memory_space<vmem>>, %arg7: memref<1x1x1024xf32, #tpu.memory_space<vmem>>) attributes {dimension_semantics = [#tpu.dimension_semantics<parallel>, #tpu.dimension_semantics<parallel>], iteration_bounds = array<i64: 2, 1>, scalar_prefetch = 0 : i64, scratch_operands = 0 : i64, tpu.core_type = #tpu.core_type<tc>, window_params = [{transform_indices = @transform_0, window_bounds = array<i64: 1, 8, 1024>}, {pipeline_mode = #tpu.pipeline_mode<synchronous>, transform_indices = @transform_1, window_bounds = array<i64: 128, 8>}, {pipeline_mode = #tpu.pipeline_mode<synchronous>, transform_indices = @transform_2, window_bounds = array<i64: 128, 1>}, {pipeline_mode = #tpu.pipeline_mode<synchronous>, transform_indices = @transform_3, window_bounds = array<i64: 1, 128>}, {pipeline_mode = #tpu.pipeline_mode<synchronous>, transform_indices = @transform_4, window_bounds = array<i64: 1, 1>}, {transform_indices = @transform_5, window_bounds = array<i64: 1, 1, 1024>}]} {
    %c0 = arith.constant 0 : index
    %c0_0 = arith.constant 0 : index
    %0 = vector.load %arg3[%c0, %c0_0] : memref<128x8xf32, #tpu.memory_space<vmem>>, vector<128x8xf32>
    %c0_1 = arith.constant 0 : index
    %c0_2 = arith.constant 0 : index
    %c0_3 = arith.constant 0 : index
    %1 = vector.load %arg2[%c0_1, %c0_2, %c0_3] : memref<1x8x1024xf32, #tpu.memory_space<vmem>>, vector<1x8x1024xf32>
    %2 = vector.shape_cast %1 : vector<1x8x1024xf32> to vector<8x1024xf32>
    %cst = arith.constant dense<0.000000e+00> : vector<128x1024xf32>
    %3 = tpu.matmul %0, %2, %cst {dimension_numbers = #tpu.dot_dimension_numbers<[1], [0], [0], [1], [0, 0, 1, 1], [], []>} : vector<128x8xf32>, vector<8x1024xf32>, vector<128x1024xf32> -> vector<128x1024xf32>
    %c0_4 = arith.constant 0 : index
    %c0_5 = arith.constant 0 : index
    %4 = vector.load %arg4[%c0_4, %c0_5] : memref<128x1xf32, #tpu.memory_space<vmem>>, vector<128x1xf32>
    %5 = vector.broadcast %4 : vector<128x1xf32> to vector<128x1024xf32>
    %6 = arith.addf %3, %5 : vector<128x1024xf32>
    %cst_6 = arith.constant 0.000000e+00 : f32
    %7 = vector.broadcast %cst_6 : f32 to vector<128x1024xf32>
    %8 = arith.maximumf %6, %7 : vector<128x1024xf32>
    %c0_7 = arith.constant 0 : index
    %c0_8 = arith.constant 0 : index
    %9 = vector.load %arg5[%c0_7, %c0_8] : memref<1x128xf32, #tpu.memory_space<vmem>>, vector<1x128xf32>
    %cst_9 = arith.constant dense<0.000000e+00> : vector<1x1024xf32>
    %10 = tpu.matmul %9, %8, %cst_9 {dimension_numbers = #tpu.dot_dimension_numbers<[1], [0], [0], [1], [0, 0, 1, 1], [], []>} : vector<1x128xf32>, vector<128x1024xf32>, vector<1x1024xf32> -> vector<1x1024xf32>
    %c0_10 = arith.constant 0 : index
    %c0_11 = arith.constant 0 : index
    %11 = vector.load %arg6[%c0_10, %c0_11] : memref<1x1xf32, #tpu.memory_space<vmem>>, vector<1x1xf32>
    %12 = vector.broadcast %11 : vector<1x1xf32> to vector<1x1024xf32>
    %13 = arith.addf %10, %12 : vector<1x1024xf32>
    %c0_12 = arith.constant 0 : index
    %c0_13 = arith.constant 0 : index
    %c0_14 = arith.constant 0 : index
    %14 = vector.load %arg7[%c0_12, %c0_13, %c0_14] : memref<1x1x1024xf32, #tpu.memory_space<vmem>>, vector<1x1x1024xf32>
    %15 = vector.shape_cast %14 : vector<1x1x1024xf32> to vector<1x1024xf32>
    %16 = vector.shape_cast %13 : vector<1x1024xf32> to vector<1x1x1024xf32>
    tpu.vector_store %arg7[%c0_12, %c0_13, %c0_14], %16 {strides = array<i32>} : memref<1x1x1024xf32, #tpu.memory_space<vmem>>, vector<1x1x1024xf32>,
    return
  }
  func.func @transform_0(%arg0: i32, %arg1: i32) -> (i32, i32, i32) {
    %c0_i32 = arith.constant 0 : i32
    %c0_i32_0 = arith.constant 0 : i32
    return %arg0, %c0_i32, %arg1 : i32, i32, i32
  }
  func.func @transform_1(%arg0: i32, %arg1: i32) -> (i32, i32) {
    %c0_i32 = arith.constant 0 : i32
    %c0_i32_0 = arith.constant 0 : i32
    %c0_i32_1 = arith.constant 0 : i32
    return %c0_i32, %c0_i32_0 : i32, i32
  }
  func.func @transform_2(%arg0: i32, %arg1: i32) -> (i32, i32) {
    %c0_i32 = arith.constant 0 : i32
    %c0_i32_0 = arith.constant 0 : i32
    %c0_i32_1 = arith.constant 0 : i32
    return %c0_i32, %c0_i32_0 : i32, i32
  }
  func.func @transform_3(%arg0: i32, %arg1: i32) -> (i32, i32) {
    %c0_i32 = arith.constant 0 : i32
    %c0_i32_0 = arith.constant 0 : i32
    %c0_i32_1 = arith.constant 0 : i32
    return %c0_i32, %c0_i32_0 : i32, i32
  }
  func.func @transform_4(%arg0: i32, %arg1: i32) -> (i32, i32) {
    %c0_i32 = arith.constant 0 : i32
    %c0_i32_0 = arith.constant 0 : i32
    %c0_i32_1 = arith.constant 0 : i32
    return %c0_i32, %c0_i32_0 : i32, i32
  }
  func.func @transform_5(%arg0: i32, %arg1: i32) -> (i32, i32, i32) {
    %c0_i32 = arith.constant 0 : i32
    %c0_i32_0 = arith.constant 0 : i32
    return %arg0, %c0_i32, %arg1 : i32, i32, i32
  }
}

</mosaic_0001>

<bundles_post_ra>
// kernel: net2d_forward.10
= control target key start
LH: loop header
LB: loop body
LE: loop exit
PB: predicated region body
PF: predicated region fallthrough
CT: control target
= control target key end

     0   :  { %s731_s12 = smov 0   ;;  %s733_s13 = smov 0   ;;  %s786_s0 = inlined_call_operand.vmem [shape: f32[2,4,1024], index: 0, kind: input, shape index: {}]   ;;  %s787_s1 = inlined_call_operand.vmem [shape: f32[8,4], index: 1, kind: input, shape index: {}]   ;;  %s788_s2 = inlined_call_operand.vmem [shape: f32[8,1], index: 2, kind: input, shape index: {}]   ;;  %s789_s3 = inlined_call_operand.vmem [shape: f32[2,8,1024], index: 3, kind: output, shape index: {}]  }
   0x1   :  { %s735_s14 = smov 0  }
   0x2 LB: > { %s25_s15 = sadd.s32 1, %s703_s13  ;;  %p633_p0 = scmp.ge.s32.totalorder %s707_s14, 1  ;;  %s707_s14 = sphi %s735_s14, %s13_s14   ;;  %s703_s13 = sphi %s733_s13, %s791_s13   ;;  %s699_s12 = sphi %s731_s12, %s790_s12  }
   0x3   : > { %p27_p1 = scmp.ge.s32.totalorder %s25_s15, 2  ;;  %p158_p2 = scmp.lt.s32.totalorder %s707_s14, 3 }
   0x5   : > { %s793_s15 = smov (%p27_p1, %s25_s15), 0  ;;  %p159_p3 = pnand %p633_p0, %p158_p2 }
   0x6   : > { %p191_p4 = scmp.lt.s32.totalorder (!%p159_p3), %s699_s12, 1 }
   0x7   : > { %162 = sbr.rel (%p159_p3) target bundleno = 222 (0xde), region = 32 }
   0xc   : > { %v709_v0 = vmov 0.0   ;;  %v215_v1 = vld [vmem:[%s788_s2] sm:$0xff]  ;;  %s795_s12 = smov (!%p191_p4, %s699_s12), 1  ;;  %v710_v2 = vmov 0   ;;  %vm233_vm0 = vcmask 1043456   ;;  %vm229_vm1 = vcmask 31744  }
   0xd   : > { %314 = vmatprep.mubr.f32.mxu0 %v709_v0  ;;  %385 = vmatprep.mubr.f32.mxu1 %v709_v0  ;;  %s652_s18 = sshll.u32 %s795_s12, 5  ;;  %v210_v9 = vld [vmem:[%s787_s1] sm:$0xff]  ;;  %s653_s24 = sshll.u32 %s795_s12, 6 }
   0xe   : > { %680 = vset.pattern.permute.xlu0 %v710_v2  ;;  %s198_s21 = scalar_lea.vmem %s786_s0, %s652_s18  ;;  %s208_s27 = scalar_lea.vmem %s789_s3, %s653_s24 }
   0xf   : > { %218 = vperm.xlu0 %680, %v215_v1   ;;  %v211_v3 = vld [vmem:[%s198_s21] sm:$0xff]  ;;  %v212_v4 = vld [vmem:[%s198_s21 + $0x8] sm:$0xff]  ;;  %v213_v5 = vld [vmem:[%s198_s21 + $0x10] sm:$0xff] }
  0x10   : > { %v225_v6 = vcombine.high %v211_v3, %v211_v3  ;;  %v226_v7 = vcombine.high %v212_v4, %v212_v4  ;;  %v214_v8 = vld [vmem:[%s198_s21 + $0x18] sm:$0xff]  ;;  %v227_v10 = vcombine.high %v213_v5, %v213_v5 }
  0x11   : > { %v228_v11 = vcombine.high %v214_v8, %v214_v8 }
  0x12   : > { %638 = vmatprep.subr.msk.mxu0 %vm233_vm0, %v225_v6  ;;  %641 = vmatprep.subr.msk.mxu1 %vm233_vm0, %v226_v7 }
  0x13   : > { %639 = vmatpush1.msk.msra.mxu0 %vm233_vm0, %v211_v3  ;;  %642 = vmatpush1.msk.msra.mxu1 %vm233_vm0, %v212_v4 }
  0x14   : > { %640 = vmatmul.mubr.msk.f32.vlgmr.msra.gmra.mxu0 %vm229_vm1, %v210_v9  ;;  %643 = vmatmul.mubr.msk.f32.vlgmr.msra.gmra.mxu1 %vm229_vm1, %v210_v9 }
  0x15   : > { %644 = vmatprep.subr.msk.mxu0 %vm233_vm0, %v227_v10  ;;  %647 = vmatprep.subr.msk.mxu1 %vm233_vm0, %v228_v11 }
  0x16   : > { %645 = vmatpush1.msk.msra.mxu0 %vm233_vm0, %v213_v5  ;;  %648 = vmatpush1.msk.msra.mxu1 %vm233_vm0, %v214_v8 }
  0x17   : > { %456 = vmatprep.mubr.f32.mxu0 %v709_v0  ;;  %527 = vmatprep.mubr.f32.mxu1 %v709_v0 }
  0x18   : > { %646 = vmatmul.mubr.msk.f32.vlgmr.msra.gmra.mxu0 %vm229_vm1, %v210_v9  ;;  %649 = vmatmul.mubr.msk.f32.vlgmr.msra.gmra.mxu1 %vm229_vm1, %v210_v9 }
  0x8a   : > { %v219_v12 = vpop.permute.xlu0 %218 }
  0xd4   : > { %v316_v13 = vpop.f32.mrf.mxu0  ;;  %v387_v14 = vpop.f32.mrf.mxu1 }
  0xd5   : > { %v317_v15 = vadd.f32 %v316_v13, %v219_v12  ;;  %v388_v16 = vadd.f32 %v387_v14, %v219_v12 }
  0xd6   : > { %v318_v17 = vpop.f32.mrf.mxu0  ;;  %v389_v18 = vpop.f32.mrf.mxu1 }
  0xd7   : > { %534 = vst [vmem:[%s208_s27] sm:$0xff] %v317_v15  ;;  %536 = vst [vmem:[%s208_s27 + $0x10] sm:$0xff] %v388_v16  ;;  %v319_v19 = vadd.f32 %v318_v17, %v219_v12  ;;  %v390_v20 = vadd.f32 %v389_v18, %v219_v12 }
  0xd8   : > { %v458_v21 = vpop.f32.mrf.mxu0  ;;  %v529_v22 = vpop.f32.mrf.mxu1 }
  0xd9   : > { %535 = vst [vmem:[%s208_s27 + $0x8] sm:$0xff] %v319_v19  ;;  %537 = vst [vmem:[%s208_s27 + $0x18] sm:$0xff] %v390_v20  ;;  %v459_v23 = vadd.f32 %v458_v21, %v219_v12  ;;  %v530_v24 = vadd.f32 %v529_v22, %v219_v12 }
  0xda   : > { %v460_v25 = vpop.f32.mrf.mxu0  ;;  %v531_v26 = vpop.f32.mrf.mxu1 }
  0xdb   : > { %538 = vst [vmem:[%s208_s27 + $0x20] sm:$0xff] %v459_v23  ;;  %540 = vst [vmem:[%s208_s27 + $0x30] sm:$0xff] %v530_v24  ;;  %v461_v27 = vadd.f32 %v460_v25, %v219_v12  ;;  %v532_v28 = vadd.f32 %v531_v26, %v219_v12 }
  0xdd   : > { %539 = vst [vmem:[%s208_s27 + $0x28] sm:$0xff] %v461_v27  ;;  %541 = vst [vmem:[%s208_s27 + $0x38] sm:$0xff] %v532_v28 }
  0xde PF: > { %s13_s14 = sadd.s32 1, %s707_s14   ;;  %s790_s12 = smov %s703_s13 }
  0xdf   : > { %p10_p5 = scmp.ge.s32.totalorder %s13_s14, 4   ;;  %s791_s13 = smov %s793_s15 }
  0xe1   :  { %12 = sbr.rel (!%p10_p5) target bundleno = 2 (0x2), region = 62 }

// kernel: net2d_forward.11
= control target key start
LH: loop header
LB: loop body
LE: loop exit
PB: predicated region body
PF: predicated region fallthrough
CT: control target
= control target key end

     0   :  { %s1078_s18 = smov 0   ;;  %s1080_s19 = smov 0   ;;  %s1583_s0 = inlined_call_operand.vmem [shape: f32[2,8,256], index: 0, kind: input, shape index: {}]   ;;  %s1584_s1 = inlined_call_operand.vmem [shape: f32[2,8,256], index: 1, kind: input, shape index: {}]   ;;  %s1585_s2 = inlined_call_operand.vmem [shape: f32[8,8,256], index: 2, kind: input, shape index: {}]   ;;  %s1586_s3 = inlined_call_operand.vmem [shape: f32[8,8,256], index: 3, kind: input, shape index: {}]   ;;  %s1587_s4 = inlined_call_operand.vmem [shape: f32[2,8,256], index: 4, kind: output, shape index: {0}]   ;;  %s1588_s5 = inlined_call_operand.vmem [shape: f32[2,8,256], index: 5, kind: output, shape index: {1}]  }
   0x1   :  { %s1082_s20 = smov 0  }
   0x2 LB: > { %s25_s21 = sadd.s32 1, %s1042_s19  ;;  %p943_p0 = scmp.ge.s32.totalorder %s1046_s20, 1  ;;  %s1046_s20 = sphi %s1082_s20, %s16_s20   ;;  %s1042_s19 = sphi %s1080_s19, %s1635_s19   ;;  %s1038_s18 = sphi %s1078_s18, %s1634_s18  }
   0x3   : > { %p26_p1 = scmp.ge.s32.totalorder %s25_s21, 2  ;;  %p252_p2 = scmp.lt.s32.totalorder %s1046_s20, 3 }
   0x5   : > { %s1637_s21 = smov (%p26_p1, %s25_s21), 0  ;;  %p253_p3 = pnand %p943_p0, %p252_p2 }
   0x7   : > { %256 = sbr.rel (%p253_p3) target bundleno = 69 (0x45), region = 36 }
   0xc   : > { %p317_p4 = scmp.lt.s32.totalorder %s1038_s18, 1  ;;  %v375_v0 = vlaneseq  ;;  %v1101_v2 = vld [vmem:[%s1585_s2] sm:$0xff]  ;;  %v1127_v6 = vld [vmem:[%s1585_s2 + $0x10] sm:$0xff] }
   0xd   : > { %v1122_v5 = vld [vmem:[%s1586_s3] sm:$0xff]  ;;  %v1132_v7 = vld [vmem:[%s1586_s3 + $0x10] sm:$0xff] }
   0xe   : > { %s1639_s18 = smov (!%p317_p4, %s1038_s18), 1  ;;  %v376_v1 = vshrl.u32 %v375_v0, 7  ;;  %v1139_v10 = vld [vmem:[%s1585_s2 + $0x20] sm:$0xff]  ;;  %v1157_v16 = vld [vmem:[%s1585_s2 + $0x30] sm:$0xff] }
   0xf   : > { %s1096_s22 = sshll.u32 %s1639_s18, 4  ;;  %v1144_v11 = vld [vmem:[%s1586_s3 + $0x20] sm:$0xff]  ;;  %v1162_v17 = vld [vmem:[%s1586_s3 + $0x30] sm:$0xff] }
  0x10   : > { %v1103_v3 = vsub.s32 0, %v376_v1  ;;  %v1105_v4 = vsub.s32 1, %v376_v1  ;;  %s1111_s27 = scalar_lea.vmem %s1583_s0, %s1096_s22  ;;  %s1117_s30 = scalar_lea.vmem %s1584_s1, %s1096_s22  ;;  %v1185_v24 = vld [vmem:[%s1585_s2 + $0x40] sm:$0xff]  ;;  %v1237_v40 = vld [vmem:[%s1585_s2 + $0x50] sm:$0xff] }
  0x11   : > { %v368_v8 = vld [vmem:[%s1111_s27] ss:$8 sm:$0x3]  ;;  %v952_v14 = vld [vmem:[%s1111_s27 + $0x1] ss:$8 sm:$0x3]  ;;  %s1459_s26 = scalar_lea.vmem %s1587_s4, %s1096_s22  ;;  %s366_s12 = scalar_lea.vmem %s1588_s5, %s1096_s22 }
  0x12   : > { %v369_v9 = vld [vmem:[%s1117_s30] ss:$8 sm:$0x3]  ;;  %v1147_v12 = vrot.slane %v368_v8, %v1103_v3  ;;  %v953_v15 = vld [vmem:[%s1117_s30 + $0x1] ss:$8 sm:$0x3]  ;;  %v1165_v18 = vrot.slane %v368_v8, %v1105_v4  ;;  %v1171_v20 = vrot.slane %v952_v14, %v1103_v3  ;;  %v1188_v25 = vrot.slane %v952_v14, %v1105_v4 }
  0x13   : > { %v1150_v13 = vrot.slane %v369_v9, %v1103_v3  ;;  %v1168_v19 = vrot.slane %v369_v9, %v1105_v4  ;;  %v1174_v21 = vrot.slane %v953_v15, %v1103_v3  ;;  %v1177_v22 = vld [vmem:[%s1111_s27 + $0x2] ss:$8 sm:$0x3]  ;;  %v1191_v26 = vrot.slane %v953_v15, %v1105_v4  ;;  %v1206_v31 = vld [vmem:[%s1111_s27 + $0x3] ss:$8 sm:$0x3] }
  0x14   : > { %v1180_v23 = vld [vmem:[%s1117_s30 + $0x2] ss:$8 sm:$0x3]  ;;  %1604 = vst [vmem:[#allocation2_spill] sm:$0xff] %v1188_v25  ;;  %v385_v27 = vmul.f32 %v1147_v12, %v1101_v2  ;;  %v1199_v29 = vrot.slane %v1177_v22, %v1103_v3  ;;  %v433_v34 = vmul.f32 %v1127_v6, %v1171_v20  ;;  %v1222_v36 = vrot.slane %v1206_v31, %v1103_v3  ;;  %v1242_v41 = vld [vmem:[%s1586_s3 + $0x50] sm:$0xff] }
  0x15   : > { %1605 = vst [vmem:[#allocation3_spill] sm:$0xff] %v1191_v26  ;;  %v398_v28 = vmul.f32 %v1150_v13, %v1122_v5  ;;  %v1203_v30 = vrot.slane %v1180_v23, %v1103_v3  ;;  %v1209_v32 = vld [vmem:[%s1117_s30 + $0x3] ss:$8 sm:$0x3]  ;;  %v446_v35 = vmul.f32 %v1132_v7, %v1174_v21  ;;  %1606 = vst [vmem:[#allocation4_spill] sm:$0xff] %v1237_v40  ;;  %v1307_v8 = vld [vmem:[%s1585_s2 + $0x70] sm:$0xff] }
  0x16   : > { %v1214_v33 = vld [vmem:[%s1586_s3 + $0x40] sm:$0xff]  ;;  %v1226_v37 = vrot.slane %v1209_v32, %v1103_v3  ;;  %v481_v43 = vmul.f32 %v1139_v10, %v1199_v29  ;;  %v529_v50 = vmul.f32 %v1157_v16, %v1222_v36  ;;  %1609 = vst [vmem:[#allocation7_spill] sm:$0xff] %v1307_v8  ;;  %v1312_v9 = vld [vmem:[%s1585_s2 + $0x8] sm:$0xff] }
  0x17   : > { %v1229_v38 = vld [vmem:[%s1111_s27 + $0x4] ss:$8 sm:$0x3]  ;;  %v400_v42 = vsub.f32 %v385_v27, %v398_v28  ;;  %v494_v44 = vmul.f32 %v1144_v11, %v1203_v30  ;;  %v1253_v46 = vld [vmem:[%s1111_s27 + $0x5] ss:$8 sm:$0x3]  ;;  %v448_v49 = vsub.f32 %v433_v34, %v446_v35 }
  0x18   : > { %v1232_v39 = vld [vmem:[%s1117_s30 + $0x4] ss:$8 sm:$0x3]  ;;  %v1250_v45 = vrot.slane %v1229_v38, %v1103_v3  ;;  %v1256_v47 = vld [vmem:[%s1117_s30 + $0x5] ss:$8 sm:$0x3]  ;;  %v542_v51 = vmul.f32 %v1162_v17, %v1226_v37  ;;  %v1281_v57 = vrot.slane %v1253_v46, %v1103_v3 }
  0x19   : > { %v1261_v48 = vld [vmem:[%s1585_s2 + $0x60] sm:$0xff]  ;;  %v1269_v52 = vrot.slane %v1232_v39, %v1103_v3  ;;  %v496_v55 = vsub.f32 %v481_v43, %v494_v44  ;;  %v1285_v58 = vrot.slane %v1256_v47, %v1103_v3  ;;  %v450_v61 = vadd.f32 %v448_v49, %v400_v42  ;;  %v1325_v28 = vld [vmem:[%s1586_s3 + $0x70] sm:$0xff]  ;;  %v1334_v35 = vld [vmem:[%s1586_s3 + $0x8] sm:$0xff] }
  0x1a   : > { %1607 = vst [vmem:[#allocation5_spill] sm:$0xff] %v1261_v48  ;;  %v1272_v53 = vld [vmem:[%s1111_s27 + $0x6] ss:$8 sm:$0x3]  ;;  %v577_v56 = vmul.f32 %v1185_v24, %v1250_v45  ;;  %v544_v62 = vsub.f32 %v529_v50, %v542_v51  ;;  %v625_v14 = vmul.f32 %v1237_v40, %v1281_v57  ;;  %1610 = vst [vmem:[#allocation8_spill] sm:$0xff] %v1325_v28  ;;  %v1339_v42 = vld [vmem:[%s1585_s2 + $0x18] sm:$0xff] }
  0x1b   : > { %v1275_v54 = vld [vmem:[%s1117_s30 + $0x6] ss:$8 sm:$0x3]  ;;  %1608 = vst [vmem:[#allocation6_spill] sm:$0xff] %v1285_v58  ;;  %v590_v63 = vmul.f32 %v1214_v33, %v1269_v52  ;;  %v1302_v1 = vrot.slane %v1272_v53, %v1103_v3  ;;  %v638_v15 = vmul.f32 %v1242_v41, %v1285_v58  ;;  %1612 = vst [vmem:[#allocation10_spill] sm:$0xff] %v1339_v42  ;;  %v1350_v51 = vld [vmem:[%s1586_s3 + $0x18] sm:$0xff] }
  0x1c   : > { %v1288_v59 = vld [vmem:[%s1111_s27 + $0x7] ss:$8 sm:$0x3]  ;;  %v1320_v27 = vrot.slane %v1275_v54, %v1103_v3  ;;  %v498_v43 = vadd.f32 %v496_v55, %v450_v61 }
  0x1d   : > { %v1291_v60 = vld [vmem:[%s1117_s30 + $0x7] ss:$8 sm:$0x3]  ;;  %v1329_v34 = vrot.slane %v1288_v59, %v1103_v3  ;;  %v592_v44 = vsub.f32 %v577_v56, %v590_v63  ;;  %v673_v49 = vmul.f32 %v1261_v48, %v1302_v1  ;;  %v640_v40 = vsub.f32 %v625_v14, %v638_v15 }
  0x1e   : > { %v1298_v0 = vld [vmem:[%s1586_s3 + $0x60] sm:$0xff]  ;;  %v1345_v50 = vrot.slane %v1291_v60, %v1103_v3  ;;  %v386_v56 = vmul.f32 %v1165_v18, %v1312_v9  ;;  %v546_v61 = vadd.f32 %v544_v62, %v498_v43  ;;  %v399_v63 = vmul.f32 %v1168_v19, %v1334_v35  ;;  %v1367_v14 = vld [vmem:[%s1585_s2 + $0x28] sm:$0xff] }
  0x1f   : > { %1611 = vst [vmem:[#allocation9_spill] sm:$0xff] %v1329_v34  ;;  %v686_v58 = vmul.f32 %v1298_v0, %v1320_v27  ;;  %v721_v55 = vmul.f32 %v1307_v8, %v1329_v34  ;;  %v434_v48 = vmul.f32 %v1339_v42, %v1188_v25  ;;  %v1372_v15 = vld [vmem:[%s1586_s3 + $0x28] sm:$0xff]  ;;  %v447_v43 = vmul.f32 %v1350_v51, %v1191_v26  ;;  %v1387_v42 = vld [vmem:[%s1585_s2 + $0x38] sm:$0xff] }
  0x20   : > { %1613 = vst [vmem:[#allocation11_spill] sm:$0xff] %v1345_v50  ;;  %v734_v3 = vmul.f32 %v1325_v28, %v1345_v50  ;;  %v1378_v8 = vrot.slane %v1177_v22, %v1105_v4  ;;  %v1382_v50 = vrot.slane %v1180_v23, %v1105_v4  ;;  %1614 = vst [vmem:[#allocation12_spill] sm:$0xff] %v1387_v42 }
  0x21   : > { %v688_v62 = vsub.f32 %v673_v49, %v686_v58  ;;  %v594_v25 = vadd.f32 %v592_v44, %v546_v61  ;;  %v401_v34 = vsub.f32 %v386_v56, %v399_v63  ;;  %v1392_v58 = vld [vmem:[%s1586_s3 + $0x38] sm:$0xff]  ;;  %v1396_v22 = vrot.slane %v1206_v31, %v1105_v4  ;;  %v1414_v31 = vld [vmem:[%s1586_s3 + $0x48] sm:$0xff] }
  0x22   : > { %v736_v28 = vsub.f32 %v721_v55, %v734_v3  ;;  %v449_v49 = vsub.f32 %v434_v48, %v447_v43  ;;  %v482_v23 = vmul.f32 %v1367_v14, %v1378_v8  ;;  %v495_v26 = vmul.f32 %v1372_v15, %v1382_v50  ;;  %v1409_v55 = vld [vmem:[%s1585_s2 + $0x48] sm:$0xff]  ;;  %1616 = vst [vmem:[#allocation14_spill] sm:$0xff] %v1414_v31  ;;  %v1429_v3 = vld [vmem:[%s1585_s2 + $0x58] sm:$0xff] }
  0x23   : > { %v1404_v44 = vrot.slane %v1209_v32, %v1105_v4  ;;  %1615 = vst [vmem:[#allocation13_spill] sm:$0xff] %v1409_v55  ;;  %v642_v48 = vadd.f32 %v640_v40, %v594_v25  ;;  %v530_v56 = vmul.f32 %v1387_v42, %v1396_v22  ;;  %v1420_v61 = vrot.slane %v1229_v38, %v1105_v4  ;;  %v1436_v40 = vld [vmem:[%s1586_s3 + $0x58] sm:$0xff] }
  0x24   : > { %v1424_v32 = vrot.slane %v1232_v39, %v1105_v4  ;;  %v451_v63 = vadd.f32 %v449_v49, %v401_v34  ;;  %v497_v43 = vsub.f32 %v482_v23, %v495_v26  ;;  %v1440_v38 = vrot.slane %v1253_v46, %v1105_v4  ;;  %v1453_v49 = vld [vmem:[%s1585_s2 + $0x68] sm:$0xff] }
  0x25   : > { %v543_v25 = vmul.f32 %v1392_v58, %v1404_v44  ;;  %v690_v39 = vadd.f32 %v688_v62, %v642_v48  ;;  %v578_v42 = vmul.f32 %v1409_v55, %v1420_v61  ;;  %v1448_v26 = vrot.slane %v1256_v47, %v1105_v4  ;;  %1618 = vst [vmem:[#allocation16_spill] sm:$0xff] %v1453_v49  ;;  %v1466_v47 = vld [vmem:[%s1586_s3 + $0x68] sm:$0xff] }
  0x26   : > { %1617 = vst [vmem:[#allocation15_spill] sm:$0xff] %v1424_v32  ;;  %v591_v34 = vmul.f32 %v1414_v31, %v1424_v32  ;;  %v499_v46 = vadd.f32 %v497_v43, %v451_v63  ;;  %v626_v23 = vmul.f32 %v1429_v3, %v1440_v38  ;;  %v1470_v48 = vrot.slane %v1272_v53, %v1105_v4  ;;  %v1481_v63 = vld [vmem:[%s1585_s2 + $0x78] sm:$0xff] }
  0x27   : > { %v545_v62 = vsub.f32 %v530_v56, %v543_v25  ;;  %v738_v55 = vadd.f32 %v736_v28, %v690_v39  ;;  %v639_v31 = vmul.f32 %v1436_v40, %v1448_v26  ;;  %v1476_v56 = vrot.slane %v1275_v54, %v1105_v4  ;;  %v1486_v43 = vld [vmem:[%s1586_s3 + $0x78] sm:$0xff] }
  0x28   : > { %v593_v32 = vsub.f32 %v578_v42, %v591_v34  ;;  %v674_v28 = vmul.f32 %v1453_v49, %v1470_v48  ;;  %v1492_v42 = vrot.slane %v1288_v59, %v1105_v4  ;;  %v1496_v54 = vrot.slane %v1291_v60, %v1105_v4 }
  0x29   : > { %v547_v53 = vadd.f32 %v545_v62, %v499_v46  ;;  %748 = vst [vmem:[%s1459_s26] sm:$0xff] %v738_v55  ;;  %v641_v25 = vsub.f32 %v626_v23, %v639_v31  ;;  %v687_v39 = vmul.f32 %v1466_v47, %v1476_v56  ;;  %v404_v34 = vmul.f32 %v1147_v12, %v1122_v5 }
  0x2a   : > { %v406_v46 = vmul.f32 %v1150_v13, %v1101_v2  ;;  %v722_v59 = vmul.f32 %v1481_v63, %v1492_v42  ;;  %v735_v49 = vmul.f32 %v1486_v43, %v1496_v54  ;;  %v452_v4 = vmul.f32 %v1132_v7, %v1171_v20 }
  0x2b   : > { %v595_v62 = vadd.f32 %v593_v32, %v547_v53  ;;  %v689_v60 = vsub.f32 %v674_v28, %v687_v39  ;;  %v454_v31 = vmul.f32 %v1127_v6, %v1174_v21  ;;  %v500_v5 = vmul.f32 %v1144_v11, %v1199_v29 }
  0x2c   : > { %v408_v55 = vadd.f32 %v406_v46, %v404_v34  ;;  %v737_v2 = vsub.f32 %v722_v59, %v735_v49  ;;  %v502_v13 = vmul.f32 %v1139_v10, %v1203_v30  ;;  %v548_v32 = vmul.f32 %v1162_v17, %v1222_v36  ;;  %v1619_v10 = vld [vmem:[#allocation6_spill] sm:$0xff]  ;;  %v1620_v30 = vld [vmem:[#allocation4_spill] sm:$0xff] }
  0x2d   : > { %v643_v12 = vadd.f32 %v641_v25, %v595_v62  ;;  %v456_v23 = vadd.f32 %v454_v31, %v452_v4  ;;  %v550_v7 = vmul.f32 %v1157_v16, %v1226_v37  ;;  %v596_v20 = vmul.f32 %v1214_v33, %v1250_v45  ;;  %v1621_v45 = vld [vmem:[#allocation5_spill] sm:$0xff]  ;;  %v1623_v25 = vld [vmem:[#allocation8_spill] sm:$0xff]  ;;  %v1624_v34 = vld [vmem:[#allocation2_spill] sm:$0xff] }
  0x2e   : > { %v598_v6 = vmul.f32 %v1185_v24, %v1269_v52  ;;  %v504_v21 = vadd.f32 %v502_v13, %v500_v5  ;;  %v644_v29 = vmul.f32 %v1242_v41, %v1281_v57  ;;  %v646_v49 = vmul.f32 %v1620_v30, %v1619_v10  ;;  %v1622_v57 = vld [vmem:[#allocation9_spill] sm:$0xff]  ;;  %v1625_v62 = vld [vmem:[#allocation3_spill] sm:$0xff]  ;;  %v1626_v59 = vld [vmem:[#allocation10_spill] sm:$0xff] }
  0x2f   : > { %v691_v11 = vadd.f32 %v689_v60, %v643_v12  ;;  %v458_v17 = vadd.f32 %v456_v23, %v408_v55  ;;  %v552_v36 = vadd.f32 %v550_v7, %v548_v32  ;;  %v692_v33 = vmul.f32 %v1298_v0, %v1302_v1  ;;  %v1627_v4 = vld [vmem:[#allocation11_spill] sm:$0xff]  ;;  %v1630_v5 = vld [vmem:[#allocation14_spill] sm:$0xff]  ;;  %v1632_v32 = vld [vmem:[#allocation13_spill] sm:$0xff] }
  0x30   : > { %v600_v28 = vadd.f32 %v598_v6, %v596_v20  ;;  %v648_v16 = vadd.f32 %v646_v49, %v644_v29  ;;  %v694_v24 = vmul.f32 %v1621_v45, %v1320_v27  ;;  %v405_v52 = vmul.f32 %v1165_v18, %v1334_v35  ;;  %v1628_v60 = vld [vmem:[#allocation7_spill] sm:$0xff] }
  0x31   : > { %v739_v53 = vadd.f32 %v737_v2, %v691_v11  ;;  %v506_v37 = vadd.f32 %v504_v21, %v458_v17  ;;  %v407_v41 = vmul.f32 %v1168_v19, %v1312_v9  ;;  %v740_v39 = vmul.f32 %v1623_v25, %v1622_v57  ;;  %v1631_v13 = vld [vmem:[#allocation15_spill] sm:$0xff]  ;;  %v1633_v11 = vld [vmem:[#allocation16_spill] sm:$0xff] }
  0x32   : > { %v453_v46 = vmul.f32 %v1350_v51, %v1624_v34  ;;  %v455_v0 = vmul.f32 %v1626_v59, %v1625_v62  ;;  %v501_v1 = vmul.f32 %v1372_v15, %v1378_v8  ;;  %v742_v18 = vmul.f32 %v1628_v60, %v1627_v4  ;;  %v1629_v51 = vld [vmem:[#allocation12_spill] sm:$0xff] }
  0x33   : > { %749 = vst [vmem:[%s1459_s26 + $0x8] sm:$0xff] %v739_v53  ;;  %v554_v27 = vadd.f32 %v552_v36, %v506_v37  ;;  %v409_v35 = vadd.f32 %v407_v41, %v405_v52  ;;  %v503_v19 = vmul.f32 %v1367_v14, %v1382_v50  ;;  %v549_v55 = vmul.f32 %v1392_v58, %v1396_v22 }
  0x34   : > { %v457_v9 = vadd.f32 %v455_v0, %v453_v46  ;;  %v551_v31 = vmul.f32 %v1629_v51, %v1404_v44  ;;  %v597_v12 = vmul.f32 %v1630_v5, %v1420_v61  ;;  %v696_v15 = vadd.f32 %v694_v24, %v692_v33 }
  0x35   : > { %v602_v8 = vadd.f32 %v600_v28, %v554_v27  ;;  %v505_v2 = vadd.f32 %v503_v19, %v501_v1  ;;  %v599_v23 = vmul.f32 %v1632_v32, %v1631_v13  ;;  %v645_v50 = vmul.f32 %v1436_v40, %v1440_v38 }
  0x36   : > { %v459_v7 = vadd.f32 %v457_v9, %v409_v35  ;;  %v553_v20 = vadd.f32 %v551_v31, %v549_v55  ;;  %v647_v14 = vmul.f32 %v1429_v3, %v1448_v26  ;;  %v744_v22 = vadd.f32 %v742_v18, %v740_v39 }
  0x37   : > { %v650_v58 = vadd.f32 %v648_v16, %v602_v8  ;;  %v601_v6 = vadd.f32 %v599_v23, %v597_v12  ;;  %v693_v61 = vmul.f32 %v1466_v47, %v1470_v48  ;;  %v695_v21 = vmul.f32 %v1633_v11, %v1476_v56 }
  0x38   : > { %v507_v44 = vadd.f32 %v505_v2, %v459_v7  ;;  %v649_v40 = vadd.f32 %v647_v14, %v645_v50  ;;  %v741_v3 = vmul.f32 %v1486_v43, %v1492_v42  ;;  %v743_v38 = vmul.f32 %v1481_v63, %v1496_v54 }
  0x39   : > { %v698_v29 = vadd.f32 %v696_v15, %v650_v58  ;;  %v697_v49 = vadd.f32 %v695_v21, %v693_v61 }
  0x3a   : > { %v555_v10 = vadd.f32 %v553_v20, %v507_v44  ;;  %v745_v48 = vadd.f32 %v743_v38, %v741_v3 }
  0x3b   : > { %v746_v26 = vadd.f32 %v744_v22, %v698_v29 }
  0x3c   : > { %v603_v30 = vadd.f32 %v601_v6, %v555_v10 }
  0x3d   : > { %750 = vst [vmem:[%s366_s12] sm:$0xff] %v746_v26 }
  0x3e   : > { %v651_v47 = vadd.f32 %v649_v40, %v603_v30 }
  0x40   : > { %v699_v56 = vadd.f32 %v697_v49, %v651_v47 }
  0x42   : > { %v747_v17 = vadd.f32 %v745_v48, %v699_v56 }
  0x44   : > { %751 = vst [vmem:[%s366_s12 + $0x8] sm:$0xff] %v747_v17 }
  0x45 PF: > { %s16_s20 = sadd.s32 1, %s1046_s20   ;;  %s1634_s18 = smov %s1042_s19 }
  0x46   : > { %p13_p5 = scmp.ge.s32.totalorder %s16_s20, 4   ;;  %s1635_s19 = smov %s1637_s21 }
  0x48   :  { %15 = sbr.rel (!%p13_p5) target bundleno = 2 (0x2), region = 115 }

// kernel: reverse.9
= control target key start
LH: loop header
LB: loop body
LE: loop exit
PB: predicated region body
PF: predicated region fallthrough
CT: control target
= control target key end

     0   :  { %v2_v0 = vlaneseq  ;;  %s2640_s0 = inlined_call_operand.vmem [shape: f32[2,8,8,8,7], index: 0, kind: input, shape index: {}]   ;;  %s2641_s1 = inlined_call_operand.vmem [shape: f32[2,8,8,8,7], index: 1, kind: output, shape index: {}]  }
   0x1   :  { %v291_v2 = vld [vmem:[%s2640_s0 + $0x10] sm:$0xff]  ;;  %v287_v3 = vld [vmem:[%s2640_s0] sm:$0xff]  ;;  %v293_v4 = vld [vmem:[%s2640_s0 + $0x18] sm:$0xff] }
   0x2   :  { %v3_v1 = vsub.s32 6, %v2_v0  ;;  %v289_v5 = vld [vmem:[%s2640_s0 + $0x8] sm:$0xff]  ;;  %v295_v7 = vld [vmem:[%s2640_s0 + $0x20] sm:$0xff]  ;;  %v301_v8 = vld [vmem:[%s2640_s0 + $0x38] sm:$0xff] }
   0x3   :  { %v297_v6 = vld [vmem:[%s2640_s0 + $0x28] sm:$0xff]  ;;  %v299_v9 = vld [vmem:[%s2640_s0 + $0x30] sm:$0xff]  ;;  %v303_v11 = vld [vmem:[%s2640_s0 + $0x40] sm:$0xff] }
   0x4   :  { %4 = vset.pattern.permute.xlu0 %v3_v1  ;;  %1861 = vset.pattern.permute.xlu1 %v3_v1  ;;  %v305_v10 = vld [vmem:[%s2640_s0 + $0x48] sm:$0xff]  ;;  %v309_v12 = vld [vmem:[%s2640_s0 + $0x58] sm:$0xff]  ;;  %v307_v13 = vld [vmem:[%s2640_s0 + $0x50] sm:$0xff] }
   0x5   :  { %559 = vperm.xlu1 %1861, %v291_v2   ;;  %547 = vperm.xlu0 %4, %v287_v3   ;;  %v313_v14 = vld [vmem:[%s2640_s0 + $0x68] sm:$0xff]  ;;  %v311_v15 = vld [vmem:[%s2640_s0 + $0x60] sm:$0xff]  ;;  %v317_v16 = vld [vmem:[%s2640_s0 + $0x78] sm:$0xff] }
   0x6   :  { %v315_v17 = vld [vmem:[%s2640_s0 + $0x70] sm:$0xff]  ;;  %v321_v18 = vld [vmem:[%s2640_s0 + $0x88] sm:$0xff]  ;;  %v319_v19 = vld [vmem:[%s2640_s0 + $0x80] sm:$0xff] }
   0x7   :  { %v325_v20 = vld [vmem:[%s2640_s0 + $0x98] sm:$0xff]  ;;  %v323_v21 = vld [vmem:[%s2640_s0 + $0x90] sm:$0xff]  ;;  %v329_v22 = vld [vmem:[%s2640_s0 + $0xa8] sm:$0xff] }
   0x8   :  { %v327_v23 = vld [vmem:[%s2640_s0 + $0xa0] sm:$0xff]  ;;  %v333_v24 = vld [vmem:[%s2640_s0 + $0xb8] sm:$0xff]  ;;  %v331_v25 = vld [vmem:[%s2640_s0 + $0xb0] sm:$0xff] }
   0x9   :  { %565 = vperm.xlu1 %1861, %v293_v4   ;;  %553 = vperm.xlu0 %4, %v289_v5   ;;  %v337_v26 = vld [vmem:[%s2640_s0 + $0xc8] sm:$0xff]  ;;  %v335_v27 = vld [vmem:[%s2640_s0 + $0xc0] sm:$0xff]  ;;  %v341_v28 = vld [vmem:[%s2640_s0 + $0xd8] sm:$0xff] }
   0xa   :  { %v339_v29 = vld [vmem:[%s2640_s0 + $0xd0] sm:$0xff]  ;;  %v345_v30 = vld [vmem:[%s2640_s0 + $0xe8] sm:$0xff]  ;;  %v343_v31 = vld [vmem:[%s2640_s0 + $0xe0] sm:$0xff] }
   0xb   :  { %v349_v32 = vld [vmem:[%s2640_s0 + $0xf8] sm:$0xff]  ;;  %v347_v33 = vld [vmem:[%s2640_s0 + $0xf0] sm:$0xff]  ;;  %v353_v34 = vld [vmem:[%s2640_s0 + $0x108] sm:$0xff] }
   0xc   :  { %v351_v35 = vld [vmem:[%s2640_s0 + $0x100] sm:$0xff]  ;;  %v357_v36 = vld [vmem:[%s2640_s0 + $0x118] sm:$0xff]  ;;  %v355_v37 = vld [vmem:[%s2640_s0 + $0x110] sm:$0xff] }
   0xd   :  { %577 = vperm.xlu1 %1861, %v297_v6   ;;  %571 = vperm.xlu0 %4, %v295_v7   ;;  %v361_v38 = vld [vmem:[%s2640_s0 + $0x128] sm:$0xff]  ;;  %v359_v39 = vld [vmem:[%s2640_s0 + $0x120] sm:$0xff]  ;;  %v365_v40 = vld [vmem:[%s2640_s0 + $0x138] sm:$0xff] }
   0xe   :  { %v363_v41 = vld [vmem:[%s2640_s0 + $0x130] sm:$0xff]  ;;  %v369_v42 = vld [vmem:[%s2640_s0 + $0x148] sm:$0xff]  ;;  %v367_v43 = vld [vmem:[%s2640_s0 + $0x140] sm:$0xff] }
   0xf   :  { %v373_v44 = vld [vmem:[%s2640_s0 + $0x158] sm:$0xff]  ;;  %v371_v45 = vld [vmem:[%s2640_s0 + $0x150] sm:$0xff]  ;;  %v377_v46 = vld [vmem:[%s2640_s0 + $0x168] sm:$0xff] }
  0x10   :  { %v375_v47 = vld [vmem:[%s2640_s0 + $0x160] sm:$0xff]  ;;  %v381_v48 = vld [vmem:[%s2640_s0 + $0x178] sm:$0xff]  ;;  %v379_v49 = vld [vmem:[%s2640_s0 + $0x170] sm:$0xff] }
  0x11   :  { %589 = vperm.xlu1 %1861, %v301_v8   ;;  %583 = vperm.xlu0 %4, %v299_v9   ;;  %v385_v50 = vld [vmem:[%s2640_s0 + $0x188] sm:$0xff]  ;;  %v383_v51 = vld [vmem:[%s2640_s0 + $0x180] sm:$0xff]  ;;  %v389_v52 = vld [vmem:[%s2640_s0 + $0x198] sm:$0xff] }
  0x12   :  { %v387_v53 = vld [vmem:[%s2640_s0 + $0x190] sm:$0xff]  ;;  %v393_v54 = vld [vmem:[%s2640_s0 + $0x1a8] sm:$0xff]  ;;  %v391_v55 = vld [vmem:[%s2640_s0 + $0x1a0] sm:$0xff] }
  0x13   :  { %v397_v56 = vld [vmem:[%s2640_s0 + $0x1b8] sm:$0xff]  ;;  %v395_v57 = vld [vmem:[%s2640_s0 + $0x1b0] sm:$0xff]  ;;  %v401_v58 = vld [vmem:[%s2640_s0 + $0x1c8] sm:$0xff] }
  0x14   :  { %v399_v59 = vld [vmem:[%s2640_s0 + $0x1c0] sm:$0xff]  ;;  %v405_v60 = vld [vmem:[%s2640_s0 + $0x1d8] sm:$0xff]  ;;  %v403_v61 = vld [vmem:[%s2640_s0 + $0x1d0] sm:$0xff] }
  0x15   :  { %601 = vperm.xlu1 %1861, %v305_v10   ;;  %595 = vperm.xlu0 %4, %v303_v11   ;;  %v409_v62 = vld [vmem:[%s2640_s0 + $0x1e8] sm:$0xff]  ;;  %v407_v63 = vld [vmem:[%s2640_s0 + $0x1e0] sm:$0xff]  ;;  %v413_v0 = vld [vmem:[%s2640_s0 + $0x1f8] sm:$0xff] }
  0x16   :  { %v411_v1 = vld [vmem:[%s2640_s0 + $0x1f0] sm:$0xff]  ;;  %v417_v4 = vld [vmem:[%s2640_s0 + $0x208] sm:$0xff]  ;;  %v415_v5 = vld [vmem:[%s2640_s0 + $0x200] sm:$0xff] }
  0x17   :  { %v421_v8 = vld [vmem:[%s2640_s0 + $0x218] sm:$0xff]  ;;  %v419_v9 = vld [vmem:[%s2640_s0 + $0x210] sm:$0xff] }
  0x19   :  { %613 = vperm.xlu1 %1861, %v309_v12   ;;  %607 = vperm.xlu0 %4, %v307_v13   ;;  %v425_v12 = vld [vmem:[%s2640_s0 + $0x228] sm:$0xff]  ;;  %v423_v13 = vld [vmem:[%s2640_s0 + $0x220] sm:$0xff] }
  0x1d   :  { %625 = vperm.xlu1 %1861, %v313_v14   ;;  %619 = vperm.xlu0 %4, %v311_v15  }
  0x21   :  { %637 = vperm.xlu1 %1861, %v317_v16   ;;  %631 = vperm.xlu0 %4, %v315_v17   ;;  %v429_v16 = vld [vmem:[%s2640_s0 + $0x238] sm:$0xff]  ;;  %v427_v17 = vld [vmem:[%s2640_s0 + $0x230] sm:$0xff] }
  0x25   :  { %649 = vperm.xlu1 %1861, %v321_v18   ;;  %643 = vperm.xlu0 %4, %v319_v19  }
  0x29   :  { %661 = vperm.xlu1 %1861, %v325_v20   ;;  %655 = vperm.xlu0 %4, %v323_v21   ;;  %v433_v20 = vld [vmem:[%s2640_s0 + $0x248] sm:$0xff]  ;;  %v431_v21 = vld [vmem:[%s2640_s0 + $0x240] sm:$0xff] }
  0x2d   :  { %673 = vperm.xlu1 %1861, %v329_v22   ;;  %667 = vperm.xlu0 %4, %v327_v23  }
  0x31   :  { %685 = vperm.xlu1 %1861, %v333_v24   ;;  %679 = vperm.xlu0 %4, %v331_v25   ;;  %v437_v24 = vld [vmem:[%s2640_s0 + $0x258] sm:$0xff]  ;;  %v435_v25 = vld [vmem:[%s2640_s0 + $0x250] sm:$0xff] }
  0x35   :  { %697 = vperm.xlu1 %1861, %v337_v26   ;;  %691 = vperm.xlu0 %4, %v335_v27  }
  0x39   :  { %709 = vperm.xlu1 %1861, %v341_v28   ;;  %703 = vperm.xlu0 %4, %v339_v29   ;;  %v441_v28 = vld [vmem:[%s2640_s0 + $0x268] sm:$0xff]  ;;  %v439_v29 = vld [vmem:[%s2640_s0 + $0x260] sm:$0xff] }
  0x3d   :  { %721 = vperm.xlu1 %1861, %v345_v30   ;;  %715 = vperm.xlu0 %4, %v343_v31  }
  0x41   :  { %733 = vperm.xlu1 %1861, %v349_v32   ;;  %727 = vperm.xlu0 %4, %v347_v33   ;;  %v445_v32 = vld [vmem:[%s2640_s0 + $0x278] sm:$0xff]  ;;  %v443_v33 = vld [vmem:[%s2640_s0 + $0x270] sm:$0xff] }
  0x45   :  { %745 = vperm.xlu1 %1861, %v353_v34   ;;  %739 = vperm.xlu0 %4, %v351_v35  }
  0x49   :  { %757 = vperm.xlu1 %1861, %v357_v36   ;;  %751 = vperm.xlu0 %4, %v355_v37   ;;  %v449_v36 = vld [vmem:[%s2640_s0 + $0x288] sm:$0xff]  ;;  %v447_v37 = vld [vmem:[%s2640_s0 + $0x280] sm:$0xff] }
  0x4d   :  { %769 = vperm.xlu1 %1861, %v361_v38   ;;  %763 = vperm.xlu0 %4, %v359_v39  }
  0x51   :  { %781 = vperm.xlu1 %1861, %v365_v40   ;;  %775 = vperm.xlu0 %4, %v363_v41   ;;  %v453_v40 = vld [vmem:[%s2640_s0 + $0x298] sm:$0xff]  ;;  %v451_v41 = vld [vmem:[%s2640_s0 + $0x290] sm:$0xff] }
  0x55   :  { %793 = vperm.xlu1 %1861, %v369_v42   ;;  %787 = vperm.xlu0 %4, %v367_v43  }
  0x59   :  { %805 = vperm.xlu1 %1861, %v373_v44   ;;  %799 = vperm.xlu0 %4, %v371_v45   ;;  %v457_v44 = vld [vmem:[%s2640_s0 + $0x2a8] sm:$0xff]  ;;  %v455_v45 = vld [vmem:[%s2640_s0 + $0x2a0] sm:$0xff] }
  0x5d   :  { %817 = vperm.xlu1 %1861, %v377_v46   ;;  %811 = vperm.xlu0 %4, %v375_v47  }
  0x61   :  { %829 = vperm.xlu1 %1861, %v381_v48   ;;  %823 = vperm.xlu0 %4, %v379_v49   ;;  %v461_v48 = vld [vmem:[%s2640_s0 + $0x2b8] sm:$0xff]  ;;  %v459_v49 = vld [vmem:[%s2640_s0 + $0x2b0] sm:$0xff] }
  0x65   :  { %841 = vperm.xlu1 %1861, %v385_v50   ;;  %835 = vperm.xlu0 %4, %v383_v51  }
  0x69   :  { %853 = vperm.xlu1 %1861, %v389_v52   ;;  %847 = vperm.xlu0 %4, %v387_v53   ;;  %v465_v52 = vld [vmem:[%s2640_s0 + $0x2c8] sm:$0xff]  ;;  %v463_v53 = vld [vmem:[%s2640_s0 + $0x2c0] sm:$0xff] }
  0x6d   :  { %865 = vperm.xlu1 %1861, %v393_v54   ;;  %859 = vperm.xlu0 %4, %v391_v55  }
  0x71   :  { %877 = vperm.xlu1 %1861, %v397_v56   ;;  %871 = vperm.xlu0 %4, %v395_v57   ;;  %v469_v56 = vld [vmem:[%s2640_s0 + $0x2d8] sm:$0xff]  ;;  %v467_v57 = vld [vmem:[%s2640_s0 + $0x2d0] sm:$0xff] }
  0x75   :  { %889 = vperm.xlu1 %1861, %v401_v58   ;;  %883 = vperm.xlu0 %4, %v399_v59  }
  0x79   :  { %901 = vperm.xlu1 %1861, %v405_v60   ;;  %895 = vperm.xlu0 %4, %v403_v61   ;;  %v473_v60 = vld [vmem:[%s2640_s0 + $0x2e8] sm:$0xff]  ;;  %v471_v61 = vld [vmem:[%s2640_s0 + $0x2e0] sm:$0xff] }
  0x7d   :  { %913 = vperm.xlu1 %1861, %v409_v62   ;;  %907 = vperm.xlu0 %4, %v407_v63  }
  0x80   :  { %v560_v2 = vpop.permute.xlu1 %559  ;;  %v548_v3 = vpop.permute.xlu0 %547 }
  0x81   :  { %1599 = vst [vmem:[%s2641_s1 + $0x10] sm:$0xff] %v560_v2  ;;  %1595 = vst [vmem:[%s2641_s1] sm:$0xff] %v548_v3  ;;  %925 = vperm.xlu1 %1861, %v413_v0   ;;  %919 = vperm.xlu0 %4, %v411_v1   ;;  %v477_v0 = vld [vmem:[%s2640_s0 + $0x2f8] sm:$0xff]  ;;  %v475_v1 = vld [vmem:[%s2640_s0 + $0x2f0] sm:$0xff] }
  0x84   :  { %v566_v6 = vpop.permute.xlu1 %565  ;;  %v554_v7 = vpop.permute.xlu0 %553 }
  0x85   :  { %1601 = vst [vmem:[%s2641_s1 + $0x18] sm:$0xff] %v566_v6  ;;  %1597 = vst [vmem:[%s2641_s1 + $0x8] sm:$0xff] %v554_v7  ;;  %937 = vperm.xlu1 %1861, %v417_v4   ;;  %931 = vperm.xlu0 %4, %v415_v5   ;;  %v481_v4 = vld [vmem:[%s2640_s0 + $0x308] sm:$0xff]  ;;  %v479_v5 = vld [vmem:[%s2640_s0 + $0x300] sm:$0xff] }
  0x88   :  { %v578_v10 = vpop.permute.xlu1 %577  ;;  %v572_v11 = vpop.permute.xlu0 %571 }
  0x89   :  { %1605 = vst [vmem:[%s2641_s1 + $0x28] sm:$0xff] %v578_v10  ;;  %1603 = vst [vmem:[%s2641_s1 + $0x20] sm:$0xff] %v572_v11  ;;  %949 = vperm.xlu1 %1861, %v421_v8   ;;  %943 = vperm.xlu0 %4, %v419_v9   ;;  %v485_v8 = vld [vmem:[%s2640_s0 + $0x318] sm:$0xff]  ;;  %v483_v9 = vld [vmem:[%s2640_s0 + $0x310] sm:$0xff] }
  0x8c   :  { %v590_v14 = vpop.permute.xlu1 %589  ;;  %v584_v15 = vpop.permute.xlu0 %583 }
  0x8d   :  { %1609 = vst [vmem:[%s2641_s1 + $0x38] sm:$0xff] %v590_v14  ;;  %1607 = vst [vmem:[%s2641_s1 + $0x30] sm:$0xff] %v584_v15  ;;  %961 = vperm.xlu1 %1861, %v425_v12   ;;  %955 = vperm.xlu0 %4, %v423_v13   ;;  %v489_v12 = vld [vmem:[%s2640_s0 + $0x328] sm:$0xff]  ;;  %v487_v13 = vld [vmem:[%s2640_s0 + $0x320] sm:$0xff] }
  0x90   :  { %v602_v18 = vpop.permute.xlu1 %601  ;;  %v596_v19 = vpop.permute.xlu0 %595 }
  0x91   :  { %1613 = vst [vmem:[%s2641_s1 + $0x48] sm:$0xff] %v602_v18  ;;  %1611 = vst [vmem:[%s2641_s1 + $0x40] sm:$0xff] %v596_v19  ;;  %973 = vperm.xlu1 %1861, %v429_v16   ;;  %967 = vperm.xlu0 %4, %v427_v17   ;;  %v493_v16 = vld [vmem:[%s2640_s0 + $0x338] sm:$0xff]  ;;  %v491_v17 = vld [vmem:[%s2640_s0 + $0x330] sm:$0xff] }
  0x94   :  { %v614_v22 = vpop.permute.xlu1 %613  ;;  %v608_v23 = vpop.permute.xlu0 %607 }
  0x95   :  { %1617 = vst [vmem:[%s2641_s1 + $0x58] sm:$0xff] %v614_v22  ;;  %1615 = vst [vmem:[%s2641_s1 + $0x50] sm:$0xff] %v608_v23  ;;  %985 = vperm.xlu1 %1861, %v433_v20   ;;  %979 = vperm.xlu0 %4, %v431_v21   ;;  %v497_v20 = vld [vmem:[%s2640_s0 + $0x348] sm:$0xff]  ;;  %v495_v21 = vld [vmem:[%s2640_s0 + $0x340] sm:$0xff] }
  0x98   :  { %v626_v26 = vpop.permute.xlu1 %625  ;;  %v620_v27 = vpop.permute.xlu0 %619 }
  0x99   :  { %1621 = vst [vmem:[%s2641_s1 + $0x68] sm:$0xff] %v626_v26  ;;  %1619 = vst [vmem:[%s2641_s1 + $0x60] sm:$0xff] %v620_v27  ;;  %997 = vperm.xlu1 %1861, %v437_v24   ;;  %991 = vperm.xlu0 %4, %v435_v25   ;;  %v501_v24 = vld [vmem:[%s2640_s0 + $0x358] sm:$0xff]  ;;  %v499_v25 = vld [vmem:[%s2640_s0 + $0x350] sm:$0xff] }
  0x9c   :  { %v638_v30 = vpop.permute.xlu1 %637  ;;  %v632_v31 = vpop.permute.xlu0 %631 }
  0x9d   :  { %1625 = vst [vmem:[%s2641_s1 + $0x78] sm:$0xff] %v638_v30  ;;  %1623 = vst [vmem:[%s2641_s1 + $0x70] sm:$0xff] %v632_v31  ;;  %1009 = vperm.xlu1 %1861, %v441_v28   ;;  %1003 = vperm.xlu0 %4, %v439_v29   ;;  %v505_v28 = vld [vmem:[%s2640_s0 + $0x368] sm:$0xff]  ;;  %v503_v29 = vld [vmem:[%s2640_s0 + $0x360] sm:$0xff] }
  0xa0   :  { %v650_v34 = vpop.permute.xlu1 %649  ;;  %v644_v35 = vpop.permute.xlu0 %643 }
  0xa1   :  { %1629 = vst [vmem:[%s2641_s1 + $0x88] sm:$0xff] %v650_v34  ;;  %1627 = vst [vmem:[%s2641_s1 + $0x80] sm:$0xff] %v644_v35  ;;  %1021 = vperm.xlu1 %1861, %v445_v32   ;;  %1015 = vperm.xlu0 %4, %v443_v33   ;;  %v509_v32 = vld [vmem:[%s2640_s0 + $0x378] sm:$0xff]  ;;  %v507_v33 = vld [vmem:[%s2640_s0 + $0x370] sm:$0xff] }
  0xa4   :  { %v662_v38 = vpop.permute.xlu1 %661  ;;  %v656_v39 = vpop.permute.xlu0 %655 }
  0xa5   :  { %1633 = vst [vmem:[%s2641_s1 + $0x98] sm:$0xff] %v662_v38  ;;  %1631 = vst [vmem:[%s2641_s1 + $0x90] sm:$0xff] %v656_v39  ;;  %1033 = vperm.xlu1 %1861, %v449_v36   ;;  %1027 = vperm.xlu0 %4, %v447_v37   ;;  %v513_v36 = vld [vmem:[%s2640_s0 + $0x388] sm:$0xff]  ;;  %v511_v37 = vld [vmem:[%s2640_s0 + $0x380] sm:$0xff] }
  0xa8   :  { %v674_v42 = vpop.permute.xlu1 %673  ;;  %v668_v43 = vpop.permute.xlu0 %667 }
  0xa9   :  { %1637 = vst [vmem:[%s2641_s1 + $0xa8] sm:$0xff] %v674_v42  ;;  %1635 = vst [vmem:[%s2641_s1 + $0xa0] sm:$0xff] %v668_v43  ;;  %1045 = vperm.xlu1 %1861, %v453_v40   ;;  %1039 = vperm.xlu0 %4, %v451_v41   ;;  %v517_v40 = vld [vmem:[%s2640_s0 + $0x398] sm:$0xff]  ;;  %v515_v41 = vld [vmem:[%s2640_s0 + $0x390] sm:$0xff] }
  0xac   :  { %v686_v46 = vpop.permute.xlu1 %685  ;;  %v680_v47 = vpop.permute.xlu0 %679 }
  0xad   :  { %1641 = vst [vmem:[%s2641_s1 + $0xb8] sm:$0xff] %v686_v46  ;;  %1639 = vst [vmem:[%s2641_s1 + $0xb0] sm:$0xff] %v680_v47  ;;  %1057 = vperm.xlu1 %1861, %v457_v44   ;;  %1051 = vperm.xlu0 %4, %v455_v45   ;;  %v521_v44 = vld [vmem:[%s2640_s0 + $0x3a8] sm:$0xff]  ;;  %v519_v45 = vld [vmem:[%s2640_s0 + $0x3a0] sm:$0xff] }
  0xb0   :  { %v698_v50 = vpop.permute.xlu1 %697  ;;  %v692_v51 = vpop.permute.xlu0 %691 }
  0xb1   :  { %1645 = vst [vmem:[%s2641_s1 + $0xc8] sm:$0xff] %v698_v50  ;;  %1643 = vst [vmem:[%s2641_s1 + $0xc0] sm:$0xff] %v692_v51  ;;  %1069 = vperm.xlu1 %1861, %v461_v48   ;;  %1063 = vperm.xlu0 %4, %v459_v49   ;;  %v525_v48 = vld [vmem:[%s2640_s0 + $0x3b8] sm:$0xff]  ;;  %v523_v49 = vld [vmem:[%s2640_s0 + $0x3b0] sm:$0xff] }
  0xb4   :  { %v710_v54 = vpop.permute.xlu1 %709  ;;  %v704_v55 = vpop.permute.xlu0 %703 }
  0xb5   :  { %1649 = vst [vmem:[%s2641_s1 + $0xd8] sm:$0xff] %v710_v54  ;;  %1647 = vst [vmem:[%s2641_s1 + $0xd0] sm:$0xff] %v704_v55  ;;  %1081 = vperm.xlu1 %1861, %v465_v52   ;;  %1075 = vperm.xlu0 %4, %v463_v53   ;;  %v529_v52 = vld [vmem:[%s2640_s0 + $0x3c8] sm:$0xff]  ;;  %v527_v53 = vld [vmem:[%s2640_s0 + $0x3c0] sm:$0xff] }
  0xb8   :  { %v722_v58 = vpop.permute.xlu1 %721  ;;  %v716_v59 = vpop.permute.xlu0 %715 }
  0xb9   :  { %1653 = vst [vmem:[%s2641_s1 + $0xe8] sm:$0xff] %v722_v58  ;;  %1651 = vst [vmem:[%s2641_s1 + $0xe0] sm:$0xff] %v716_v59  ;;  %1093 = vperm.xlu1 %1861, %v469_v56   ;;  %1087 = vperm.xlu0 %4, %v467_v57   ;;  %v533_v56 = vld [vmem:[%s2640_s0 + $0x3d8] sm:$0xff]  ;;  %v531_v57 = vld [vmem:[%s2640_s0 + $0x3d0] sm:$0xff] }
  0xbc   :  { %v734_v62 = vpop.permute.xlu1 %733  ;;  %v728_v63 = vpop.permute.xlu0 %727 }
  0xbd   :  { %1657 = vst [vmem:[%s2641_s1 + $0xf8] sm:$0xff] %v734_v62  ;;  %1655 = vst [vmem:[%s2641_s1 + $0xf0] sm:$0xff] %v728_v63  ;;  %1105 = vperm.xlu1 %1861, %v473_v60   ;;  %1099 = vperm.xlu0 %4, %v471_v61   ;;  %v537_v60 = vld [vmem:[%s2640_s0 + $0x3e8] sm:$0xff]  ;;  %v535_v61 = vld [vmem:[%s2640_s0 + $0x3e0] sm:$0xff] }
  0xc0   :  { %v746_v2 = vpop.permute.xlu1 %745  ;;  %v740_v3 = vpop.permute.xlu0 %739 }
  0xc1   :  { %1661 = vst [vmem:[%s2641_s1 + $0x108] sm:$0xff] %v746_v2  ;;  %1659 = vst [vmem:[%s2641_s1 + $0x100] sm:$0xff] %v740_v3  ;;  %1117 = vperm.xlu1 %1861, %v477_v0   ;;  %1111 = vperm.xlu0 %4, %v475_v1   ;;  %v541_v0 = vld [vmem:[%s2640_s0 + $0x3f8] sm:$0xff]  ;;  %v539_v1 = vld [vmem:[%s2640_s0 + $0x3f0] sm:$0xff] }
  0xc4   :  { %v758_v6 = vpop.permute.xlu1 %757  ;;  %v752_v7 = vpop.permute.xlu0 %751 }
  0xc5   :  { %1665 = vst [vmem:[%s2641_s1 + $0x118] sm:$0xff] %v758_v6  ;;  %1663 = vst [vmem:[%s2641_s1 + $0x110] sm:$0xff] %v752_v7  ;;  %1129 = vperm.xlu1 %1861, %v481_v4   ;;  %1123 = vperm.xlu0 %4, %v479_v5  }
  0xc8   :  { %v770_v10 = vpop.permute.xlu1 %769  ;;  %v764_v11 = vpop.permute.xlu0 %763 }
  0xc9   :  { %1669 = vst [vmem:[%s2641_s1 + $0x128] sm:$0xff] %v770_v10  ;;  %1667 = vst [vmem:[%s2641_s1 + $0x120] sm:$0xff] %v764_v11  ;;  %1141 = vperm.xlu1 %1861, %v485_v8   ;;  %1135 = vperm.xlu0 %4, %v483_v9  }
  0xcc   :  { %v782_v14 = vpop.permute.xlu1 %781  ;;  %v776_v15 = vpop.permute.xlu0 %775 }
  0xcd   :  { %1673 = vst [vmem:[%s2641_s1 + $0x138] sm:$0xff] %v782_v14  ;;  %1671 = vst [vmem:[%s2641_s1 + $0x130] sm:$0xff] %v776_v15  ;;  %1153 = vperm.xlu1 %1861, %v489_v12   ;;  %1147 = vperm.xlu0 %4, %v487_v13  }
  0xd0   :  { %v794_v18 = vpop.permute.xlu1 %793  ;;  %v788_v19 = vpop.permute.xlu0 %787 }
  0xd1   :  { %1677 = vst [vmem:[%s2641_s1 + $0x148] sm:$0xff] %v794_v18  ;;  %1675 = vst [vmem:[%s2641_s1 + $0x140] sm:$0xff] %v788_v19  ;;  %1165 = vperm.xlu1 %1861, %v493_v16   ;;  %1159 = vperm.xlu0 %4, %v491_v17  }
  0xd4   :  { %v806_v22 = vpop.permute.xlu1 %805  ;;  %v800_v23 = vpop.permute.xlu0 %799 }
  0xd5   :  { %1681 = vst [vmem:[%s2641_s1 + $0x158] sm:$0xff] %v806_v22  ;;  %1679 = vst [vmem:[%s2641_s1 + $0x150] sm:$0xff] %v800_v23  ;;  %1177 = vperm.xlu1 %1861, %v497_v20   ;;  %1171 = vperm.xlu0 %4, %v495_v21  }
  0xd8   :  { %v818_v26 = vpop.permute.xlu1 %817  ;;  %v812_v27 = vpop.permute.xlu0 %811 }
  0xd9   :  { %1685 = vst [vmem:[%s2641_s1 + $0x168] sm:$0xff] %v818_v26  ;;  %1683 = vst [vmem:[%s2641_s1 + $0x160] sm:$0xff] %v812_v27  ;;  %1189 = vperm.xlu1 %1861, %v501_v24   ;;  %1183 = vperm.xlu0 %4, %v499_v25  }
  0xdc   :  { %v830_v30 = vpop.permute.xlu1 %829  ;;  %v824_v31 = vpop.permute.xlu0 %823 }
  0xdd   :  { %1689 = vst [vmem:[%s2641_s1 + $0x178] sm:$0xff] %v830_v30  ;;  %1687 = vst [vmem:[%s2641_s1 + $0x170] sm:$0xff] %v824_v31  ;;  %1201 = vperm.xlu1 %1861, %v505_v28   ;;  %1195 = vperm.xlu0 %4, %v503_v29  }
  0xe0   :  { %v842_v34 = vpop.permute.xlu1 %841  ;;  %v836_v35 = vpop.permute.xlu0 %835 }
  0xe1   :  { %1693 = vst [vmem:[%s2641_s1 + $0x188] sm:$0xff] %v842_v34  ;;  %1691 = vst [vmem:[%s2641_s1 + $0x180] sm:$0xff] %v836_v35  ;;  %1213 = vperm.xlu1 %1861, %v509_v32   ;;  %1207 = vperm.xlu0 %4, %v507_v33  }
  0xe4   :  { %v854_v38 = vpop.permute.xlu1 %853  ;;  %v848_v39 = vpop.permute.xlu0 %847 }
  0xe5   :  { %1697 = vst [vmem:[%s2641_s1 + $0x198] sm:$0xff] %v854_v38  ;;  %1695 = vst [vmem:[%s2641_s1 + $0x190] sm:$0xff] %v848_v39  ;;  %1225 = vperm.xlu1 %1861, %v513_v36   ;;  %1219 = vperm.xlu0 %4, %v511_v37  }
  0xe8   :  { %v866_v42 = vpop.permute.xlu1 %865  ;;  %v860_v43 = vpop.permute.xlu0 %859 }
  0xe9   :  { %1701 = vst [vmem:[%s2641_s1 + $0x1a8] sm:$0xff] %v866_v42  ;;  %1699 = vst [vmem:[%s2641_s1 + $0x1a0] sm:$0xff] %v860_v43  ;;  %1237 = vperm.xlu1 %1861, %v517_v40   ;;  %1231 = vperm.xlu0 %4, %v515_v41  }
  0xec   :  { %v878_v46 = vpop.permute.xlu1 %877  ;;  %v872_v47 = vpop.permute.xlu0 %871 }
  0xed   :  { %1705 = vst [vmem:[%s2641_s1 + $0x1b8] sm:$0xff] %v878_v46  ;;  %1703 = vst [vmem:[%s2641_s1 + $0x1b0] sm:$0xff] %v872_v47  ;;  %1249 = vperm.xlu1 %1861, %v521_v44   ;;  %1243 = vperm.xlu0 %4, %v519_v45  }
  0xf0   :  { %v890_v50 = vpop.permute.xlu1 %889  ;;  %v884_v51 = vpop.permute.xlu0 %883 }
  0xf1   :  { %1709 = vst [vmem:[%s2641_s1 + $0x1c8] sm:$0xff] %v890_v50  ;;  %1707 = vst [vmem:[%s2641_s1 + $0x1c0] sm:$0xff] %v884_v51  ;;  %1261 = vperm.xlu1 %1861, %v525_v48   ;;  %1255 = vperm.xlu0 %4, %v523_v49  }
  0xf4   :  { %v902_v54 = vpop.permute.xlu1 %901  ;;  %v896_v55 = vpop.permute.xlu0 %895 }
  0xf5   :  { %1713 = vst [vmem:[%s2641_s1 + $0x1d8] sm:$0xff] %v902_v54  ;;  %1711 = vst [vmem:[%s2641_s1 + $0x1d0] sm:$0xff] %v896_v55  ;;  %1273 = vperm.xlu1 %1861, %v529_v52   ;;  %1267 = vperm.xlu0 %4, %v527_v53  }
  0xf8   :  { %v914_v58 = vpop.permute.xlu1 %913  ;;  %v908_v59 = vpop.permute.xlu0 %907 }
  0xf9   :  { %1717 = vst [vmem:[%s2641_s1 + $0x1e8] sm:$0xff] %v914_v58  ;;  %1715 = vst [vmem:[%s2641_s1 + $0x1e0] sm:$0xff] %v908_v59  ;;  %1285 = vperm.xlu1 %1861, %v533_v56   ;;  %1279 = vperm.xlu0 %4, %v531_v57  }
  0xfc   :  { %v926_v62 = vpop.permute.xlu1 %925  ;;  %v920_v63 = vpop.permute.xlu0 %919 }
  0xfd   :  { %1721 = vst [vmem:[%s2641_s1 + $0x1f8] sm:$0xff] %v926_v62  ;;  %1719 = vst [vmem:[%s2641_s1 + $0x1f0] sm:$0xff] %v920_v63  ;;  %1297 = vperm.xlu1 %1861, %v537_v60   ;;  %1291 = vperm.xlu0 %4, %v535_v61  }
 0x100   :  { %v938_v2 = vpop.permute.xlu1 %937  ;;  %v932_v3 = vpop.permute.xlu0 %931 }
 0x101   :  { %1725 = vst [vmem:[%s2641_s1 + $0x208] sm:$0xff] %v938_v2  ;;  %1723 = vst [vmem:[%s2641_s1 + $0x200] sm:$0xff] %v932_v3  ;;  %1309 = vperm.xlu1 %1861, %v541_v0   ;;  %1303 = vperm.xlu0 %4, %v539_v1  }
 0x104   :  { %v950_v4 = vpop.permute.xlu1 %949  ;;  %v944_v5 = vpop.permute.xlu0 %943 }
 0x105   :  { %1729 = vst [vmem:[%s2641_s1 + $0x218] sm:$0xff] %v950_v4  ;;  %1727 = vst [vmem:[%s2641_s1 + $0x210] sm:$0xff] %v944_v5 }
 0x108   :  { %v962_v6 = vpop.permute.xlu1 %961  ;;  %v956_v7 = vpop.permute.xlu0 %955 }
 0x109   :  { %1733 = vst [vmem:[%s2641_s1 + $0x228] sm:$0xff] %v962_v6  ;;  %1731 = vst [vmem:[%s2641_s1 + $0x220] sm:$0xff] %v956_v7 }
 0x10c   :  { %v974_v8 = vpop.permute.xlu1 %973  ;;  %v968_v9 = vpop.permute.xlu0 %967 }
 0x10d   :  { %1737 = vst [vmem:[%s2641_s1 + $0x238] sm:$0xff] %v974_v8  ;;  %1735 = vst [vmem:[%s2641_s1 + $0x230] sm:$0xff] %v968_v9 }
 0x110   :  { %v986_v10 = vpop.permute.xlu1 %985  ;;  %v980_v11 = vpop.permute.xlu0 %979 }
 0x111   :  { %1741 = vst [vmem:[%s2641_s1 + $0x248] sm:$0xff] %v986_v10  ;;  %1739 = vst [vmem:[%s2641_s1 + $0x240] sm:$0xff] %v980_v11 }
 0x114   :  { %v998_v12 = vpop.permute.xlu1 %997  ;;  %v992_v13 = vpop.permute.xlu0 %991 }
 0x115   :  { %1745 = vst [vmem:[%s2641_s1 + $0x258] sm:$0xff] %v998_v12  ;;  %1743 = vst [vmem:[%s2641_s1 + $0x250] sm:$0xff] %v992_v13 }
 0x118   :  { %v1010_v14 = vpop.permute.xlu1 %1009  ;;  %v1004_v15 = vpop.permute.xlu0 %1003 }
 0x119   :  { %1749 = vst [vmem:[%s2641_s1 + $0x268] sm:$0xff] %v1010_v14  ;;  %1747 = vst [vmem:[%s2641_s1 + $0x260] sm:$0xff] %v1004_v15 }
 0x11c   :  { %v1022_v16 = vpop.permute.xlu1 %1021  ;;  %v1016_v17 = vpop.permute.xlu0 %1015 }
 0x11d   :  { %1753 = vst [vmem:[%s2641_s1 + $0x278] sm:$0xff] %v1022_v16  ;;  %1751 = vst [vmem:[%s2641_s1 + $0x270] sm:$0xff] %v1016_v17 }
 0x120   :  { %v1034_v18 = vpop.permute.xlu1 %1033  ;;  %v1028_v19 = vpop.permute.xlu0 %1027 }
 0x121   :  { %1757 = vst [vmem:[%s2641_s1 + $0x288] sm:$0xff] %v1034_v18  ;;  %1755 = vst [vmem:[%s2641_s1 + $0x280] sm:$0xff] %v1028_v19 }
 0x124   :  { %v1046_v20 = vpop.permute.xlu1 %1045  ;;  %v1040_v21 = vpop.permute.xlu0 %1039 }
 0x125   :  { %1761 = vst [vmem:[%s2641_s1 + $0x298] sm:$0xff] %v1046_v20  ;;  %1759 = vst [vmem:[%s2641_s1 + $0x290] sm:$0xff] %v1040_v21 }
 0x128   :  { %v1058_v22 = vpop.permute.xlu1 %1057  ;;  %v1052_v23 = vpop.permute.xlu0 %1051 }
 0x129   :  { %1765 = vst [vmem:[%s2641_s1 + $0x2a8] sm:$0xff] %v1058_v22  ;;  %1763 = vst [vmem:[%s2641_s1 + $0x2a0] sm:$0xff] %v1052_v23 }
 0x12c   :  { %v1070_v24 = vpop.permute.xlu1 %1069  ;;  %v1064_v25 = vpop.permute.xlu0 %1063 }
 0x12d   :  { %1769 = vst [vmem:[%s2641_s1 + $0x2b8] sm:$0xff] %v1070_v24  ;;  %1767 = vst [vmem:[%s2641_s1 + $0x2b0] sm:$0xff] %v1064_v25 }
 0x130   :  { %v1082_v26 = vpop.permute.xlu1 %1081  ;;  %v1076_v27 = vpop.permute.xlu0 %1075 }
 0x131   :  { %1773 = vst [vmem:[%s2641_s1 + $0x2c8] sm:$0xff] %v1082_v26  ;;  %1771 = vst [vmem:[%s2641_s1 + $0x2c0] sm:$0xff] %v1076_v27 }
 0x134   :  { %v1094_v28 = vpop.permute.xlu1 %1093  ;;  %v1088_v29 = vpop.permute.xlu0 %1087 }
 0x135   :  { %1777 = vst [vmem:[%s2641_s1 + $0x2d8] sm:$0xff] %v1094_v28  ;;  %1775 = vst [vmem:[%s2641_s1 + $0x2d0] sm:$0xff] %v1088_v29 }
 0x138   :  { %v1106_v30 = vpop.permute.xlu1 %1105  ;;  %v1100_v31 = vpop.permute.xlu0 %1099 }
 0x139   :  { %1781 = vst [vmem:[%s2641_s1 + $0x2e8] sm:$0xff] %v1106_v30  ;;  %1779 = vst [vmem:[%s2641_s1 + $0x2e0] sm:$0xff] %v1100_v31 }
 0x13c   :  { %v1118_v32 = vpop.permute.xlu1 %1117  ;;  %v1112_v33 = vpop.permute.xlu0 %1111 }
 0x13d   :  { %1785 = vst [vmem:[%s2641_s1 + $0x2f8] sm:$0xff] %v1118_v32  ;;  %1783 = vst [vmem:[%s2641_s1 + $0x2f0] sm:$0xff] %v1112_v33 }
 0x140   :  { %v1130_v34 = vpop.permute.xlu1 %1129  ;;  %v1124_v35 = vpop.permute.xlu0 %1123 }
 0x141   :  { %1789 = vst [vmem:[%s2641_s1 + $0x308] sm:$0xff] %v1130_v34  ;;  %1787 = vst [vmem:[%s2641_s1 + $0x300] sm:$0xff] %v1124_v35 }
 0x144   :  { %v1142_v36 = vpop.permute.xlu1 %1141  ;;  %v1136_v37 = vpop.permute.xlu0 %1135 }
 0x145   :  { %1793 = vst [vmem:[%s2641_s1 + $0x318] sm:$0xff] %v1142_v36  ;;  %1791 = vst [vmem:[%s2641_s1 + $0x310] sm:$0xff] %v1136_v37 }
 0x148   :  { %v1154_v38 = vpop.permute.xlu1 %1153  ;;  %v1148_v39 = vpop.permute.xlu0 %1147 }
 0x149   :  { %1797 = vst [vmem:[%s2641_s1 + $0x328] sm:$0xff] %v1154_v38  ;;  %1795 = vst [vmem:[%s2641_s1 + $0x320] sm:$0xff] %v1148_v39 }
 0x14c   :  { %v1166_v40 = vpop.permute.xlu1 %1165  ;;  %v1160_v41 = vpop.permute.xlu0 %1159 }
 0x14d   :  { %1801 = vst [vmem:[%s2641_s1 + $0x338] sm:$0xff] %v1166_v40  ;;  %1799 = vst [vmem:[%s2641_s1 + $0x330] sm:$0xff] %v1160_v41 }
 0x150   :  { %v1178_v42 = vpop.permute.xlu1 %1177  ;;  %v1172_v43 = vpop.permute.xlu0 %1171 }
 0x151   :  { %1805 = vst [vmem:[%s2641_s1 + $0x348] sm:$0xff] %v1178_v42  ;;  %1803 = vst [vmem:[%s2641_s1 + $0x340] sm:$0xff] %v1172_v43 }
 0x154   :  { %v1190_v44 = vpop.permute.xlu1 %1189  ;;  %v1184_v45 = vpop.permute.xlu0 %1183 }
 0x155   :  { %1809 = vst [vmem:[%s2641_s1 + $0x358] sm:$0xff] %v1190_v44  ;;  %1807 = vst [vmem:[%s2641_s1 + $0x350] sm:$0xff] %v1184_v45 }
 0x158   :  { %v1202_v46 = vpop.permute.xlu1 %1201  ;;  %v1196_v47 = vpop.permute.xlu0 %1195 }
 0x159   :  { %1813 = vst [vmem:[%s2641_s1 + $0x368] sm:$0xff] %v1202_v46  ;;  %1811 = vst [vmem:[%s2641_s1 + $0x360] sm:$0xff] %v1196_v47 }
 0x15c   :  { %v1214_v48 = vpop.permute.xlu1 %1213  ;;  %v1208_v49 = vpop.permute.xlu0 %1207 }
 0x15d   :  { %1817 = vst [vmem:[%s2641_s1 + $0x378] sm:$0xff] %v1214_v48  ;;  %1815 = vst [vmem:[%s2641_s1 + $0x370] sm:$0xff] %v1208_v49 }
 0x160   :  { %v1226_v50 = vpop.permute.xlu1 %1225  ;;  %v1220_v51 = vpop.permute.xlu0 %1219 }
 0x161   :  { %1821 = vst [vmem:[%s2641_s1 + $0x388] sm:$0xff] %v1226_v50  ;;  %1819 = vst [vmem:[%s2641_s1 + $0x380] sm:$0xff] %v1220_v51 }
 0x164   :  { %v1238_v52 = vpop.permute.xlu1 %1237  ;;  %v1232_v53 = vpop.permute.xlu0 %1231 }
 0x165   :  { %1825 = vst [vmem:[%s2641_s1 + $0x398] sm:$0xff] %v1238_v52  ;;  %1823 = vst [vmem:[%s2641_s1 + $0x390] sm:$0xff] %v1232_v53 }
 0x168   :  { %v1250_v54 = vpop.permute.xlu1 %1249  ;;  %v1244_v55 = vpop.permute.xlu0 %1243 }
 0x169   :  { %1829 = vst [vmem:[%s2641_s1 + $0x3a8] sm:$0xff] %v1250_v54  ;;  %1827 = vst [vmem:[%s2641_s1 + $0x3a0] sm:$0xff] %v1244_v55 }
 0x16c   :  { %v1262_v56 = vpop.permute.xlu1 %1261  ;;  %v1256_v57 = vpop.permute.xlu0 %1255 }
 0x16d   :  { %1833 = vst [vmem:[%s2641_s1 + $0x3b8] sm:$0xff] %v1262_v56  ;;  %1831 = vst [vmem:[%s2641_s1 + $0x3b0] sm:$0xff] %v1256_v57 }
 0x170   :  { %v1274_v58 = vpop.permute.xlu1 %1273  ;;  %v1268_v59 = vpop.permute.xlu0 %1267 }
 0x171   :  { %1837 = vst [vmem:[%s2641_s1 + $0x3c8] sm:$0xff] %v1274_v58  ;;  %1835 = vst [vmem:[%s2641_s1 + $0x3c0] sm:$0xff] %v1268_v59 }
 0x174   :  { %v1286_v60 = vpop.permute.xlu1 %1285  ;;  %v1280_v61 = vpop.permute.xlu0 %1279 }
 0x175   :  { %1841 = vst [vmem:[%s2641_s1 + $0x3d8] sm:$0xff] %v1286_v60  ;;  %1839 = vst [vmem:[%s2641_s1 + $0x3d0] sm:$0xff] %v1280_v61 }
 0x178   :  { %v1298_v62 = vpop.permute.xlu1 %1297  ;;  %v1292_v63 = vpop.permute.xlu0 %1291 }
 0x179   :  { %1845 = vst [vmem:[%s2641_s1 + $0x3e8] sm:$0xff] %v1298_v62  ;;  %1843 = vst [vmem:[%s2641_s1 + $0x3e0] sm:$0xff] %v1292_v63 }
 0x17c   :  { %v1310_v0 = vpop.permute.xlu1 %1309  ;;  %v1304_v1 = vpop.permute.xlu0 %1303 }
 0x17d   :  { %1849 = vst [vmem:[%s2641_s1 + $0x3f8] sm:$0xff] %v1310_v0  ;;  %1847 = vst [vmem:[%s2641_s1 + $0x3f0] sm:$0xff] %v1304_v1 }

// kernel: net2d_forward.12
= control target key start
LH: loop header
LB: loop body
LE: loop exit
PB: predicated region body
PF: predicated region fallthrough
CT: control target
= control target key end

     0   :  { %s1019_s24 = smov 0   ;;  %s1021_s25 = smov 0   ;;  %s1103_s0 = inlined_call_operand.vmem [shape: f32[2,8,1024], index: 0, kind: input, shape index: {}]   ;;  %s1104_s1 = inlined_call_operand.vmem [shape: f32[2,8,1024], index: 1, kind: input, shape index: {}]   ;;  %s1105_s2 = inlined_call_operand.vmem [shape: f32[8,8], index: 2, kind: input, shape index: {}]   ;;  %s1106_s3 = inlined_call_operand.vmem [shape: f32[8,1], index: 3, kind: input, shape index: {}]   ;;  %s1107_s4 = inlined_call_operand.vmem [shape: f32[8,1], index: 4, kind: input, shape index: {}]   ;;  %s1108_s5 = inlined_call_operand.vmem [shape: f32[8,1], index: 5, kind: input, shape index: {}]   ;;  %s1109_s6 = inlined_call_operand.vmem [shape: f32[2,8,1024], index: 6, kind: output, shape index: {0}]   ;;  %s1110_s7 = inlined_call_operand.vmem [shape: f32[2,1,8,2], index: 7, kind: output, shape index: {1}]  }
   0x1   :  { %s1023_s26 = smov 0  }
   0x2 LB: > { %s30_s27 = sadd.s32 1, %s971_s25  ;;  %p908_p0 = scmp.ge.s32.totalorder %s975_s26, 1  ;;  %s975_s26 = sphi %s1023_s26, %s18_s26   ;;  %s971_s25 = sphi %s1021_s25, %s1112_s25   ;;  %s967_s24 = sphi %s1019_s24, %s1111_s24  }
   0x3   : > { %p32_p1 = scmp.ge.s32.totalorder %s30_s27, 2  ;;  %p280_p2 = scmp.lt.s32.totalorder %s975_s26, 3 }
   0x5   : > { %s1114_s27 = smov (%p32_p1, %s30_s27), 0  ;;  %p281_p3 = pnand %p908_p0, %p280_p2 }
   0x6   : > { %p337_p4 = scmp.lt.s32.totalorder (!%p281_p3), %s967_s24, 1 }
   0x7   : > { %284 = sbr.rel (%p281_p3) target bundleno = 501 (0x1f5), region = 44 }
   0xc   : > { %v381_v0 = vld [vmem:[%s1107_s4] sm:$0xff]  ;;  %v977_v1 = vmov 0   ;;  %v978_v3 = vmov 0.0   ;;  %s1116_s24 = smov (!%p337_p4, %s967_s24), 1  ;;  %vm416_vm0 = vcmask 64512   ;;  %vm754_vm1 = vcmask 7168  }
   0xd   : > { %951 = vset.pattern.permute.xlu0 %v977_v1  ;;  %952 = vset.pattern.permute.xlu1 %v977_v1  ;;  %v395_v2 = vld [vmem:[%s1108_s5] sm:$0xff]  ;;  %s1049_s11 = sshll.u32 %s1116_s24, 6  ;;  %s915_s23 = sshll.u32 %s1116_s24, 3  ;;  %vm756_vm2 = vcmask 15360  }
   0xe   : > { %384 = vperm.xlu0 %951, %v381_v0   ;;  %484 = vmatprep.mubr.f32.mxu0 %v978_v3  ;;  %v410_v4 = vld [vmem:[%s1106_s3] sm:$0xff]  ;;  %s344_s14 = scalar_lea.vmem %s1103_s0, %s1049_s11  ;;  %s1066_s19 = scalar_lea.vmem %s1104_s1, %s1049_s11 }
   0xf   : > { %555 = vmatprep.mubr.f32.mxu1 %v978_v3  ;;  %413 = vperm.xlu1 %952, %v410_v4   ;;  %v374_v5 = vld [vmem:[%s344_s14 + $0x8] sm:$0xff]  ;;  %v376_v7 = vld [vmem:[%s344_s14 + $0x18] sm:$0xff]  ;;  %v373_v8 = vld [vmem:[%s344_s14] sm:$0xff]  ;;  %s1074_s22 = scalar_lea.vmem %s1109_s6, %s1049_s11  ;;  %s372_s30 = scalar_lea.vmem %s1110_s7, %s915_s23 }
  0x10   : > { %v375_v9 = vld [vmem:[%s344_s14 + $0x10] sm:$0xff]  ;;  %v378_v14 = vld [vmem:[%s344_s14 + $0x28] sm:$0xff]  ;;  %v380_v15 = vld [vmem:[%s344_s14 + $0x38] sm:$0xff] }
  0x11   : > { %v377_v17 = vld [vmem:[%s344_s14 + $0x20] sm:$0xff]  ;;  %v379_v18 = vld [vmem:[%s344_s14 + $0x30] sm:$0xff]  ;;  %v705_v40 = vld [vmem:[%s1066_s19 + $0x8] sm:$0xff] }
  0x12   : > { %398 = vperm.xlu0 %951, %v395_v2   ;;  %v409_v23 = vld [vmem:[%s1105_s2] sm:$0xff]  ;;  %v706_v36 = vld [vmem:[%s1066_s19 + $0x10] sm:$0xff]  ;;  %v707_v42 = vld [vmem:[%s1066_s19 + $0x18] sm:$0xff] }
  0x13   : > { %v704_v34 = vld [vmem:[%s1066_s19] sm:$0xff]  ;;  %v710_v52 = vld [vmem:[%s1066_s19 + $0x30] sm:$0xff]  ;;  %v709_v56 = vld [vmem:[%s1066_s19 + $0x28] sm:$0xff] }
  0x14   : > { %v708_v51 = vld [vmem:[%s1066_s19 + $0x20] sm:$0xff]  ;;  %v711_v62 = vld [vmem:[%s1066_s19 + $0x38] sm:$0xff] }
  0x89   : > { %v385_v6 = vpop.permute.xlu0 %384 }
  0x8a   : > { %v388_v10 = vmul.f32 %v385_v6, %v374_v5  ;;  %v390_v11 = vmul.f32 %v385_v6, %v376_v7  ;;  %v387_v12 = vmul.f32 %v385_v6, %v373_v8  ;;  %v389_v13 = vmul.f32 %v385_v6, %v375_v9  ;;  %v414_v32 = vpop.permute.xlu1 %413 }
  0x8b   : > { %v392_v24 = vmul.f32 %v385_v6, %v378_v14  ;;  %v394_v25 = vmul.f32 %v385_v6, %v380_v15  ;;  %v391_v26 = vmul.f32 %v385_v6, %v377_v17  ;;  %v393_v27 = vmul.f32 %v385_v6, %v379_v18 }
  0x8d   : > { %v399_v16 = vpop.permute.xlu0 %398 }
  0x8e   : > { %v402_v19 = vadd.f32 %v399_v16, %v388_v10  ;;  %v404_v20 = vadd.f32 %v399_v16, %v390_v11  ;;  %v401_v21 = vadd.f32 %v399_v16, %v387_v12  ;;  %v403_v22 = vadd.f32 %v399_v16, %v389_v13 }
  0x8f   : > { %v406_v28 = vadd.f32 %v399_v16, %v392_v24  ;;  %v408_v29 = vadd.f32 %v399_v16, %v394_v25  ;;  %v405_v30 = vadd.f32 %v399_v16, %v391_v26  ;;  %v407_v31 = vadd.f32 %v399_v16, %v393_v27 }
  0x90   : > { %450 = vmatprep.subr.mxu0 %v402_v19  ;;  %521 = vmatprep.subr.mxu1 %v404_v20 }
  0x91   : > { %451 = vmatpush1.msra.mxu0 %v401_v21  ;;  %522 = vmatpush1.msra.mxu1 %v403_v22 }
  0x92   : > { %916 = vmatmul.mubr.msk.f32.vlgmr.msra.gmra.mxu0 %vm416_vm0, %v409_v23  ;;  %917 = vmatmul.mubr.msk.f32.vlgmr.msra.gmra.mxu1 %vm416_vm0, %v409_v23 }
  0x93   : > { %592 = vmatprep.subr.mxu0 %v406_v28  ;;  %663 = vmatprep.subr.mxu1 %v408_v29 }
  0x94   : > { %593 = vmatpush1.msra.mxu0 %v405_v30  ;;  %664 = vmatpush1.msra.mxu1 %v407_v31 }
  0x95   : > { %626 = vmatprep.mubr.f32.mxu0 %v978_v3  ;;  %697 = vmatprep.mubr.f32.mxu1 %v978_v3 }
  0x96   : > { %918 = vmatmul.mubr.msk.f32.vlgmr.msra.gmra.mxu0 %vm416_vm0, %v409_v23  ;;  %919 = vmatmul.mubr.msk.f32.vlgmr.msra.gmra.mxu1 %vm416_vm0, %v409_v23 }
 0x152   : > { %v486_v33 = vpop.f32.mrf.mxu0  ;;  %v557_v35 = vpop.f32.mrf.mxu1 }
 0x153   : > { %v487_v37 = vadd.f32 %v486_v33, %v414_v32  ;;  %v558_v38 = vadd.f32 %v557_v35, %v414_v32 }
 0x154   : > { %v488_v39 = vpop.f32.mrf.mxu0  ;;  %v559_v41 = vpop.f32.mrf.mxu1 }
 0x155   : > { %v712_v43 = vadd.f32 %v704_v34, %v487_v37  ;;  %v714_v44 = vadd.f32 %v706_v36, %v558_v38  ;;  %v489_v45 = vadd.f32 %v488_v39, %v414_v32  ;;  %v560_v46 = vadd.f32 %v559_v41, %v414_v32 }
 0x156   : > { %v628_v47 = vpop.f32.mrf.mxu0  ;;  %v699_v48 = vpop.f32.mrf.mxu1 }
 0x157   : > { %720 = vst [vmem:[%s1074_s22] sm:$0xff] %v712_v43  ;;  %722 = vst [vmem:[%s1074_s22 + $0x10] sm:$0xff] %v714_v44  ;;  %v713_v49 = vadd.f32 %v705_v40, %v489_v45  ;;  %v715_v50 = vadd.f32 %v707_v42, %v560_v46  ;;  %v629_v53 = vadd.f32 %v628_v47, %v414_v32 }
 0x158   : > { %v700_v54 = vadd.f32 %v699_v48, %v414_v32  ;;  %v630_v55 = vpop.f32.mrf.mxu0  ;;  %v701_v57 = vpop.f32.mrf.mxu1  ;;  %v737_v58 = vmul.f32 %v712_v43, %v712_v43  ;;  %v739_v2 = vmul.f32 %v714_v44, %v714_v44 }
 0x159   : > { %721 = vst [vmem:[%s1074_s22 + $0x8] sm:$0xff] %v713_v49  ;;  %v728_v59 = vadd.f32 %v713_v49, %v712_v43  ;;  %v738_v60 = vmul.f32 %v713_v49, %v713_v49  ;;  %723 = vst [vmem:[%s1074_s22 + $0x18] sm:$0xff] %v715_v50  ;;  %v631_v61 = vadd.f32 %v630_v55, %v414_v32 }
 0x15a   : > { %v716_v63 = vadd.f32 %v708_v51, %v629_v53  ;;  %v718_v0 = vadd.f32 %v710_v52, %v700_v54  ;;  %v702_v1 = vadd.f32 %v701_v57, %v414_v32  ;;  %v740_v8 = vmul.f32 %v715_v50, %v715_v50 }
 0x15b   : > { %v745_v3 = vadd.f32 %v738_v60, %v737_v58  ;;  %v729_v4 = vadd.f32 %v728_v59, %v714_v44  ;;  %v717_v5 = vadd.f32 %v709_v56, %v631_v61 }
 0x15c   : > { %724 = vst [vmem:[%s1074_s22 + $0x20] sm:$0xff] %v716_v63  ;;  %726 = vst [vmem:[%s1074_s22 + $0x30] sm:$0xff] %v718_v0  ;;  %v719_v6 = vadd.f32 %v711_v62, %v702_v1  ;;  %v741_v12 = vmul.f32 %v716_v63, %v716_v63  ;;  %v743_v17 = vmul.f32 %v718_v0, %v718_v0 }
 0x15d   : > { %v730_v7 = vadd.f32 %v729_v4, %v715_v50  ;;  %v746_v9 = vadd.f32 %v745_v3, %v739_v2  ;;  %725 = vst [vmem:[%s1074_s22 + $0x28] sm:$0xff] %v717_v5  ;;  %v742_v13 = vmul.f32 %v717_v5, %v717_v5 }
 0x15e   : > { %727 = vst [vmem:[%s1074_s22 + $0x38] sm:$0xff] %v719_v6  ;;  %v744_v20 = vmul.f32 %v719_v6, %v719_v6 }
 0x15f   : > { %v747_v10 = vadd.f32 %v746_v9, %v740_v8  ;;  %v731_v11 = vadd.f32 %v730_v7, %v716_v63 }
 0x161   : > { %v732_v14 = vadd.f32 %v731_v11, %v717_v5  ;;  %v748_v15 = vadd.f32 %v747_v10, %v741_v12 }
 0x163   : > { %v733_v16 = vadd.f32 %v732_v14, %v718_v0  ;;  %v749_v18 = vadd.f32 %v748_v15, %v742_v13 }
 0x165   : > { %v734_v19 = vadd.f32 %v733_v16, %v719_v6  ;;  %v750_v21 = vadd.f32 %v749_v18, %v743_v17 }
 0x167   : > { %735 = vadd.xlane.f32.xlu1 %v734_v19  ;;  %v751_v22 = vadd.f32 %v750_v21, %v744_v20 }
 0x169   : > { %752 = vadd.xlane.f32.xlu0 %v751_v22 }
 0x1f0   : > { %v736_v23 = vpop.xlane.xlu1 %735 }
 0x1f2   : > { %v753_v24 = vpop.xlane.xlu0 %752 }
 0x1f3   : > { %v755_v25 = vsel %vm754_vm1, %v736_v23, %v753_v24 }
 0x1f4   : > { %757 = vst.msk [vmem:[%s372_s30] sm:$0xff] %vm756_vm2, %v755_v25 }
 0x1f5 PF: > { %s18_s26 = sadd.s32 1, %s975_s26   ;;  %s1111_s24 = smov %s971_s25 }
 0x1f6   : > { %p15_p5 = scmp.ge.s32.totalorder %s18_s26, 4   ;;  %s1112_s25 = smov %s1114_s27 }
 0x1f8   :  { %17 = sbr.rel (!%p15_p5) target bundleno = 2 (0x2), region = 89 }

// kernel: net2d_forward.14
= control target key start
LH: loop header
LB: loop body
LE: loop exit
PB: predicated region body
PF: predicated region fallthrough
CT: control target
= control target key end

     0   :  { %s1027_s24 = smov 0   ;;  %s1029_s25 = smov 0   ;;  %s1111_s0 = inlined_call_operand.vmem [shape: f32[2,8,1024], index: 0, kind: input, shape index: {}]   ;;  %s1112_s1 = inlined_call_operand.vmem [shape: f32[2,8,1024], index: 1, kind: input, shape index: {}]   ;;  %s1113_s2 = inlined_call_operand.vmem [shape: f32[8,8], index: 2, kind: input, shape index: {}]   ;;  %s1114_s3 = inlined_call_operand.vmem [shape: f32[8,1], index: 3, kind: input, shape index: {}]   ;;  %s1115_s4 = inlined_call_operand.vmem [shape: f32[8,1], index: 4, kind: input, shape index: {}]   ;;  %s1116_s5 = inlined_call_operand.vmem [shape: f32[8,1], index: 5, kind: input, shape index: {}]   ;;  %s1117_s6 = inlined_call_operand.vmem [shape: f32[2,8,1024], index: 6, kind: output, shape index: {0}]   ;;  %s1118_s7 = inlined_call_operand.vmem [shape: f32[2,1,8,2], index: 7, kind: output, shape index: {1}]  }
   0x1   :  { %s1031_s26 = smov 0  }
   0x2 LB: > { %s30_s27 = sadd.s32 1, %s979_s25  ;;  %p916_p0 = scmp.ge.s32.totalorder %s983_s26, 1  ;;  %s983_s26 = sphi %s1031_s26, %s18_s26   ;;  %s979_s25 = sphi %s1029_s25, %s1120_s25   ;;  %s975_s24 = sphi %s1027_s24, %s1119_s24  }
   0x3   : > { %p32_p1 = scmp.ge.s32.totalorder %s30_s27, 2  ;;  %p280_p2 = scmp.lt.s32.totalorder %s983_s26, 3 }
   0x5   : > { %s1122_s27 = smov (%p32_p1, %s30_s27), 0  ;;  %p281_p3 = pnand %p916_p0, %p280_p2 }
   0x6   : > { %p337_p4 = scmp.lt.s32.totalorder (!%p281_p3), %s975_s24, 1 }
   0x7   : > { %284 = sbr.rel (%p281_p3) target bundleno = 503 (0x1f7), region = 44 }
   0xc   : > { %v381_v0 = vld [vmem:[%s1115_s4] sm:$0xff]  ;;  %v985_v1 = vmov 0   ;;  %v986_v3 = vmov 0.0   ;;  %s1124_s24 = smov (!%p337_p4, %s975_s24), 1  ;;  %vm424_vm0 = vcmask 64512   ;;  %vm762_vm1 = vcmask 7168  }
   0xd   : > { %959 = vset.pattern.permute.xlu0 %v985_v1  ;;  %960 = vset.pattern.permute.xlu1 %v985_v1  ;;  %v395_v2 = vld [vmem:[%s1116_s5] sm:$0xff]  ;;  %s1057_s11 = sshll.u32 %s1124_s24, 6  ;;  %s923_s23 = sshll.u32 %s1124_s24, 3  ;;  %vm764_vm2 = vcmask 15360  }
   0xe   : > { %384 = vperm.xlu0 %959, %v381_v0   ;;  %492 = vmatprep.mubr.f32.mxu0 %v986_v3  ;;  %v418_v4 = vld [vmem:[%s1114_s3] sm:$0xff]  ;;  %s344_s14 = scalar_lea.vmem %s1111_s0, %s1057_s11  ;;  %s1074_s19 = scalar_lea.vmem %s1112_s1, %s1057_s11 }
   0xf   : > { %563 = vmatprep.mubr.f32.mxu1 %v986_v3  ;;  %421 = vperm.xlu1 %960, %v418_v4   ;;  %v374_v5 = vld [vmem:[%s344_s14 + $0x8] sm:$0xff]  ;;  %v376_v6 = vld [vmem:[%s344_s14 + $0x18] sm:$0xff]  ;;  %v373_v8 = vld [vmem:[%s344_s14] sm:$0xff]  ;;  %s1082_s22 = scalar_lea.vmem %s1117_s6, %s1057_s11  ;;  %s372_s30 = scalar_lea.vmem %s1118_s7, %s923_s23 }
  0x10   : > { %v375_v9 = vld [vmem:[%s344_s14 + $0x10] sm:$0xff]  ;;  %v378_v10 = vld [vmem:[%s344_s14 + $0x28] sm:$0xff]  ;;  %v380_v11 = vld [vmem:[%s344_s14 + $0x38] sm:$0xff] }
  0x11   : > { %v377_v12 = vld [vmem:[%s344_s14 + $0x20] sm:$0xff]  ;;  %v379_v13 = vld [vmem:[%s344_s14 + $0x30] sm:$0xff]  ;;  %v713_v48 = vld [vmem:[%s1074_s19 + $0x8] sm:$0xff] }
  0x12   : > { %398 = vperm.xlu0 %959, %v395_v2   ;;  %v417_v35 = vld [vmem:[%s1113_s2] sm:$0xff]  ;;  %v714_v44 = vld [vmem:[%s1074_s19 + $0x10] sm:$0xff]  ;;  %v715_v50 = vld [vmem:[%s1074_s19 + $0x18] sm:$0xff] }
  0x13   : > { %v712_v42 = vld [vmem:[%s1074_s19] sm:$0xff]  ;;  %v718_v60 = vld [vmem:[%s1074_s19 + $0x30] sm:$0xff]  ;;  %v717_v0 = vld [vmem:[%s1074_s19 + $0x28] sm:$0xff] }
  0x14   : > { %v716_v59 = vld [vmem:[%s1074_s19 + $0x20] sm:$0xff] }
  0x89   : > { %v385_v7 = vpop.permute.xlu0 %384 }
  0x8a   : > { %v388_v14 = vmul.f32 %v385_v7, %v374_v5  ;;  %v390_v15 = vmul.f32 %v385_v7, %v376_v6  ;;  %v387_v16 = vmul.f32 %v385_v7, %v373_v8  ;;  %v389_v17 = vmul.f32 %v385_v7, %v375_v9  ;;  %v422_v40 = vpop.permute.xlu1 %421  ;;  %v719_v6 = vld [vmem:[%s1074_s19 + $0x38] sm:$0xff] }
  0x8b   : > { %v392_v19 = vmul.f32 %v385_v7, %v378_v10  ;;  %v394_v20 = vmul.f32 %v385_v7, %v380_v11  ;;  %v391_v21 = vmul.f32 %v385_v7, %v377_v12  ;;  %v393_v22 = vmul.f32 %v385_v7, %v379_v13 }
  0x8d   : > { %v399_v18 = vpop.permute.xlu0 %398 }
  0x8e   : > { %v402_v23 = vadd.f32 %v399_v18, %v388_v14  ;;  %v404_v24 = vadd.f32 %v399_v18, %v390_v15  ;;  %v401_v25 = vadd.f32 %v399_v18, %v387_v16  ;;  %v403_v26 = vadd.f32 %v399_v18, %v389_v17 }
  0x8f   : > { %v406_v27 = vadd.f32 %v399_v18, %v392_v19  ;;  %v408_v28 = vadd.f32 %v399_v18, %v394_v20  ;;  %v405_v29 = vadd.f32 %v399_v18, %v391_v21  ;;  %v407_v30 = vadd.f32 %v399_v18, %v393_v22 }
  0x90   : > { %v410_v31 = vmax.f32 %v402_v23, 0.0  ;;  %v412_v32 = vmax.f32 %v404_v24, 0.0  ;;  %v409_v33 = vmax.f32 %v401_v25, 0.0  ;;  %v411_v34 = vmax.f32 %v403_v26, 0.0 }
  0x91   : > { %v414_v36 = vmax.f32 %v406_v27, 0.0  ;;  %v416_v37 = vmax.f32 %v408_v28, 0.0  ;;  %v413_v38 = vmax.f32 %v405_v29, 0.0  ;;  %v415_v39 = vmax.f32 %v407_v30, 0.0 }
  0x92   : > { %458 = vmatprep.subr.mxu0 %v410_v31  ;;  %529 = vmatprep.subr.mxu1 %v412_v32 }
  0x93   : > { %459 = vmatpush1.msra.mxu0 %v409_v33  ;;  %530 = vmatpush1.msra.mxu1 %v411_v34 }
  0x94   : > { %924 = vmatmul.mubr.msk.f32.vlgmr.msra.gmra.mxu0 %vm424_vm0, %v417_v35  ;;  %925 = vmatmul.mubr.msk.f32.vlgmr.msra.gmra.mxu1 %vm424_vm0, %v417_v35 }
  0x95   : > { %600 = vmatprep.subr.mxu0 %v414_v36  ;;  %671 = vmatprep.subr.mxu1 %v416_v37 }
  0x96   : > { %601 = vmatpush1.msra.mxu0 %v413_v38  ;;  %672 = vmatpush1.msra.mxu1 %v415_v39 }
  0x97   : > { %634 = vmatprep.mubr.f32.mxu0 %v986_v3  ;;  %705 = vmatprep.mubr.f32.mxu1 %v986_v3 }
  0x98   : > { %926 = vmatmul.mubr.msk.f32.vlgmr.msra.gmra.mxu0 %vm424_vm0, %v417_v35  ;;  %927 = vmatmul.mubr.msk.f32.vlgmr.msra.gmra.mxu1 %vm424_vm0, %v417_v35 }
 0x154   : > { %v494_v41 = vpop.f32.mrf.mxu0  ;;  %v565_v43 = vpop.f32.mrf.mxu1 }
 0x155   : > { %v495_v45 = vadd.f32 %v494_v41, %v422_v40  ;;  %v566_v46 = vadd.f32 %v565_v43, %v422_v40 }
 0x156   : > { %v496_v47 = vpop.f32.mrf.mxu0  ;;  %v567_v49 = vpop.f32.mrf.mxu1 }
 0x157   : > { %v720_v51 = vadd.f32 %v712_v42, %v495_v45  ;;  %v722_v52 = vadd.f32 %v714_v44, %v566_v46  ;;  %v497_v53 = vadd.f32 %v496_v47, %v422_v40  ;;  %v568_v54 = vadd.f32 %v567_v49, %v422_v40 }
 0x158   : > { %v636_v55 = vpop.f32.mrf.mxu0  ;;  %v707_v56 = vpop.f32.mrf.mxu1 }
 0x159   : > { %728 = vst [vmem:[%s1082_s22] sm:$0xff] %v720_v51  ;;  %730 = vst [vmem:[%s1082_s22 + $0x10] sm:$0xff] %v722_v52  ;;  %v721_v57 = vadd.f32 %v713_v48, %v497_v53  ;;  %v723_v58 = vadd.f32 %v715_v50, %v568_v54  ;;  %v637_v61 = vadd.f32 %v636_v55, %v422_v40 }
 0x15a   : > { %v708_v62 = vadd.f32 %v707_v56, %v422_v40  ;;  %v638_v63 = vpop.f32.mrf.mxu0  ;;  %v709_v1 = vpop.f32.mrf.mxu1  ;;  %v745_v2 = vmul.f32 %v720_v51, %v720_v51  ;;  %v747_v10 = vmul.f32 %v722_v52, %v722_v52 }
 0x15b   : > { %729 = vst [vmem:[%s1082_s22 + $0x8] sm:$0xff] %v721_v57  ;;  %v736_v3 = vadd.f32 %v721_v57, %v720_v51  ;;  %v746_v4 = vmul.f32 %v721_v57, %v721_v57  ;;  %731 = vst [vmem:[%s1082_s22 + $0x18] sm:$0xff] %v723_v58  ;;  %v639_v5 = vadd.f32 %v638_v63, %v422_v40 }
 0x15c   : > { %v724_v7 = vadd.f32 %v716_v59, %v637_v61  ;;  %v726_v8 = vadd.f32 %v718_v60, %v708_v62  ;;  %v710_v9 = vadd.f32 %v709_v1, %v422_v40  ;;  %v748_v16 = vmul.f32 %v723_v58, %v723_v58 }
 0x15d   : > { %v753_v11 = vadd.f32 %v746_v4, %v745_v2  ;;  %v737_v12 = vadd.f32 %v736_v3, %v722_v52  ;;  %v725_v13 = vadd.f32 %v717_v0, %v639_v5 }
 0x15e   : > { %732 = vst [vmem:[%s1082_s22 + $0x20] sm:$0xff] %v724_v7  ;;  %734 = vst [vmem:[%s1082_s22 + $0x30] sm:$0xff] %v726_v8  ;;  %v727_v14 = vadd.f32 %v719_v6, %v710_v9  ;;  %v749_v20 = vmul.f32 %v724_v7, %v724_v7  ;;  %v751_v25 = vmul.f32 %v726_v8, %v726_v8 }
 0x15f   : > { %v738_v15 = vadd.f32 %v737_v12, %v723_v58  ;;  %v754_v17 = vadd.f32 %v753_v11, %v747_v10  ;;  %733 = vst [vmem:[%s1082_s22 + $0x28] sm:$0xff] %v725_v13  ;;  %v750_v21 = vmul.f32 %v725_v13, %v725_v13 }
 0x160   : > { %735 = vst [vmem:[%s1082_s22 + $0x38] sm:$0xff] %v727_v14  ;;  %v752_v28 = vmul.f32 %v727_v14, %v727_v14 }
 0x161   : > { %v755_v18 = vadd.f32 %v754_v17, %v748_v16  ;;  %v739_v19 = vadd.f32 %v738_v15, %v724_v7 }
 0x163   : > { %v740_v22 = vadd.f32 %v739_v19, %v725_v13  ;;  %v756_v23 = vadd.f32 %v755_v18, %v749_v20 }
 0x165   : > { %v741_v24 = vadd.f32 %v740_v22, %v726_v8  ;;  %v757_v26 = vadd.f32 %v756_v23, %v750_v21 }
 0x167   : > { %v742_v27 = vadd.f32 %v741_v24, %v727_v14  ;;  %v758_v29 = vadd.f32 %v757_v26, %v751_v25 }
 0x169   : > { %743 = vadd.xlane.f32.xlu1 %v742_v27  ;;  %v759_v30 = vadd.f32 %v758_v29, %v752_v28 }
 0x16b   : > { %760 = vadd.xlane.f32.xlu0 %v759_v30 }
 0x1f2   : > { %v744_v31 = vpop.xlane.xlu1 %743 }
 0x1f4   : > { %v761_v32 = vpop.xlane.xlu0 %760 }
 0x1f5   : > { %v763_v33 = vsel %vm762_vm1, %v744_v31, %v761_v32 }
 0x1f6   : > { %765 = vst.msk [vmem:[%s372_s30] sm:$0xff] %vm764_vm2, %v763_v33 }
 0x1f7 PF: > { %s18_s26 = sadd.s32 1, %s983_s26   ;;  %s1119_s24 = smov %s979_s25 }
 0x1f8   : > { %p15_p5 = scmp.ge.s32.totalorder %s18_s26, 4   ;;  %s1120_s25 = smov %s1122_s27 }
 0x1fa   :  { %17 = sbr.rel (!%p15_p5) target bundleno = 2 (0x2), region = 89 }

// kernel: net2d_forward.19
= control target key start
LH: loop header
LB: loop body
LE: loop exit
PB: predicated region body
PF: predicated region fallthrough
CT: control target
= control target key end

     0   :  { %s1804_s20 = smov 0   ;;  %s1806_s21 = smov 0   ;;  %s2598_s0 = inlined_call_operand.vmem [shape: f32[2,8,1024], index: 0, kind: input, shape index: {}]   ;;  %s2599_s1 = inlined_call_operand.vmem [shape: f32[128,8], index: 1, kind: input, shape index: {}]   ;;  %s2600_s2 = inlined_call_operand.vmem [shape: f32[128,1], index: 2, kind: input, shape index: {}]   ;;  %s2601_s3 = inlined_call_operand.vmem [shape: f32[1,128], index: 3, kind: input, shape index: {}]   ;;  %s2602_s4 = inlined_call_operand.<no memory space> [shape: f32[1,1], index: 4, kind: input, shape index: {}]   ;;  %s2603_s5 = inlined_call_operand.vmem [shape: f32[2,1,1024], index: 5, kind: output, shape index: {}]  }
   0x1   :  { %v10_v0 = vstv %s2602_s4  ;;  %s1808_s22 = smov 0  }
   0x2   :  { %11 = vst [vmem:[#allocation2] sm:$0x1] %v10_v0 }
   0x3 LB: > { %s29_s4 = sadd.s32 1, %s1762_s21  ;;  %p1644_p0 = scmp.ge.s32.totalorder %s1766_s22, 1  ;;  %s1766_s22 = sphi %s1808_s22, %s17_s22   ;;  %s1762_s21 = sphi %s1806_s21, %s2724_s21   ;;  %s1758_s20 = sphi %s1804_s20, %s2723_s20  }
   0x4   : > { %p31_p1 = scmp.ge.s32.totalorder %s29_s4, 2  ;;  %p210_p2 = scmp.lt.s32.totalorder %s1766_s22, 3 }
   0x6   : > { %s2726_s4 = smov (%p31_p1, %s29_s4), 0  ;;  %p211_p3 = pnand %p1644_p0, %p210_p2 }
   0x8   : > { %214 = sbr.rel (%p211_p3) target bundleno = 584 (0x248), region = 40 }
   0xd   : > { %p246_p4 = scmp.lt.s32.totalorder %s1758_s20, 1  ;;  %v2604_v1 = vmov 0.0   ;;  %v1769_v2 = vmov 0   ;;  %v301_v3 = vld [vmem:[%s2600_s2 + $0x68] sm:$0xff]  ;;  %v303_v4 = vld [vmem:[%s2600_s2 + $0x78] sm:$0xff]  ;;  %v1839_v5 = vld [vmem:[%s2599_s1] sm:$0xff] }
   0xe   : > { %497 = vmatprep.mubr.f32.mxu0 %v2604_v1  ;;  %658 = vmatprep.mubr.f32.mxu1 %v2604_v1  ;;  %vm384_vm0 = vcmask 64512   ;;  %v1848_v14 = vld [vmem:[%s2599_s1 + $0x8] sm:$0xff]  ;;  %v300_v15 = vld [vmem:[%s2600_s2 + $0x60] sm:$0xff]  ;;  %v302_v16 = vld [vmem:[%s2600_s2 + $0x70] sm:$0xff] }
   0xf   : > { %s2728_s20 = smov (!%p246_p4, %s1758_s20), 1  ;;  %1743 = vset.pattern.permute.xlu1 %v1769_v2  ;;  %1742 = vset.pattern.permute.xlu0 %v1769_v2  ;;  %v1867_v17 = vld [vmem:[%s2599_s1 + $0x10] sm:$0xff]  ;;  %v299_v19 = vld [vmem:[%s2600_s2 + $0x58] sm:$0xff]  ;;  %v296_v21 = vld [vmem:[%s2600_s2 + $0x40] sm:$0xff] }
  0x10   : > { %s1714_s25 = sshll.u32 %s2728_s20, 6  ;;  %371 = vperm.xlu1 %1743, %v301_v3   ;;  %381 = vperm.xlu0 %1742, %v303_v4   ;;  %v298_v18 = vld [vmem:[%s2600_s2 + $0x50] sm:$0xff]  ;;  %v1884_v20 = vld [vmem:[%s2599_s1 + $0x18] sm:$0xff]  ;;  %v297_v22 = vld [vmem:[%s2600_s2 + $0x48] sm:$0xff]  ;;  %s1647_s27 = sshll.u32 %s2728_s20, 3 }
  0x11   : > { %s253_s30 = scalar_lea.vmem %s2598_s0, %s1714_s25  ;;  %v1901_v23 = vld [vmem:[%s2599_s1 + $0x20] sm:$0xff]  ;;  %v294_v24 = vld [vmem:[%s2600_s2 + $0x30] sm:$0xff]  ;;  %v295_v25 = vld [vmem:[%s2600_s2 + $0x38] sm:$0xff] }
  0x12   : > { %v281_v6 = vld [vmem:[%s253_s30 + $0x8] sm:$0xff]  ;;  %v283_v7 = vld [vmem:[%s253_s30 + $0x18] sm:$0xff]  ;;  %v280_v8 = vld [vmem:[%s253_s30] sm:$0xff] }
  0x13   : > { %463 = vmatprep.subr.mxu0 %v281_v6  ;;  %624 = vmatprep.subr.mxu1 %v283_v7  ;;  %v282_v9 = vld [vmem:[%s253_s30 + $0x10] sm:$0xff]  ;;  %v285_v10 = vld [vmem:[%s253_s30 + $0x28] sm:$0xff]  ;;  %v287_v11 = vld [vmem:[%s253_s30 + $0x38] sm:$0xff] }
  0x14   : > { %464 = vmatpush1.msra.mxu0 %v280_v8  ;;  %625 = vmatpush1.msra.mxu1 %v282_v9  ;;  %v284_v12 = vld [vmem:[%s253_s30 + $0x20] sm:$0xff]  ;;  %v286_v13 = vld [vmem:[%s253_s30 + $0x30] sm:$0xff]  ;;  %v1918_v26 = vld [vmem:[%s2599_s1 + $0x28] sm:$0xff]  ;;  %s262_s30 = scalar_lea.vmem %s2603_s5, %s1647_s27 }
  0x15   : > { %1648 = vmatmul.mubr.msk.f32.vlgmr.msra.gmra.mxu0 %vm384_vm0, %v1839_v5  ;;  %1664 = vmatmul.mubr.msk.f32.vlgmr.msra.gmra.mxu1 %vm384_vm0, %v1839_v5  ;;  %v292_v27 = vld [vmem:[%s2600_s2 + $0x20] sm:$0xff]  ;;  %v293_v28 = vld [vmem:[%s2600_s2 + $0x28] sm:$0xff]  ;;  %v1935_v29 = vld [vmem:[%s2599_s1 + $0x30] sm:$0xff] }
  0x16   : > { %785 = vmatprep.subr.mxu0 %v285_v10  ;;  %946 = vmatprep.subr.mxu1 %v287_v11  ;;  %v290_v30 = vld [vmem:[%s2600_s2 + $0x10] sm:$0xff]  ;;  %v291_v31 = vld [vmem:[%s2600_s2 + $0x18] sm:$0xff]  ;;  %v288_v33 = vld [vmem:[%s2600_s2] sm:$0xff] }
  0x17   : > { %786 = vmatpush1.msra.mxu0 %v284_v12  ;;  %947 = vmatpush1.msra.mxu1 %v286_v13  ;;  %v1952_v32 = vld [vmem:[%s2599_s1 + $0x38] sm:$0xff]  ;;  %v289_v34 = vld [vmem:[%s2600_s2 + $0x8] sm:$0xff]  ;;  %v1969_v35 = vld [vmem:[%s2599_s1 + $0x40] sm:$0xff] }
  0x18   : > { %503 = vmatprep.mubr.f32.mxu0 %v2604_v1  ;;  %664 = vmatprep.mubr.f32.mxu1 %v2604_v1  ;;  %v1206_v36 = vld [vmem:[#allocation2] sm:$0x1]  ;;  %v1980_v37 = vld [vmem:[%s2599_s1 + $0x48] sm:$0xff]  ;;  %v1991_v38 = vld [vmem:[%s2599_s1 + $0x50] sm:$0xff] }
  0x19   : > { %1649 = vmatmul.mubr.msk.f32.gmra.mxu0 %vm384_vm0, %v1848_v14  ;;  %1665 = vmatmul.mubr.msk.f32.gmra.mxu1 %vm384_vm0, %v1848_v14  ;;  %v2002_v39 = vld [vmem:[%s2599_s1 + $0x58] sm:$0xff]  ;;  %v2013_v40 = vld [vmem:[%s2599_s1 + $0x60] sm:$0xff]  ;;  %v2024_v41 = vld [vmem:[%s2599_s1 + $0x68] sm:$0xff] }
  0x1a   : > { %509 = vmatprep.mubr.f32.mxu0 %v2604_v1  ;;  %670 = vmatprep.mubr.f32.mxu1 %v2604_v1  ;;  %v2035_v42 = vld [vmem:[%s2599_s1 + $0x70] sm:$0xff]  ;;  %v2046_v43 = vld [vmem:[%s2599_s1 + $0x78] sm:$0xff] }
  0x1b   : > { %366 = vperm.xlu1 %1743, %v300_v15   ;;  %376 = vperm.xlu0 %1742, %v302_v16  }
  0x1d   : > { %1650 = vmatmul.mubr.msk.f32.gmra.mxu0 %vm384_vm0, %v1867_v17  ;;  %1666 = vmatmul.mubr.msk.f32.gmra.mxu1 %vm384_vm0, %v1867_v17 }
  0x1e   : > { %515 = vmatprep.mubr.f32.mxu0 %v2604_v1  ;;  %676 = vmatprep.mubr.f32.mxu1 %v2604_v1 }
  0x1f   : > { %356 = vperm.xlu1 %1743, %v298_v18   ;;  %361 = vperm.xlu0 %1742, %v299_v19  }
  0x21   : > { %1651 = vmatmul.mubr.msk.f32.gmra.mxu0 %vm384_vm0, %v1884_v20  ;;  %1667 = vmatmul.mubr.msk.f32.gmra.mxu1 %vm384_vm0, %v1884_v20 }
  0x22   : > { %521 = vmatprep.mubr.f32.mxu0 %v2604_v1  ;;  %682 = vmatprep.mubr.f32.mxu1 %v2604_v1 }
  0x23   : > { %346 = vperm.xlu1 %1743, %v296_v21   ;;  %351 = vperm.xlu0 %1742, %v297_v22  }
  0x25   : > { %1652 = vmatmul.mubr.msk.f32.gmra.mxu0 %vm384_vm0, %v1901_v23  ;;  %1668 = vmatmul.mubr.msk.f32.gmra.mxu1 %vm384_vm0, %v1901_v23 }
  0x26   : > { %527 = vmatprep.mubr.f32.mxu0 %v2604_v1  ;;  %688 = vmatprep.mubr.f32.mxu1 %v2604_v1 }
  0x27   : > { %336 = vperm.xlu1 %1743, %v294_v24   ;;  %341 = vperm.xlu0 %1742, %v295_v25  }
  0x29   : > { %1653 = vmatmul.mubr.msk.f32.gmra.mxu0 %vm384_vm0, %v1918_v26  ;;  %1669 = vmatmul.mubr.msk.f32.gmra.mxu1 %vm384_vm0, %v1918_v26 }
  0x2a   : > { %533 = vmatprep.mubr.f32.mxu0 %v2604_v1  ;;  %694 = vmatprep.mubr.f32.mxu1 %v2604_v1 }
  0x2b   : > { %326 = vperm.xlu1 %1743, %v292_v27   ;;  %331 = vperm.xlu0 %1742, %v293_v28  }
  0x2d   : > { %1654 = vmatmul.mubr.msk.f32.gmra.mxu0 %vm384_vm0, %v1935_v29  ;;  %1670 = vmatmul.mubr.msk.f32.gmra.mxu1 %vm384_vm0, %v1935_v29 }
  0x2e   : > { %539 = vmatprep.mubr.f32.mxu0 %v2604_v1  ;;  %700 = vmatprep.mubr.f32.mxu1 %v2604_v1 }
  0x2f   : > { %316 = vperm.xlu1 %1743, %v290_v30   ;;  %321 = vperm.xlu0 %1742, %v291_v31  }
  0x31   : > { %1655 = vmatmul.mubr.msk.f32.gmra.mxu0 %vm384_vm0, %v1952_v32  ;;  %1671 = vmatmul.mubr.msk.f32.gmra.mxu1 %vm384_vm0, %v1952_v32 }
  0x32   : > { %545 = vmatprep.mubr.f32.mxu0 %v2604_v1  ;;  %706 = vmatprep.mubr.f32.mxu1 %v2604_v1 }
  0x33   : > { %306 = vperm.xlu1 %1743, %v288_v33   ;;  %311 = vperm.xlu0 %1742, %v289_v34  }
  0x35   : > { %1656 = vmatmul.mubr.msk.f32.gmra.mxu0 %vm384_vm0, %v1969_v35  ;;  %1672 = vmatmul.mubr.msk.f32.gmra.mxu1 %vm384_vm0, %v1969_v35 }
  0x36   : > { %551 = vmatprep.mubr.f32.mxu0 %v2604_v1  ;;  %712 = vmatprep.mubr.f32.mxu1 %v2604_v1 }
  0x37   : > { %1209 = vperm.xlu0 %1742, %v1206_v36  }
  0x39   : > { %1657 = vmatmul.mubr.msk.f32.gmra.mxu0 %vm384_vm0, %v1980_v37  ;;  %1673 = vmatmul.mubr.msk.f32.gmra.mxu1 %vm384_vm0, %v1980_v37 }
  0x3a   : > { %557 = vmatprep.mubr.f32.mxu0 %v2604_v1  ;;  %718 = vmatprep.mubr.f32.mxu1 %v2604_v1 }
  0x3d   : > { %1658 = vmatmul.mubr.msk.f32.gmra.mxu0 %vm384_vm0, %v1991_v38  ;;  %1674 = vmatmul.mubr.msk.f32.gmra.mxu1 %vm384_vm0, %v1991_v38 }
  0x3e   : > { %563 = vmatprep.mubr.f32.mxu0 %v2604_v1  ;;  %724 = vmatprep.mubr.f32.mxu1 %v2604_v1 }
  0x41   : > { %1659 = vmatmul.mubr.msk.f32.gmra.mxu0 %vm384_vm0, %v2002_v39  ;;  %1675 = vmatmul.mubr.msk.f32.gmra.mxu1 %vm384_vm0, %v2002_v39 }
  0x42   : > { %569 = vmatprep.mubr.f32.mxu0 %v2604_v1  ;;  %730 = vmatprep.mubr.f32.mxu1 %v2604_v1 }
  0x45   : > { %1660 = vmatmul.mubr.msk.f32.gmra.mxu0 %vm384_vm0, %v2013_v40  ;;  %1676 = vmatmul.mubr.msk.f32.gmra.mxu1 %vm384_vm0, %v2013_v40 }
  0x46   : > { %575 = vmatprep.mubr.f32.mxu0 %v2604_v1  ;;  %736 = vmatprep.mubr.f32.mxu1 %v2604_v1 }
  0x49   : > { %1661 = vmatmul.mubr.msk.f32.gmra.mxu0 %vm384_vm0, %v2024_v41  ;;  %1677 = vmatmul.mubr.msk.f32.gmra.mxu1 %vm384_vm0, %v2024_v41 }
  0x4a   : > { %581 = vmatprep.mubr.f32.mxu0 %v2604_v1  ;;  %742 = vmatprep.mubr.f32.mxu1 %v2604_v1 }
  0x4d   : > { %1662 = vmatmul.mubr.msk.f32.gmra.mxu0 %vm384_vm0, %v2035_v42  ;;  %1678 = vmatmul.mubr.msk.f32.gmra.mxu1 %vm384_vm0, %v2035_v42 }
  0x4e   : > { %587 = vmatprep.mubr.f32.mxu0 %v2604_v1  ;;  %748 = vmatprep.mubr.f32.mxu1 %v2604_v1 }
  0x51   : > { %1663 = vmatmul.mubr.msk.f32.gmra.mxu0 %vm384_vm0, %v2046_v43  ;;  %1679 = vmatmul.mubr.msk.f32.gmra.mxu1 %vm384_vm0, %v2046_v43 }
  0x52   : > { %819 = vmatprep.mubr.f32.mxu0 %v2604_v1  ;;  %980 = vmatprep.mubr.f32.mxu1 %v2604_v1 }
  0x55   : > { %1680 = vmatmul.mubr.msk.f32.vlgmr.msra.gmra.mxu0 %vm384_vm0, %v1839_v5  ;;  %1696 = vmatmul.mubr.msk.f32.vlgmr.msra.gmra.mxu1 %vm384_vm0, %v1839_v5 }
  0x56   : > { %825 = vmatprep.mubr.f32.mxu0 %v2604_v1  ;;  %986 = vmatprep.mubr.f32.mxu1 %v2604_v1 }
  0x59   : > { %1681 = vmatmul.mubr.msk.f32.gmra.mxu0 %vm384_vm0, %v1848_v14  ;;  %1697 = vmatmul.mubr.msk.f32.gmra.mxu1 %vm384_vm0, %v1848_v14 }
  0x5a   : > { %831 = vmatprep.mubr.f32.mxu0 %v2604_v1  ;;  %992 = vmatprep.mubr.f32.mxu1 %v2604_v1 }
  0x5d   : > { %1682 = vmatmul.mubr.msk.f32.gmra.mxu0 %vm384_vm0, %v1867_v17  ;;  %1698 = vmatmul.mubr.msk.f32.gmra.mxu1 %vm384_vm0, %v1867_v17 }
  0x5e   : > { %837 = vmatprep.mubr.f32.mxu0 %v2604_v1  ;;  %998 = vmatprep.mubr.f32.mxu1 %v2604_v1 }
  0x61   : > { %1683 = vmatmul.mubr.msk.f32.gmra.mxu0 %vm384_vm0, %v1884_v20  ;;  %1699 = vmatmul.mubr.msk.f32.gmra.mxu1 %vm384_vm0, %v1884_v20 }
  0x62   : > { %843 = vmatprep.mubr.f32.mxu0 %v2604_v1  ;;  %1004 = vmatprep.mubr.f32.mxu1 %v2604_v1 }
  0x65   : > { %1684 = vmatmul.mubr.msk.f32.gmra.mxu0 %vm384_vm0, %v1901_v23  ;;  %1700 = vmatmul.mubr.msk.f32.gmra.mxu1 %vm384_vm0, %v1901_v23 }
  0x66   : > { %849 = vmatprep.mubr.f32.mxu0 %v2604_v1  ;;  %1010 = vmatprep.mubr.f32.mxu1 %v2604_v1 }
  0x69   : > { %1685 = vmatmul.mubr.msk.f32.gmra.mxu0 %vm384_vm0, %v1918_v26  ;;  %1701 = vmatmul.mubr.msk.f32.gmra.mxu1 %vm384_vm0, %v1918_v26 }
  0x6a   : > { %855 = vmatprep.mubr.f32.mxu0 %v2604_v1  ;;  %1016 = vmatprep.mubr.f32.mxu1 %v2604_v1 }
  0x6d   : > { %1686 = vmatmul.mubr.msk.f32.gmra.mxu0 %vm384_vm0, %v1935_v29  ;;  %1702 = vmatmul.mubr.msk.f32.gmra.mxu1 %vm384_vm0, %v1935_v29 }
  0x6e   : > { %861 = vmatprep.mubr.f32.mxu0 %v2604_v1  ;;  %1022 = vmatprep.mubr.f32.mxu1 %v2604_v1 }
  0x71   : > { %1687 = vmatmul.mubr.msk.f32.gmra.mxu0 %vm384_vm0, %v1952_v32  ;;  %1703 = vmatmul.mubr.msk.f32.gmra.mxu1 %vm384_vm0, %v1952_v32 }
  0x72   : > { %867 = vmatprep.mubr.f32.mxu0 %v2604_v1  ;;  %1028 = vmatprep.mubr.f32.mxu1 %v2604_v1 }
  0x75   : > { %1688 = vmatmul.mubr.msk.f32.gmra.mxu0 %vm384_vm0, %v1969_v35  ;;  %1704 = vmatmul.mubr.msk.f32.gmra.mxu1 %vm384_vm0, %v1969_v35 }
  0x76   : > { %873 = vmatprep.mubr.f32.mxu0 %v2604_v1  ;;  %1034 = vmatprep.mubr.f32.mxu1 %v2604_v1 }
  0x79   : > { %1689 = vmatmul.mubr.msk.f32.gmra.mxu0 %vm384_vm0, %v1980_v37  ;;  %1705 = vmatmul.mubr.msk.f32.gmra.mxu1 %vm384_vm0, %v1980_v37 }
  0x7a   : > { %879 = vmatprep.mubr.f32.mxu0 %v2604_v1  ;;  %1040 = vmatprep.mubr.f32.mxu1 %v2604_v1 }
  0x7d   : > { %1690 = vmatmul.mubr.msk.f32.gmra.mxu0 %vm384_vm0, %v1991_v38  ;;  %1706 = vmatmul.mubr.msk.f32.gmra.mxu1 %vm384_vm0, %v1991_v38 }
  0x7e   : > { %885 = vmatprep.mubr.f32.mxu0 %v2604_v1  ;;  %1046 = vmatprep.mubr.f32.mxu1 %v2604_v1 }
  0x81   : > { %1691 = vmatmul.mubr.msk.f32.gmra.mxu0 %vm384_vm0, %v2002_v39  ;;  %1707 = vmatmul.mubr.msk.f32.gmra.mxu1 %vm384_vm0, %v2002_v39 }
  0x82   : > { %891 = vmatprep.mubr.f32.mxu0 %v2604_v1  ;;  %1052 = vmatprep.mubr.f32.mxu1 %v2604_v1 }
  0x85   : > { %1692 = vmatmul.mubr.msk.f32.gmra.mxu0 %vm384_vm0, %v2013_v40  ;;  %1708 = vmatmul.mubr.msk.f32.gmra.mxu1 %vm384_vm0, %v2013_v40 }
  0x86   : > { %897 = vmatprep.mubr.f32.mxu0 %v2604_v1  ;;  %1058 = vmatprep.mubr.f32.mxu1 %v2604_v1 }
  0x89   : > { %1693 = vmatmul.mubr.msk.f32.gmra.mxu0 %vm384_vm0, %v2024_v41  ;;  %1709 = vmatmul.mubr.msk.f32.gmra.mxu1 %vm384_vm0, %v2024_v41 }
  0x8a   : > { %903 = vmatprep.mubr.f32.mxu0 %v2604_v1  ;;  %1064 = vmatprep.mubr.f32.mxu1 %v2604_v1 }
  0x8b   : > { %v2242_v27 = vpop.permute.xlu0 %381  ;;  %v2244_v30 = vpop.permute.xlu1 %371 }
  0x8c   : > { %2641 = vst [vmem:[#allocation22_spill] sm:$0xff] %v2242_v27 }
  0x8d   : > { %1694 = vmatmul.mubr.msk.f32.gmra.mxu0 %vm384_vm0, %v2035_v42  ;;  %1710 = vmatmul.mubr.msk.f32.gmra.mxu1 %vm384_vm0, %v2035_v42 }
  0x8e   : > { %909 = vmatprep.mubr.f32.mxu0 %v2604_v1  ;;  %1070 = vmatprep.mubr.f32.mxu1 %v2604_v1 }
  0x91   : > { %1695 = vmatmul.mubr.msk.f32.gmra.mxu0 %vm384_vm0, %v2046_v43  ;;  %1711 = vmatmul.mubr.msk.f32.gmra.mxu1 %vm384_vm0, %v2046_v43 }
  0x92   : > { %1280 = vmatprep.mubr.f32.mxu0 %v2604_v1  ;;  %1351 = vmatprep.mubr.f32.mxu1 %v2604_v1 }
  0x96   : > { %v2246_v35 = vpop.permute.xlu0 %376  ;;  %v2248_v38 = vpop.permute.xlu1 %366 }
  0x97   : > { %2642 = vst [vmem:[#allocation23_spill] sm:$0xff] %v2246_v35 }
  0x9a   : > { %v2250_v43 = vpop.permute.xlu0 %361 }
  0xd5   : > { %v2150_v44 = vpop.f32.mrf.mxu0  ;;  %v2152_v45 = vpop.f32.mrf.mxu1 }
  0xd6   : > { %2622 = vst [vmem:[#allocation3_spill] sm:$0xff] %v2150_v44  ;;  %2623 = vst [vmem:[#allocation4_spill] sm:$0xff] %v2152_v45  ;;  %v2252_v44 = vpop.permute.xlu1 %356 }
  0xd7   : > { %v2154_v46 = vpop.f32.mrf.mxu0  ;;  %v2156_v47 = vpop.f32.mrf.mxu1 }
  0xd8   : > { %2624 = vst [vmem:[#allocation5_spill] sm:$0xff] %v2154_v46  ;;  %2625 = vst [vmem:[#allocation6_spill] sm:$0xff] %v2156_v47 }
  0xd9   : > { %v2158_v48 = vpop.f32.mrf.mxu0  ;;  %v2160_v49 = vpop.f32.mrf.mxu1 }
  0xda   : > { %2626 = vst [vmem:[#allocation7_spill] sm:$0xff] %v2158_v48  ;;  %2627 = vst [vmem:[#allocation8_spill] sm:$0xff] %v2160_v49 }
  0xdb   : > { %v2162_v50 = vpop.f32.mrf.mxu0  ;;  %v2164_v51 = vpop.f32.mrf.mxu1 }
  0xdc   : > { %2628 = vst [vmem:[#allocation9_spill] sm:$0xff] %v2162_v50  ;;  %2629 = vst [vmem:[#allocation10_spill] sm:$0xff] %v2164_v51 }
  0xdd   : > { %v2166_v52 = vpop.f32.mrf.mxu0  ;;  %v2168_v53 = vpop.f32.mrf.mxu1 }
  0xde   : > { %2630 = vst [vmem:[#allocation11_spill] sm:$0xff] %v2166_v52  ;;  %2631 = vst [vmem:[#allocation12_spill] sm:$0xff] %v2168_v53  ;;  %v2256_v53 = vpop.permute.xlu0 %351 }
  0xdf   : > { %v2170_v54 = vpop.f32.mrf.mxu0  ;;  %v2172_v55 = vpop.f32.mrf.mxu1 }
  0xe0   : > { %2632 = vst [vmem:[#allocation13_spill] sm:$0xff] %v2170_v54  ;;  %2633 = vst [vmem:[#allocation14_spill] sm:$0xff] %v2172_v55 }
  0xe1   : > { %v2174_v56 = vpop.f32.mrf.mxu0  ;;  %v2176_v57 = vpop.f32.mrf.mxu1 }
  0xe2   : > { %2634 = vst [vmem:[#allocation15_spill] sm:$0xff] %v2174_v56  ;;  %2635 = vst [vmem:[#allocation16_spill] sm:$0xff] %v2176_v57 }
  0xe3   : > { %v2178_v58 = vpop.f32.mrf.mxu0  ;;  %v2180_v59 = vpop.f32.mrf.mxu1 }
  0xe4   : > { %2636 = vst [vmem:[#allocation17_spill] sm:$0xff] %v2178_v58  ;;  %2637 = vst [vmem:[#allocation18_spill] sm:$0xff] %v2180_v59 }
  0xe5   : > { %v2182_v60 = vpop.f32.mrf.mxu0  ;;  %v2184_v61 = vpop.f32.mrf.mxu1 }
  0xe6   : > { %2638 = vst [vmem:[#allocation19_spill] sm:$0xff] %v2182_v60  ;;  %2639 = vst [vmem:[#allocation20_spill] sm:$0xff] %v2184_v61 }
  0xe7   : > { %v2186_v62 = vpop.f32.mrf.mxu0  ;;  %v2188_v63 = vpop.f32.mrf.mxu1 }
  0xe8   : > { %2640 = vst [vmem:[#allocation21_spill] sm:$0xff] %v2188_v63 }
  0xe9   : > { %v2190_v0 = vpop.f32.mrf.mxu0  ;;  %v2192_v2 = vpop.f32.mrf.mxu1 }
  0xeb   : > { %v2194_v3 = vpop.f32.mrf.mxu0  ;;  %v2196_v4 = vpop.f32.mrf.mxu1 }
  0xed   : > { %v2198_v5 = vpop.f32.mrf.mxu0  ;;  %v2200_v6 = vpop.f32.mrf.mxu1 }
  0xef   : > { %v2202_v7 = vpop.f32.mrf.mxu0  ;;  %v2204_v8 = vpop.f32.mrf.mxu1 }
  0xf1   : > { %v2206_v9 = vpop.f32.mrf.mxu0  ;;  %v2208_v10 = vpop.f32.mrf.mxu1 }
  0xf3   : > { %v2210_v11 = vpop.f32.mrf.mxu0  ;;  %v2212_v12 = vpop.f32.mrf.mxu1 }
  0xf5   : > { %v2214_v13 = vpop.f32.mrf.mxu0  ;;  %v2216_v14 = vpop.f32.mrf.mxu1 }
  0xf7   : > { %v2218_v15 = vpop.f32.mrf.mxu0  ;;  %v2220_v16 = vpop.f32.mrf.mxu1 }
  0xf9   : > { %v2222_v17 = vpop.f32.mrf.mxu0  ;;  %v2224_v18 = vpop.f32.mrf.mxu1 }
  0xfb   : > { %v2226_v19 = vpop.f32.mrf.mxu0  ;;  %v2228_v20 = vpop.f32.mrf.mxu1 }
  0xfd   : > { %v2230_v21 = vpop.f32.mrf.mxu0  ;;  %v2232_v22 = vpop.f32.mrf.mxu1 }
  0xff   : > { %v2234_v23 = vpop.f32.mrf.mxu0  ;;  %v2236_v24 = vpop.f32.mrf.mxu1 }
 0x101   : > { %v2238_v25 = vpop.f32.mrf.mxu0  ;;  %v2240_v26 = vpop.f32.mrf.mxu1 }
 0x103   : > { %v567_v28 = vpop.f32.mrf.mxu0  ;;  %v728_v29 = vpop.f32.mrf.mxu1 }
 0x105   : > { %v571_v31 = vpop.f32.mrf.mxu0  ;;  %v732_v32 = vpop.f32.mrf.mxu1 }
 0x107   : > { %v573_v33 = vpop.f32.mrf.mxu0  ;;  %v734_v34 = vpop.f32.mrf.mxu1 }
 0x109   : > { %v577_v36 = vpop.f32.mrf.mxu0  ;;  %v738_v37 = vpop.f32.mrf.mxu1 }
 0x10b   : > { %v579_v39 = vpop.f32.mrf.mxu0  ;;  %v740_v40 = vpop.f32.mrf.mxu1 }
 0x10c   : > { %v580_v61 = vadd.f32 %v579_v39, %v2244_v30 }
 0x10d   : > { %v583_v41 = vpop.f32.mrf.mxu0  ;;  %v744_v42 = vpop.f32.mrf.mxu1 }
 0x10e   : > { %v584_v56 = vadd.f32 %v583_v41, %v2246_v35  ;;  %v745_v59 = vadd.f32 %v744_v42, %v2246_v35 }
 0x10f   : > { %v585_v1 = vpop.f32.mrf.mxu0  ;;  %v746_v45 = vpop.f32.mrf.mxu1 }
 0x110   : > { %v586_v52 = vadd.f32 %v585_v1, %v2246_v35  ;;  %v747_v55 = vadd.f32 %v746_v45, %v2246_v35  ;;  %v741_v1 = vadd.f32 %v740_v40, %v2244_v30  ;;  %v2286_v40 = vpop.permute.xlu0 %341 }
 0x111   : > { %v589_v47 = vpop.f32.mrf.mxu0  ;;  %v750_v46 = vpop.f32.mrf.mxu1 }
 0x112   : > { %v590_v49 = vadd.f32 %v589_v47, %v2242_v27  ;;  %v751_v48 = vadd.f32 %v750_v46, %v2242_v27  ;;  %v2268_v46 = vpop.permute.xlu1 %346  ;;  %v1190_v35 = vmax.f32 %v586_v52, 0.0  ;;  %v1192_v39 = vmax.f32 %v747_v55, 0.0 }
 0x113   : > { %v591_v51 = vpop.f32.mrf.mxu0  ;;  %v752_v50 = vpop.f32.mrf.mxu1  ;;  %v729_v52 = vadd.f32 %v728_v29, %v2250_v43  ;;  %v1182_v55 = vmax.f32 %v580_v61, 0.0  ;;  %v562_v61 = vadd.f32 %v2234_v23, %v2252_v44  ;;  %v723_v29 = vadd.f32 %v2236_v24, %v2252_v44 }
 0x114   : > { %v592_v54 = vadd.f32 %v591_v51, %v2242_v27  ;;  %v753_v57 = vadd.f32 %v752_v50, %v2242_v27  ;;  %v578_v51 = vadd.f32 %v577_v36, %v2244_v30  ;;  %v739_v50 = vadd.f32 %v738_v37, %v2244_v30 }
 0x115   : > { %v2264_v58 = vpop.f32.mrf.mxu0  ;;  %v2266_v47 = vpop.f32.mrf.mxu1  ;;  %v1197_v27 = vmax.f32 %v590_v49, 0.0  ;;  %v1199_v41 = vmax.f32 %v751_v48, 0.0  ;;  %v1189_v36 = vmax.f32 %v584_v56, 0.0  ;;  %v1191_v37 = vmax.f32 %v745_v59, 0.0 }
 0x116   : > { %2643 = vst [vmem:[#allocation24_spill] sm:$0xff] %v2264_v58  ;;  %2644 = vst [vmem:[#allocation25_spill] sm:$0xff] %v2266_v47  ;;  %v1198_v60 = vmax.f32 %v592_v54, 0.0  ;;  %v1200_v45 = vmax.f32 %v753_v57, 0.0  ;;  %v574_v47 = vadd.f32 %v573_v33, %v2248_v38  ;;  %v735_v58 = vadd.f32 %v734_v34, %v2248_v38 }
 0x117   : > { %v2274_v63 = vpop.f32.mrf.mxu0  ;;  %v2276_v42 = vpop.f32.mrf.mxu1  ;;  %v572_v54 = vadd.f32 %v571_v31, %v2248_v38  ;;  %v733_v57 = vadd.f32 %v732_v32, %v2248_v38  ;;  %v568_v33 = vadd.f32 %v567_v28, %v2250_v43  ;;  %v566_v56 = vadd.f32 %v2238_v25, %v2250_v43 }
 0x118   : > { %2645 = vst [vmem:[#allocation26_spill] sm:$0xff] %v2274_v63  ;;  %2646 = vst [vmem:[#allocation27_spill] sm:$0xff] %v2276_v42  ;;  %1216 = vmatprep.subr.mxu0 %v1198_v60  ;;  %1287 = vmatprep.subr.mxu1 %v1200_v45  ;;  %v1184_v60 = vmax.f32 %v741_v1, 0.0  ;;  %v727_v59 = vadd.f32 %v2240_v26, %v2250_v43  ;;  %v1181_v31 = vmax.f32 %v578_v51, 0.0  ;;  %v1183_v32 = vmax.f32 %v739_v50, 0.0  ;;  %v2298_v28 = vpop.permute.xlu1 %336 }
 0x119   : > { %v2282_v49 = vpop.f32.mrf.mxu0  ;;  %v2284_v48 = vpop.f32.mrf.mxu1  ;;  %1217 = vmatpush1.msra.mxu0 %v1197_v27  ;;  %1288 = vmatpush1.msra.mxu1 %v1199_v41  ;;  %v1174_v25 = vmax.f32 %v574_v47, 0.0  ;;  %v560_v26 = vadd.f32 %v2230_v21, %v2252_v44  ;;  %v721_v1 = vadd.f32 %v2232_v22, %v2252_v44  ;;  %v1173_v45 = vmax.f32 %v572_v54, 0.0 }
 0x11a   : > { %2647 = vst [vmem:[#allocation28_spill] sm:$0xff] %v2282_v49  ;;  %2648 = vst [vmem:[#allocation29_spill] sm:$0xff] %v2284_v48  ;;  %1218 = vmatprep.subr.mxu0 %v1190_v35  ;;  %1289 = vmatprep.subr.mxu1 %v1192_v39  ;;  %v1176_v35 = vmax.f32 %v735_v58, 0.0  ;;  %v1175_v51 = vmax.f32 %v733_v57, 0.0  ;;  %v556_v23 = vadd.f32 %v2226_v19, %v2256_v53  ;;  %v1166_v24 = vmax.f32 %v568_v33, 0.0  ;;  %v2324_v19 = vpop.permute.xlu0 %331 }
 0x11b   : > { %v2294_v27 = vpop.f32.mrf.mxu0  ;;  %v2296_v34 = vpop.f32.mrf.mxu1  ;;  %1219 = vmatpush1.msra.mxu0 %v1189_v36  ;;  %1290 = vmatpush1.msra.mxu1 %v1191_v37  ;;  %v717_v58 = vadd.f32 %v2228_v20, %v2256_v53  ;;  %v1168_v47 = vmax.f32 %v729_v52, 0.0  ;;  %v554_v21 = vadd.f32 %v2222_v17, %v2256_v53  ;;  %v715_v22 = vadd.f32 %v2224_v18, %v2256_v53 }
 0x11c   : > { %2649 = vst [vmem:[#allocation30_spill] sm:$0xff] %v2294_v27  ;;  %2650 = vst [vmem:[#allocation31_spill] sm:$0xff] %v2296_v34  ;;  %1220 = vmatprep.subr.mxu0 %v1182_v55  ;;  %1291 = vmatprep.subr.mxu1 %v1184_v60  ;;  %v1165_v39 = vmax.f32 %v566_v56, 0.0  ;;  %v1167_v54 = vmax.f32 %v727_v59, 0.0  ;;  %v550_v20 = vadd.f32 %v2218_v15, %v2268_v46  ;;  %v1158_v17 = vmax.f32 %v562_v61, 0.0  ;;  %v2338_v15 = vpop.permute.xlu1 %326 }
 0x11d   : > { %v2308_v50 = vpop.f32.mrf.mxu0  ;;  %v2310_v41 = vpop.f32.mrf.mxu1  ;;  %1221 = vmatpush1.msra.mxu0 %v1181_v31  ;;  %1292 = vmatpush1.msra.mxu1 %v1183_v32  ;;  %v711_v37 = vadd.f32 %v2220_v16, %v2268_v46  ;;  %v1160_v33 = vmax.f32 %v723_v29, 0.0  ;;  %v548_v18 = vadd.f32 %v2214_v13, %v2268_v46  ;;  %v709_v52 = vadd.f32 %v2216_v14, %v2268_v46 }
 0x11e   : > { %2651 = vst [vmem:[#allocation32_spill] sm:$0xff] %v2308_v50  ;;  %2652 = vst [vmem:[#allocation33_spill] sm:$0xff] %v2310_v41  ;;  %1222 = vmatprep.subr.mxu0 %v1174_v25  ;;  %1293 = vmatprep.subr.mxu1 %v1176_v35  ;;  %v1157_v55 = vmax.f32 %v560_v26, 0.0  ;;  %v1159_v60 = vmax.f32 %v721_v1, 0.0  ;;  %v544_v16 = vadd.f32 %v2210_v11, %v2286_v40  ;;  %v1150_v13 = vmax.f32 %v556_v23, 0.0 }
 0x11f   : > { %v2320_v57 = vpop.f32.mrf.mxu0  ;;  %v2322_v36 = vpop.f32.mrf.mxu1  ;;  %1223 = vmatpush1.msra.mxu0 %v1173_v45  ;;  %1294 = vmatpush1.msra.mxu1 %v1175_v51  ;;  %2657 = vst [vmem:[#allocation38_spill] sm:$0xff] %v2338_v15  ;;  %v705_v31 = vadd.f32 %v2212_v12, %v2286_v40  ;;  %v1152_v32 = vmax.f32 %v717_v58, 0.0  ;;  %v542_v14 = vadd.f32 %v2206_v9, %v2286_v40  ;;  %v1149_v29 = vmax.f32 %v554_v21, 0.0 }
 0x120   : > { %2653 = vst [vmem:[#allocation34_spill] sm:$0xff] %v2320_v57  ;;  %2654 = vst [vmem:[#allocation35_spill] sm:$0xff] %v2322_v36  ;;  %1224 = vmatprep.subr.mxu0 %v1166_v24  ;;  %1295 = vmatprep.subr.mxu1 %v1168_v47  ;;  %v703_v61 = vadd.f32 %v2208_v10, %v2286_v40  ;;  %v1151_v25 = vmax.f32 %v715_v22, 0.0  ;;  %v538_v11 = vadd.f32 %v2202_v7, %v2298_v28  ;;  %v2364_v7 = vpop.permute.xlu0 %321  ;;  %v2692_v36 = vld [vmem:[#allocation22_spill] sm:$0xff] }
 0x121   : > { %v2334_v56 = vpop.f32.mrf.mxu0  ;;  %v2336_v59 = vpop.f32.mrf.mxu1  ;;  %1225 = vmatpush1.msra.mxu0 %v1165_v39  ;;  %1296 = vmatpush1.msra.mxu1 %v1167_v54  ;;  %v699_v12 = vadd.f32 %v2204_v8, %v2298_v28  ;;  %v1142_v1 = vmax.f32 %v550_v20, 0.0  ;;  %v1144_v45 = vmax.f32 %v711_v37, 0.0  ;;  %v536_v9 = vadd.f32 %v2198_v5, %v2298_v28  ;;  %2662 = vst [vmem:[#allocation43_spill] sm:$0xff] %v2364_v7 }
 0x122   : > { %2655 = vst [vmem:[#allocation36_spill] sm:$0xff] %v2334_v56  ;;  %2656 = vst [vmem:[#allocation37_spill] sm:$0xff] %v2336_v59  ;;  %1226 = vmatprep.subr.mxu0 %v1158_v17  ;;  %1297 = vmatprep.subr.mxu1 %v1160_v33  ;;  %v697_v10 = vadd.f32 %v2200_v6, %v2298_v28  ;;  %v1141_v51 = vmax.f32 %v548_v18, 0.0  ;;  %v1143_v23 = vmax.f32 %v709_v52, 0.0  ;;  %v1134_v5 = vmax.f32 %v544_v16, 0.0  ;;  %v2666_v17 = vld [vmem:[#allocation21_spill] sm:$0xff] }
 0x123   : > { %v2348_v35 = vpop.f32.mrf.mxu0  ;;  %v2350_v26 = vpop.f32.mrf.mxu1  ;;  %1227 = vmatpush1.msra.mxu0 %v1157_v55  ;;  %1298 = vmatpush1.msra.mxu1 %v1159_v60  ;;  %v532_v8 = vadd.f32 %v2194_v3, %v2324_v19  ;;  %v693_v47 = vadd.f32 %v2196_v4, %v2324_v19  ;;  %v1136_v21 = vmax.f32 %v705_v31, 0.0  ;;  %v530_v6 = vadd.f32 %v2190_v0, %v2324_v19  ;;  %v2668_v55 = vld [vmem:[#allocation20_spill] sm:$0xff] }
 0x124   : > { %2658 = vst [vmem:[#allocation39_spill] sm:$0xff] %v2348_v35  ;;  %2659 = vst [vmem:[#allocation40_spill] sm:$0xff] %v2350_v26  ;;  %1228 = vmatprep.subr.mxu0 %v1150_v13  ;;  %1299 = vmatprep.subr.mxu1 %v1152_v32  ;;  %v691_v22 = vadd.f32 %v2192_v2, %v2324_v19  ;;  %v1133_v39 = vmax.f32 %v542_v14, 0.0  ;;  %v1135_v54 = vmax.f32 %v703_v61, 0.0  ;;  %v2378_v3 = vpop.permute.xlu1 %316  ;;  %v1126_v0 = vmax.f32 %v538_v11, 0.0  ;;  %v2667_v2 = vld [vmem:[#allocation19_spill] sm:$0xff] }
 0x125   : > { %v2360_v58 = vpop.f32.mrf.mxu0  ;;  %v2362_v24 = vpop.f32.mrf.mxu1  ;;  %1229 = vmatpush1.msra.mxu0 %v1149_v29  ;;  %1300 = vmatpush1.msra.mxu1 %v1151_v25  ;;  %2665 = vst [vmem:[#allocation46_spill] sm:$0xff] %v2378_v3  ;;  %v526_v4 = vadd.f32 %v2186_v62, %v2338_v15  ;;  %v687_v33 = vadd.f32 %v2666_v17, %v2338_v15  ;;  %v1128_v18 = vmax.f32 %v699_v12, 0.0  ;;  %v1125_v16 = vmax.f32 %v536_v9, 0.0  ;;  %v2671_v62 = vld [vmem:[#allocation17_spill] sm:$0xff]  ;;  %v2672_v61 = vld [vmem:[#allocation18_spill] sm:$0xff]  ;;  %v2673_v12 = vld [vmem:[#allocation15_spill] sm:$0xff] }
 0x126   : > { %2660 = vst [vmem:[#allocation41_spill] sm:$0xff] %v2360_v58  ;;  %2661 = vst [vmem:[#allocation42_spill] sm:$0xff] %v2362_v24  ;;  %1230 = vmatprep.subr.mxu0 %v1142_v1  ;;  %1301 = vmatprep.subr.mxu1 %v1144_v45  ;;  %v524_v52 = vadd.f32 %v2667_v2, %v2338_v15  ;;  %v685_v60 = vadd.f32 %v2668_v55, %v2338_v15  ;;  %v1127_v31 = vmax.f32 %v697_v10, 0.0  ;;  %v2674_v45 = vld [vmem:[#allocation16_spill] sm:$0xff]  ;;  %v2693_v26 = vld [vmem:[#allocation23_spill] sm:$0xff] }
 0x127   : > { %v2374_v20 = vpop.f32.mrf.mxu0  ;;  %v2376_v37 = vpop.f32.mrf.mxu1  ;;  %1231 = vmatpush1.msra.mxu0 %v1141_v51  ;;  %1302 = vmatpush1.msra.mxu1 %v1143_v23  ;;  %v520_v14 = vadd.f32 %v2671_v62, %v2364_v7  ;;  %v681_v29 = vadd.f32 %v2672_v61, %v2364_v7  ;;  %v1118_v25 = vmax.f32 %v532_v8, 0.0  ;;  %v1120_v11 = vmax.f32 %v693_v47, 0.0  ;;  %v2677_v8 = vld [vmem:[#allocation13_spill] sm:$0xff] }
 0x128   : > { %2663 = vst [vmem:[#allocation44_spill] sm:$0xff] %v2374_v20  ;;  %2664 = vst [vmem:[#allocation45_spill] sm:$0xff] %v2376_v37  ;;  %1232 = vmatprep.subr.mxu0 %v1134_v5  ;;  %1303 = vmatprep.subr.mxu1 %v1136_v21  ;;  %v518_v1 = vadd.f32 %v2673_v12, %v2364_v7  ;;  %v679_v9 = vadd.f32 %v2674_v45, %v2364_v7  ;;  %v1117_v10 = vmax.f32 %v530_v6, 0.0  ;;  %v2404_v21 = vpop.permute.xlu0 %311  ;;  %v2679_v6 = vld [vmem:[#allocation11_spill] sm:$0xff]  ;;  %v2418_v61 = vpop.permute.xlu1 %306 }
 0x129   : > { %v2388_v13 = vpop.f32.mrf.mxu0  ;;  %v2390_v32 = vpop.f32.mrf.mxu1  ;;  %1233 = vmatpush1.msra.mxu0 %v1133_v39  ;;  %1304 = vmatpush1.msra.mxu1 %v1135_v54  ;;  %v1119_v51 = vmax.f32 %v691_v22, 0.0  ;;  %2676 = vst [vmem:[#allocation17_spill] sm:$0xff] %v2404_v21  ;;  %v514_v47 = vadd.f32 %v2677_v8, %v2378_v3  ;;  %v2678_v39 = vld [vmem:[#allocation14_spill] sm:$0xff]  ;;  %v1110_v17 = vmax.f32 %v526_v4, 0.0  ;;  %v512_v22 = vadd.f32 %v2679_v6, %v2378_v3  ;;  %v2682_v4 = vld [vmem:[#allocation9_spill] sm:$0xff]  ;;  %v2685_v6 = vld [vmem:[#allocation8_spill] sm:$0xff] }
 0x12a   : > { %2669 = vst [vmem:[#allocation21_spill] sm:$0xff] %v2388_v13  ;;  %2670 = vst [vmem:[#allocation19_spill] sm:$0xff] %v2390_v32  ;;  %1234 = vmatprep.subr.mxu0 %v1126_v0  ;;  %1305 = vmatprep.subr.mxu1 %v1128_v18  ;;  %v675_v54 = vadd.f32 %v2678_v39, %v2378_v3  ;;  %v1112_v0 = vmax.f32 %v687_v33, 0.0  ;;  %v2680_v18 = vld [vmem:[#allocation12_spill] sm:$0xff]  ;;  %v1109_v55 = vmax.f32 %v524_v52, 0.0  ;;  %v1102_v12 = vmax.f32 %v520_v14, 0.0 }
 0x12b   : > { %v2400_v23 = vpop.f32.mrf.mxu0  ;;  %v2402_v5 = vpop.f32.mrf.mxu1  ;;  %1235 = vmatpush1.msra.mxu0 %v1125_v16  ;;  %1306 = vmatpush1.msra.mxu1 %v1127_v31  ;;  %v673_v2 = vadd.f32 %v2680_v18, %v2378_v3  ;;  %v1111_v16 = vmax.f32 %v685_v60, 0.0  ;;  %2681 = vst [vmem:[#allocation18_spill] sm:$0xff] %v2418_v61  ;;  %v508_v33 = vadd.f32 %v2682_v4, %v2404_v21  ;;  %v1104_v45 = vmax.f32 %v681_v29, 0.0  ;;  %v2686_v4 = vld [vmem:[#allocation5_spill] sm:$0xff]  ;;  %v2687_v29 = vld [vmem:[#allocation6_spill] sm:$0xff] }
 0x12c   : > { %2675 = vst [vmem:[#allocation20_spill] sm:$0xff] %v2402_v5  ;;  %1236 = vmatprep.subr.mxu0 %v1118_v25  ;;  %1307 = vmatprep.subr.mxu1 %v1120_v11  ;;  %v2683_v25 = vld [vmem:[#allocation10_spill] sm:$0xff]  ;;  %v1101_v52 = vmax.f32 %v518_v1, 0.0  ;;  %v1103_v60 = vmax.f32 %v679_v9, 0.0  ;;  %v667_v18 = vadd.f32 %v2685_v6, %v2404_v21  ;;  %v502_v14 = vadd.f32 %v2686_v4, %v2418_v61  ;;  %v2689_v4 = vld [vmem:[#allocation4_spill] sm:$0xff] }
 0x12d   : > { %v2414_v31 = vpop.f32.mrf.mxu0  ;;  %v2416_v62 = vpop.f32.mrf.mxu1  ;;  %1237 = vmatpush1.msra.mxu0 %v1117_v10  ;;  %1308 = vmatpush1.msra.mxu1 %v1119_v51  ;;  %v669_v11 = vadd.f32 %v2683_v25, %v2404_v21  ;;  %v2684_v10 = vld [vmem:[#allocation7_spill] sm:$0xff]  ;;  %v1094_v1 = vmax.f32 %v514_v47, 0.0  ;;  %v1096_v9 = vmax.f32 %v675_v54, 0.0  ;;  %v1095_v25 = vmax.f32 %v673_v2, 0.0 }
 0x12e   : > { %1238 = vmatprep.subr.mxu0 %v1110_v17  ;;  %1309 = vmatprep.subr.mxu1 %v1112_v0  ;;  %v506_v51 = vadd.f32 %v2684_v10, %v2404_v21  ;;  %v663_v17 = vadd.f32 %v2687_v29, %v2418_v61  ;;  %v1093_v0 = vmax.f32 %v512_v22, 0.0  ;;  %v2688_v10 = vld [vmem:[#allocation3_spill] sm:$0xff]  ;;  %v661_v42 = vadd.f32 %v2689_v4, %v2418_v61 }
 0x12f   : > { %v2424_v8 = vpop.f32.mrf.mxu0  ;;  %v2426_v39 = vpop.f32.mrf.mxu1  ;;  %1239 = vmatpush1.msra.mxu0 %v1109_v55  ;;  %1310 = vmatpush1.msra.mxu1 %v1111_v16  ;;  %v500_v6 = vadd.f32 %v2688_v10, %v2418_v61  ;;  %v1086_v63 = vmax.f32 %v508_v33, 0.0  ;;  %v1088_v29 = vmax.f32 %v669_v11, 0.0  ;;  %v1087_v2 = vmax.f32 %v667_v18, 0.0 }
 0x130   : > { %1240 = vmatprep.subr.mxu0 %v1102_v12  ;;  %1311 = vmatprep.subr.mxu1 %v1104_v45  ;;  %v1085_v22 = vmax.f32 %v506_v51, 0.0  ;;  %v1078_v12 = vmax.f32 %v502_v14, 0.0  ;;  %v1080_v45 = vmax.f32 %v663_v17, 0.0  ;;  %v1079_v11 = vmax.f32 %v661_v42, 0.0 }
 0x131   : > { %v2436_v55 = vpop.f32.mrf.mxu0  ;;  %v2438_v16 = vpop.f32.mrf.mxu1  ;;  %1241 = vmatpush1.msra.mxu0 %v1101_v52  ;;  %1312 = vmatpush1.msra.mxu1 %v1103_v60  ;;  %v1077_v33 = vmax.f32 %v500_v6, 0.0  ;;  %v2691_v14 = vmov 0.0  }
 0x132   : > { %1242 = vmatprep.subr.mxu0 %v1094_v1  ;;  %1313 = vmatprep.subr.mxu1 %v1096_v9  ;;  %v2455_v1 = vld [vmem:[%s2601_s3] sm:$0x1] }
 0x133   : > { %v2444_v47 = vpop.f32.mrf.mxu0  ;;  %v2446_v54 = vpop.f32.mrf.mxu1  ;;  %1243 = vmatpush1.msra.mxu0 %v1093_v0  ;;  %1314 = vmatpush1.msra.mxu1 %v1095_v25  ;;  %2690 = vst [vmem:[#allocation15_spill] sm:$0xff] %v2455_v1 }
 0x134   : > { %1244 = vmatprep.subr.mxu0 %v1086_v63  ;;  %1315 = vmatprep.subr.mxu1 %v1088_v29 }
 0x135   : > { %v2448_v52 = vpop.f32.mrf.mxu0  ;;  %v2450_v60 = vpop.f32.mrf.mxu1  ;;  %1245 = vmatpush1.msra.mxu0 %v1085_v22  ;;  %1316 = vmatpush1.msra.mxu1 %v1087_v2 }
 0x136   : > { %1246 = vmatprep.subr.mxu0 %v1078_v12  ;;  %1317 = vmatprep.subr.mxu1 %v1080_v45 }
 0x137   : > { %v2457_v51 = vpop.f32.mrf.mxu0  ;;  %v2459_v18 = vpop.f32.mrf.mxu1  ;;  %1247 = vmatpush1.msra.mxu0 %v1077_v33  ;;  %1318 = vmatpush1.msra.mxu1 %v1079_v11 }
 0x138   : > { %1281 = vmatmul.mubr.f32.vlgmr.msra.gmra.mxu0 %v2455_v1  ;;  %1352 = vmatmul.mubr.f32.vlgmr.msra.gmra.mxu1 %v2455_v1 }
 0x139   : > { %v2463_v63 = vpop.f32.mrf.mxu0  ;;  %v2465_v42 = vpop.f32.mrf.mxu1  ;;  %1422 = vmatprep.mubr.f32.mxu0 %v2691_v14  ;;  %1493 = vmatprep.mubr.f32.mxu1 %v2691_v14 }
 0x13b   : > { %v2469_v17 = vpop.f32.mrf.mxu0  ;;  %v2471_v9 = vpop.f32.mrf.mxu1 }
 0x13d   : > { %v2473_v0 = vpop.f32.mrf.mxu0  ;;  %v2475_v25 = vpop.f32.mrf.mxu1 }
 0x13f   : > { %v883_v10 = vpop.f32.mrf.mxu0  ;;  %v1044_v6 = vpop.f32.mrf.mxu1 }
 0x141   : > { %v887_v4 = vpop.f32.mrf.mxu0  ;;  %v1048_v29 = vpop.f32.mrf.mxu1 }
 0x143   : > { %v889_v22 = vpop.f32.mrf.mxu0  ;;  %v1050_v2 = vpop.f32.mrf.mxu1 }
 0x145   : > { %v893_v12 = vpop.f32.mrf.mxu0  ;;  %v1054_v45 = vpop.f32.mrf.mxu1 }
 0x147   : > { %v895_v33 = vpop.f32.mrf.mxu0  ;;  %v1056_v11 = vpop.f32.mrf.mxu1 }
 0x149   : > { %v899_v1 = vpop.f32.mrf.mxu0  ;;  %v1060_v14 = vpop.f32.mrf.mxu1 }
 0x14a   : > { %v900_v13 = vadd.f32 %v899_v1, %v2244_v30  ;;  %v1043_v1 = vadd.f32 %v2475_v25, %v2252_v44 }
 0x14b   : > { %v901_v61 = vpop.f32.mrf.mxu0  ;;  %v1062_v48 = vpop.f32.mrf.mxu1 }
 0x14c   : > { %v902_v15 = vadd.f32 %v901_v61, %v2244_v30 }
 0x14d   : > { %v905_v49 = vpop.f32.mrf.mxu0  ;;  %v1066_v34 = vpop.f32.mrf.mxu1 }
 0x14e   : > { %v906_v37 = vadd.f32 %v905_v49, %v2693_v26  ;;  %v1067_v20 = vadd.f32 %v1066_v34, %v2693_v26  ;;  %v894_v34 = vadd.f32 %v893_v12, %v2248_v38 }
 0x14f   : > { %v907_v27 = vpop.f32.mrf.mxu0  ;;  %v1068_v21 = vpop.f32.mrf.mxu1 }
 0x150   : > { %v908_v35 = vadd.f32 %v907_v27, %v2693_v26  ;;  %v1069_v7 = vadd.f32 %v1068_v21, %v2693_v26  ;;  %v1061_v27 = vadd.f32 %v1060_v14, %v2244_v30  ;;  %v1193_v26 = vmax.f32 %v906_v37, 0.0 }
 0x151   : > { %v911_v41 = vpop.f32.mrf.mxu0  ;;  %v1072_v50 = vpop.f32.mrf.mxu1 }
 0x152   : > { %v912_v57 = vadd.f32 %v911_v41, %v2692_v36  ;;  %v1073_v3 = vadd.f32 %v1072_v50, %v2692_v36  ;;  %v1063_v41 = vadd.f32 %v1062_v48, %v2244_v30  ;;  %v1196_v49 = vmax.f32 %v1069_v7, 0.0 }
 0x153   : > { %v913_v59 = vpop.f32.mrf.mxu0  ;;  %v1074_v56 = vpop.f32.mrf.mxu1  ;;  %v1055_v48 = vadd.f32 %v1054_v45, %v2248_v38  ;;  %v890_v30 = vadd.f32 %v889_v22, %v2250_v43  ;;  %v1049_v7 = vadd.f32 %v1048_v29, %v2250_v43  ;;  %v1187_v61 = vmax.f32 %v1061_v27, 0.0 }
 0x154   : > { %v914_v24 = vadd.f32 %v913_v59, %v2692_v36  ;;  %v1075_v58 = vadd.f32 %v1074_v56, %v2692_v36  ;;  %v1201_v5 = vmax.f32 %v912_v57, 0.0  ;;  %v1203_v21 = vmax.f32 %v1073_v3, 0.0 }
 0x155   : > { %v896_v59 = vadd.f32 %v895_v33, %v2248_v38  ;;  %v1057_v36 = vadd.f32 %v1056_v11, %v2248_v38  ;;  %v1194_v56 = vmax.f32 %v908_v35, 0.0  ;;  %v1051_v57 = vadd.f32 %v1050_v2, %v2250_v43 }
 0x156   : > { %v1202_v32 = vmax.f32 %v914_v24, 0.0  ;;  %v1204_v50 = vmax.f32 %v1075_v58, 0.0  ;;  %v1195_v58 = vmax.f32 %v1067_v20, 0.0  ;;  %v1186_v24 = vmax.f32 %v902_v15, 0.0 }
 0x157   : > { %v1188_v3 = vmax.f32 %v1063_v41, 0.0  ;;  %v888_v35 = vadd.f32 %v887_v4, %v2250_v43  ;;  %v884_v38 = vadd.f32 %v883_v10, %v2252_v44  ;;  %v1045_v20 = vadd.f32 %v1044_v6, %v2252_v44 }
 0x158   : > { %1358 = vmatprep.subr.mxu0 %v1202_v32  ;;  %1429 = vmatprep.subr.mxu1 %v1204_v50  ;;  %v1185_v32 = vmax.f32 %v900_v13, 0.0  ;;  %v1178_v37 = vmax.f32 %v896_v59, 0.0  ;;  %v882_v15 = vadd.f32 %v2473_v0, %v2252_v44  ;;  %v1177_v4 = vmax.f32 %v894_v34, 0.0 }
 0x159   : > { %1359 = vmatpush1.msra.mxu0 %v1201_v5  ;;  %1430 = vmatpush1.msra.mxu1 %v1203_v21  ;;  %v1180_v5 = vmax.f32 %v1057_v36, 0.0  ;;  %v1179_v43 = vmax.f32 %v1055_v48, 0.0  ;;  %v878_v13 = vadd.f32 %v2469_v17, %v2256_v53  ;;  %v1039_v10 = vadd.f32 %v2471_v9, %v2256_v53  ;;  %v2694_v21 = vld [vmem:[#allocation20_spill] sm:$0xff]  ;;  %v2697_v48 = vld [vmem:[#allocation38_spill] sm:$0xff] }
 0x15a   : > { %1360 = vmatprep.subr.mxu0 %v1194_v56  ;;  %1431 = vmatprep.subr.mxu1 %v1196_v49  ;;  %v1170_v6 = vmax.f32 %v890_v30, 0.0  ;;  %v1172_v29 = vmax.f32 %v1051_v57, 0.0  ;;  %v876_v0 = vadd.f32 %v2463_v63, %v2256_v53  ;;  %v1037_v44 = vadd.f32 %v2465_v42, %v2256_v53  ;;  %v2695_v56 = vld [vmem:[#allocation21_spill] sm:$0xff]  ;;  %v2696_v49 = vld [vmem:[#allocation19_spill] sm:$0xff] }
 0x15b   : > { %1361 = vmatpush1.msra.mxu0 %v1193_v26  ;;  %1432 = vmatpush1.msra.mxu1 %v1195_v58  ;;  %v1169_v25 = vmax.f32 %v888_v35, 0.0  ;;  %v1171_v22 = vmax.f32 %v1049_v7, 0.0  ;;  %v872_v17 = vadd.f32 %v2457_v51, %v2268_v46  ;;  %v1033_v9 = vadd.f32 %v2459_v18, %v2268_v46  ;;  %v2698_v26 = vld [vmem:[#allocation44_spill] sm:$0xff]  ;;  %v2699_v58 = vld [vmem:[#allocation45_spill] sm:$0xff]  ;;  %v2701_v7 = vld [vmem:[#allocation42_spill] sm:$0xff] }
 0x15c   : > { %1362 = vmatprep.subr.mxu0 %v1186_v24  ;;  %1433 = vmatprep.subr.mxu1 %v1188_v3  ;;  %v1162_v2 = vmax.f32 %v884_v38, 0.0  ;;  %v1164_v12 = vmax.f32 %v1045_v20, 0.0  ;;  %v870_v63 = vadd.f32 %v2448_v52, %v2268_v46  ;;  %v1031_v53 = vadd.f32 %v2450_v60, %v2268_v46  ;;  %v2700_v3 = vld [vmem:[#allocation41_spill] sm:$0xff]  ;;  %v2702_v38 = vld [vmem:[#allocation43_spill] sm:$0xff] }
 0x15d   : > { %1363 = vmatpush1.msra.mxu0 %v1185_v32  ;;  %1434 = vmatpush1.msra.mxu1 %v1187_v61  ;;  %v1161_v42 = vmax.f32 %v882_v15, 0.0  ;;  %v1163_v45 = vmax.f32 %v1043_v1, 0.0  ;;  %v866_v51 = vadd.f32 %v2444_v47, %v2286_v40  ;;  %v1027_v18 = vadd.f32 %v2446_v54, %v2286_v40  ;;  %v2703_v20 = vld [vmem:[#allocation39_spill] sm:$0xff] }
 0x15e   : > { %1364 = vmatprep.subr.mxu0 %v1178_v37  ;;  %1435 = vmatprep.subr.mxu1 %v1180_v5  ;;  %v1154_v33 = vmax.f32 %v878_v13, 0.0  ;;  %v1156_v11 = vmax.f32 %v1039_v10, 0.0  ;;  %v864_v52 = vadd.f32 %v2436_v55, %v2286_v40  ;;  %v1025_v46 = vadd.f32 %v2438_v16, %v2286_v40  ;;  %v2704_v5 = vld [vmem:[#allocation40_spill] sm:$0xff]  ;;  %v2706_v10 = vld [vmem:[#allocation37_spill] sm:$0xff] }
 0x15f   : > { %1365 = vmatpush1.msra.mxu0 %v1177_v4  ;;  %1436 = vmatpush1.msra.mxu1 %v1179_v43  ;;  %v1153_v60 = vmax.f32 %v876_v0, 0.0  ;;  %v1155_v14 = vmax.f32 %v1037_v44, 0.0  ;;  %v860_v47 = vadd.f32 %v2424_v8, %v2298_v28  ;;  %v1021_v54 = vadd.f32 %v2426_v39, %v2298_v28  ;;  %v2705_v43 = vld [vmem:[#allocation36_spill] sm:$0xff]  ;;  %v2707_v44 = vld [vmem:[#allocation46_spill] sm:$0xff] }
 0x160   : > { %1366 = vmatprep.subr.mxu0 %v1170_v6  ;;  %1437 = vmatprep.subr.mxu1 %v1172_v29  ;;  %v1146_v41 = vmax.f32 %v872_v17, 0.0  ;;  %v1148_v50 = vmax.f32 %v1033_v9, 0.0  ;;  %v858_v55 = vadd.f32 %v2414_v31, %v2298_v28  ;;  %v1019_v40 = vadd.f32 %v2416_v62, %v2298_v28  ;;  %v2709_v17 = vld [vmem:[#allocation35_spill] sm:$0xff] }
 0x161   : > { %1367 = vmatpush1.msra.mxu0 %v1169_v25  ;;  %1438 = vmatpush1.msra.mxu1 %v1171_v22  ;;  %v1145_v16 = vmax.f32 %v870_v63, 0.0  ;;  %v1147_v27 = vmax.f32 %v1031_v53, 0.0  ;;  %v854_v8 = vadd.f32 %v2400_v23, %v2324_v19  ;;  %v1015_v39 = vadd.f32 %v2694_v21, %v2324_v19  ;;  %v2708_v25 = vld [vmem:[#allocation34_spill] sm:$0xff]  ;;  %v2710_v63 = vld [vmem:[#allocation32_spill] sm:$0xff] }
 0x162   : > { %1368 = vmatprep.subr.mxu0 %v1162_v2  ;;  %1439 = vmatprep.subr.mxu1 %v1164_v12  ;;  %v1138_v59 = vmax.f32 %v866_v51, 0.0  ;;  %v1140_v36 = vmax.f32 %v1027_v18, 0.0  ;;  %v852_v31 = vadd.f32 %v2695_v56, %v2324_v19  ;;  %v1013_v28 = vadd.f32 %v2696_v49, %v2324_v19 }
 0x163   : > { %1369 = vmatpush1.msra.mxu0 %v1161_v42  ;;  %1440 = vmatpush1.msra.mxu1 %v1163_v45  ;;  %v1137_v62 = vmax.f32 %v864_v52, 0.0  ;;  %v1139_v34 = vmax.f32 %v1025_v46, 0.0  ;;  %v848_v23 = vadd.f32 %v2698_v26, %v2697_v48  ;;  %v1009_v30 = vadd.f32 %v2699_v58, %v2697_v48  ;;  %v2711_v42 = vld [vmem:[#allocation33_spill] sm:$0xff]  ;;  %v2714_v46 = vld [vmem:[#allocation31_spill] sm:$0xff] }
 0x164   : > { %1370 = vmatprep.subr.mxu0 %v1154_v33  ;;  %1441 = vmatprep.subr.mxu1 %v1156_v11  ;;  %v1130_v57 = vmax.f32 %v860_v47, 0.0  ;;  %v1132_v24 = vmax.f32 %v1021_v54, 0.0  ;;  %v846_v35 = vadd.f32 %v2700_v3, %v2697_v48  ;;  %v1007_v19 = vadd.f32 %v2701_v7, %v2697_v48  ;;  %v2712_v33 = vld [vmem:[#allocation17_spill] sm:$0xff]  ;;  %v2713_v11 = vld [vmem:[#allocation30_spill] sm:$0xff]  ;;  %v2715_v54 = vld [vmem:[#allocation28_spill] sm:$0xff] }
 0x165   : > { %1371 = vmatpush1.msra.mxu0 %v1153_v60  ;;  %1442 = vmatpush1.msra.mxu1 %v1155_v14  ;;  %v1129_v32 = vmax.f32 %v858_v55, 0.0  ;;  %v1131_v61 = vmax.f32 %v1019_v40, 0.0  ;;  %v842_v37 = vadd.f32 %v2703_v20, %v2702_v38  ;;  %v1003_v15 = vadd.f32 %v2704_v5, %v2702_v38  ;;  %v2722_v7 = vld [vmem:[#allocation15_spill] sm:$0xff] }
 0x166   : > { %1372 = vmatprep.subr.mxu0 %v1146_v41  ;;  %1443 = vmatprep.subr.mxu1 %v1148_v50  ;;  %v1122_v1 = vmax.f32 %v854_v8, 0.0  ;;  %v1124_v4 = vmax.f32 %v1015_v39, 0.0  ;;  %v840_v13 = vadd.f32 %v2705_v43, %v2702_v38  ;;  %v1001_v6 = vadd.f32 %v2706_v10, %v2702_v38  ;;  %v2716_v50 = vld [vmem:[#allocation29_spill] sm:$0xff]  ;;  %v2718_v8 = vld [vmem:[#allocation26_spill] sm:$0xff]  ;;  %v2719_v39 = vld [vmem:[#allocation27_spill] sm:$0xff] }
 0x167   : > { %1373 = vmatpush1.msra.mxu0 %v1145_v16  ;;  %1444 = vmatpush1.msra.mxu1 %v1147_v27  ;;  %v1121_v29 = vmax.f32 %v852_v31, 0.0  ;;  %v1123_v0 = vmax.f32 %v1013_v28, 0.0  ;;  %v836_v22 = vadd.f32 %v2708_v25, %v2707_v44  ;;  %v997_v9 = vadd.f32 %v2709_v17, %v2707_v44  ;;  %v2717_v27 = vld [vmem:[#allocation18_spill] sm:$0xff]  ;;  %v2720_v31 = vld [vmem:[#allocation24_spill] sm:$0xff]  ;;  %v2721_v28 = vld [vmem:[#allocation25_spill] sm:$0xff] }
 0x168   : > { %1374 = vmatprep.subr.mxu0 %v1138_v59  ;;  %1445 = vmatprep.subr.mxu1 %v1140_v36  ;;  %v1114_v2 = vmax.f32 %v848_v23, 0.0  ;;  %v1116_v12 = vmax.f32 %v1009_v30, 0.0  ;;  %v834_v53 = vadd.f32 %v2710_v63, %v2707_v44  ;;  %v995_v45 = vadd.f32 %v2711_v42, %v2707_v44 }
 0x169   : > { %1375 = vmatpush1.msra.mxu0 %v1137_v62  ;;  %1446 = vmatpush1.msra.mxu1 %v1139_v34  ;;  %v1113_v51 = vmax.f32 %v846_v35, 0.0  ;;  %v1115_v18 = vmax.f32 %v1007_v19, 0.0  ;;  %v830_v52 = vadd.f32 %v2713_v11, %v2712_v33  ;;  %v991_v60 = vadd.f32 %v2714_v46, %v2712_v33 }
 0x16a   : > { %1376 = vmatprep.subr.mxu0 %v1130_v57  ;;  %1447 = vmatprep.subr.mxu1 %v1132_v24  ;;  %v1106_v14 = vmax.f32 %v842_v37, 0.0  ;;  %v1108_v47 = vmax.f32 %v1003_v15, 0.0  ;;  %v828_v41 = vadd.f32 %v2715_v54, %v2712_v33  ;;  %v989_v55 = vadd.f32 %v2716_v50, %v2712_v33  ;;  %v1210_v37 = vpop.permute.xlu0 %1209 }
 0x16b   : > { %1377 = vmatpush1.msra.mxu0 %v1129_v32  ;;  %1448 = vmatpush1.msra.mxu1 %v1131_v61  ;;  %v1105_v40 = vmax.f32 %v840_v13, 0.0  ;;  %v1107_v16 = vmax.f32 %v1001_v6, 0.0  ;;  %v824_v21 = vadd.f32 %v2718_v8, %v2717_v27  ;;  %v985_v59 = vadd.f32 %v2719_v39, %v2717_v27 }
 0x16c   : > { %1378 = vmatprep.subr.mxu0 %v1122_v1  ;;  %1449 = vmatprep.subr.mxu1 %v1124_v4  ;;  %v1098_v36 = vmax.f32 %v836_v22, 0.0  ;;  %v1100_v56 = vmax.f32 %v997_v9, 0.0  ;;  %v822_v49 = vadd.f32 %v2720_v31, %v2717_v27  ;;  %v983_v62 = vadd.f32 %v2721_v28, %v2717_v27 }
 0x16d   : > { %1379 = vmatpush1.msra.mxu0 %v1121_v29  ;;  %1450 = vmatpush1.msra.mxu1 %v1123_v0  ;;  %v1097_v34 = vmax.f32 %v834_v53, 0.0  ;;  %v1099_v48 = vmax.f32 %v995_v45, 0.0  ;;  %v1090_v26 = vmax.f32 %v830_v52, 0.0  ;;  %v1092_v23 = vmax.f32 %v991_v60, 0.0 }
 0x16e   : > { %1380 = vmatprep.subr.mxu0 %v1114_v2  ;;  %1451 = vmatprep.subr.mxu1 %v1116_v12  ;;  %v1089_v58 = vmax.f32 %v828_v41, 0.0  ;;  %v1091_v30 = vmax.f32 %v989_v55, 0.0  ;;  %v1082_v57 = vmax.f32 %v824_v21, 0.0  ;;  %v1084_v24 = vmax.f32 %v985_v59, 0.0 }
 0x16f   : > { %1381 = vmatpush1.msra.mxu0 %v1113_v51  ;;  %1452 = vmatpush1.msra.mxu1 %v1115_v18  ;;  %v1081_v3 = vmax.f32 %v822_v49, 0.0  ;;  %v1083_v35 = vmax.f32 %v983_v62, 0.0  ;;  %v1212_v19 = vlaneseq  ;;  %v1770_v5 = vmov 1966171168  }
 0x170   : > { %1382 = vmatprep.subr.mxu0 %v1106_v14  ;;  %1453 = vmatprep.subr.mxu1 %v1108_v47  ;;  %v1513_v15 = vunpack.c.l.s4 %v1770_v5 }
 0x171   : > { %1383 = vmatpush1.msra.mxu0 %v1105_v40  ;;  %1454 = vmatpush1.msra.mxu1 %v1107_v16  ;;  %v1213_v32 = vshrl.u32 %v1212_v19, 7 }
 0x172   : > { %1384 = vmatprep.subr.mxu0 %v1098_v36  ;;  %1455 = vmatprep.subr.mxu1 %v1100_v56  ;;  %v1514_v13 = vunpack.c.0.s8 %v1513_v15 }
 0x173   : > { %1385 = vmatpush1.msra.mxu0 %v1097_v34  ;;  %1456 = vmatpush1.msra.mxu1 %v1099_v48  ;;  %v1214_v20 = vsub.s32 0, %v1213_v32 }
 0x174   : > { %1386 = vmatprep.subr.mxu0 %v1090_v26  ;;  %1457 = vmatprep.subr.mxu1 %v1092_v23  ;;  %v1517_v44 = vsub.s32 %v1514_v13, %v1213_v32 }
 0x175   : > { %1387 = vmatpush1.msra.mxu0 %v1089_v58  ;;  %1458 = vmatpush1.msra.mxu1 %v1091_v30  ;;  %v1215_v43 = vrot.slane %v1210_v37, %v1214_v20 }
 0x176   : > { %1388 = vmatprep.subr.mxu0 %v1082_v57  ;;  %1459 = vmatprep.subr.mxu1 %v1084_v24 }
 0x177   : > { %1389 = vmatpush1.msra.mxu0 %v1081_v3  ;;  %1460 = vmatpush1.msra.mxu1 %v1083_v35 }
 0x178   : > { %1423 = vmatmul.mubr.f32.vlgmr.msra.gmra.mxu0 %v2722_v7  ;;  %1494 = vmatmul.mubr.f32.vlgmr.msra.gmra.mxu1 %v2722_v7 }
 0x1f8   : > { %v1282_v61 = vpop.f32.mrf.mxu0  ;;  %v1353_v38 = vpop.f32.mrf.mxu1 }
 0x1f9   : > { %v1283_v29 = vadd.f32 %v1282_v61, %v1215_v43  ;;  %v1354_v0 = vadd.f32 %v1353_v38, %v1215_v43 }
 0x1fa   : > { %v1284_v1 = vpop.f32.mrf.mxu0  ;;  %v1355_v4 = vpop.f32.mrf.mxu1 }
 0x1fb   : > { %v1285_v10 = vadd.f32 %v1284_v1, %v1215_v43  ;;  %v1356_v6 = vadd.f32 %v1355_v4, %v1215_v43 }
 0x1fd   : > { %v1508_v25 = vcombine.low %v1283_v29, %v1285_v10  ;;  %v1509_v22 = vcombine.low %v1354_v0, %v1356_v6 }
 0x1ff   : > { %v1518_v2 = vrot.slane %v1508_v25, %v1517_v44  ;;  %v1525_v12 = vrot.slane %v1509_v22, %v1517_v44 }
 0x201   : > { %v1540_v52 = vcombine.low %v1518_v2, %v1525_v12 }
 0x203   : > { %v1548_v47 = vrot.slane %v1540_v52, %v1517_v44 }
 0x238   : > { %v1424_v17 = vpop.f32.mrf.mxu0  ;;  %v1495_v9 = vpop.f32.mrf.mxu1 }
 0x239   : > { %v1425_v42 = vadd.f32 %v1424_v17, %v1215_v43  ;;  %v1496_v45 = vadd.f32 %v1495_v9, %v1215_v43 }
 0x23a   : > { %v1426_v63 = vpop.f32.mrf.mxu0  ;;  %v1497_v53 = vpop.f32.mrf.mxu1 }
 0x23b   : > { %v1427_v51 = vadd.f32 %v1426_v63, %v1215_v43  ;;  %v1498_v18 = vadd.f32 %v1497_v53, %v1215_v43 }
 0x23d   : > { %v1510_v33 = vcombine.low %v1425_v42, %v1427_v51  ;;  %v1511_v11 = vcombine.low %v1496_v45, %v1498_v18 }
 0x23f   : > { %v1532_v46 = vrot.slane %v1510_v33, %v1517_v44  ;;  %v1539_v60 = vrot.slane %v1511_v11, %v1517_v44 }
 0x241   : > { %v1541_v14 = vcombine.low %v1532_v46, %v1539_v60 }
 0x243   : > { %v1555_v54 = vrot.slane %v1541_v14, %v1517_v44 }
 0x245   : > { %v1556_v41 = vcombine.low %v1548_v47, %v1555_v54 }
 0x247   : > { %1558 = vst [vmem:[%s262_s30] sm:$0xff] %v1556_v41 }
 0x248 PF: > { %s17_s22 = sadd.s32 1, %s1766_s22   ;;  %s2723_s20 = smov %s1762_s21 }
 0x249   : > { %p14_p5 = scmp.ge.s32.totalorder %s17_s22, 4   ;;  %s2724_s21 = smov %s2726_s4 }
 0x24b   :  { %16 = sbr.rel (!%p14_p5) target bundleno = 3 (0x3), region = 70 }

</bundles_post_ra>
